<compile_context>
chip_gen: v5e
topology: v5e:2x2
jax: 0.10.0
libtpu: 0.0.40
codegen_flags: <defaults>
</compile_context>

<pallas_src>
import functools

import jax
import jax.numpy as jnp
from jax import lax
from jax.experimental import pallas as pl
from jax.experimental.pallas import tpu as pltpu


# Fixed geometry of the module (28x28 input, 5x5 conv stride 2, 2x2 maxpool).
_K = 5            # conv kernel size
_S = 2            # conv stride
_OH = 12          # conv output spatial: (28 - 5)//2 + 1
_PH = 6           # pooled spatial
_NPOS = _PH * _PH  # 36 pooled positions per image
_KPAD = 32        # conv GEMM contraction dim, 25 -> 32
_CPAD = 32        # conv channels, 20 -> 32
_F1PAD = 512      # fc1 width, 500 -> 512
_F2PAD = 128      # logits, 10 -> 128 (lane-dense output)


# ----------------------------- Pallas kernel --------------------------------

def _fused_net_kernel(patches_ref, wc_ref, bc_ref, w1_ref, b1_ref, w2_ref,
                      b2_ref, out_ref, pool_ref, *, tb):
    """Full Net forward for one batch tile of `tb` images.

    patches_ref: [1, 4, 36*tb, 32] bf16  im2col patches; leading 4 = the four
                 conv-output taps of each 2x2 pool window; rows ordered
                 (pool_pos, image); trailing 32 = conv taps (25) zero-padded.
    wc_ref:      [32, 32]       bf16  conv weight (K and C zero-padded)
    bc_ref:      [1, 32]        f32   conv bias
    w1_ref:      [36, 32, 512]  bf16  fc1 weight per pooled position
    b1_ref:      [1, 512]       f32   fc1 bias
    w2_ref:      [512, 128]     bf16  fc2 weight
    b2_ref:      [1, 128]       f32   fc2 bias
    out_ref:     [tb, 128]      f32   padded logits (lane-dense store)
    pool_ref:    [36*tb, 32]    f32   VMEM scratch for pooled activations
    """
    wc = wc_ref[...]
    # Conv GEMM: one dot per pool-window tap; the 2x2 maxpool is then a pure
    # elementwise VPU max of the four results (lanes = channels).
    h = jnp.dot(patches_ref[0, 0], wc, preferred_element_type=jnp.float32)
    for t in range(1, 4):
        h = jnp.maximum(
            h, jnp.dot(patches_ref[0, t], wc, preferred_element_type=jnp.float32))
    # Shared bias + ReLU (bias add and ReLU commute with the max).
    pool_ref[...] = jnp.maximum(h + bc_ref[...], 0.0)          # [36*tb, 32]

    # fc1: z[b, :] = sum_p pooled[pos=p, image=b, :] @ W1[p].
    # Rows of pool_ref are (pool_pos, image), so each per-position slice is a
    # contiguous, sublane-aligned [tb, 32] block (tb is a multiple of 8).
    acc = jnp.zeros((tb, _F1PAD), jnp.float32) + b1_ref[...]
    for p in range(_NPOS):
        xp = pool_ref[pl.ds(p * tb, tb), :].astype(jnp.bfloat16)
        acc = acc + jnp.dot(xp, w1_ref[p], preferred_element_type=jnp.float32)
    z = jnp.maximum(acc, 0.0).astype(jnp.bfloat16)              # [tb, 512]

    # fc2 (output padded to 128 lanes -> unmasked, lane-dense store).
    out_ref[...] = (jnp.dot(z, w2_ref[...], preferred_element_type=jnp.float32)
                    + b2_ref[...])


# ------------------------------- JAX glue ------------------------------------

def _pick_batch_tile(b_pad):
    for tb in (128, 64, 32, 16, 8):
        if b_pad % tb == 0:
            return tb
    return b_pad  # unreachable: b_pad is always a multiple of 8


def _im2col_tiles(images, b_pad, tb):
    """NCHW [B,1,28,28] -> [b_pad//tb, 4, 36*tb, 32] bf16 patches.

    Leading dim 4 indexes the 2x2 pool-window tap (dh, dw); rows within a tile
    are ordered (pool_pos, image); trailing 32 is the (kh, kw) conv tap padded
    from 25 to 32 with zeros.
    """
    b = images.shape[0]
    x = images
    if b_pad != b:
        x = jnp.pad(x, ((0, b_pad - b), (0, 0), (0, 0), (0, 0)))
    taps = []
    for kh in range(_K):
        for kw in range(_K):
            taps.append(x[:, 0, kh:kh + _S * _OH:_S, kw:kw + _S * _OH:_S])
    p = jnp.stack(taps, axis=-1)                           # [b_pad, 12, 12, 25]
    p = jnp.pad(p, ((0, 0), (0, 0), (0, 0), (0, _KPAD - _K * _K)))
    p = p.reshape(b_pad, _PH, 2, _PH, 2, _KPAD)            # b, ph, dh, pw, dw, k
    p = jnp.transpose(p, (0, 2, 4, 1, 3, 5))               # b, dh, dw, ph, pw, k
    p = p.reshape(b_pad // tb, tb, 4, _NPOS, _KPAD)        # tile, bl, tap, pos, k
    p = jnp.transpose(p, (0, 2, 3, 1, 4))                  # tile, tap, pos, bl, k
    return p.reshape(b_pad // tb, 4, _NPOS * tb, _KPAD).astype(jnp.bfloat16)


def init_params(key):
    ks = jax.random.split(key, 6)
    return {
        "conv_w": jax.random.normal(ks[0], (20, 1, 5, 5), jnp.float32) * 0.1,
        "conv_b": jax.random.normal(ks[1], (20,), jnp.float32) * 0.1,
        "fc1_w": jax.random.normal(ks[2], (500, 720), jnp.float32) * 0.05,
        "fc1_b": jax.random.normal(ks[3], (500,), jnp.float32) * 0.05,
        "fc2_w": jax.random.normal(ks[4], (10, 500), jnp.float32) * 0.05,
        "fc2_b": jax.random.normal(ks[5], (10,), jnp.float32) * 0.05,
    }


def prepare_params(params):
    """One-time parameter preprocessing (hoisted OUT of the forward pass):
    pad to lane/sublane-friendly shapes, permute fc1 from PyTorch's (C,H,W)
    flatten order to the kernel's (pool_pos, channel) layout, and cast matmul
    weights to bf16. All padded rows/cols are zero, so padded lanes stay zero
    through ReLU and don't perturb the real 720/500/10 features."""
    wc = jnp.zeros((_KPAD, _CPAD), jnp.float32)
    wc = wc.at[:_K * _K, :20].set(params["conv_w"].reshape(20, _K * _K).T)
    bc = jnp.zeros((1, _CPAD), jnp.float32).at[0, :20].set(params["conv_b"])

    # fc1_w is [500, 720] with column index c*36 + pos (PyTorch CHW flatten).
    w1 = jnp.transpose(params["fc1_w"].reshape(500, 20, _NPOS), (2, 1, 0))
    w1 = jnp.pad(w1, ((0, 0), (0, _CPAD - 20), (0, _F1PAD - 500)))   # [36,32,512]
    b1 = jnp.zeros((1, _F1PAD), jnp.float32).at[0, :500].set(params["fc1_b"])

    w2 = jnp.pad(params["fc2_w"].T, ((0, _F1PAD - 500), (0, _F2PAD - 10)))
    b2 = jnp.zeros((1, _F2PAD), jnp.float32).at[0, :10].set(params["fc2_b"])

    return {"wc": wc.astype(jnp.bfloat16), "bc": bc,
            "w1": w1.astype(jnp.bfloat16), "b1": b1,
            "w2": w2.astype(jnp.bfloat16), "b2": b2}


def net_forward(prepared, images):
    """Reproduces Net.forward on batch['images'] (NCHW float32 [B,1,28,28])."""
    b = images.shape[0]
    b_pad = ((b + 7) // 8) * 8          # keep every batch tile sublane-aligned
    tb = _pick_batch_tile(b_pad)
    num_tiles = b_pad // tb

    # TODO(synk): im2col stays in XLA glue; at very large batch on v5e it could
    # move in-kernel (25 strided reads of the image block) to cut HBM traffic.
    patches = _im2col_tiles(images, b_pad, tb)   # [num_tiles, 4, 36*tb, 32] bf16

    out = pl.pallas_call(
        functools.partial(_fused_net_kernel, tb=tb),
        out_shape=jax.ShapeDtypeStruct((b_pad, _F2PAD), jnp.float32),
        grid_spec=pltpu.PrefetchScalarGridSpec(
            num_scalar_prefetch=0,
            grid=(num_tiles,),
            in_specs=[
                pl.BlockSpec((1, 4, _NPOS * tb, _KPAD), lambda i: (i, 0, 0, 0)),
                pl.BlockSpec((_KPAD, _CPAD), lambda i: (0, 0)),
                pl.BlockSpec((1, _CPAD), lambda i: (0, 0)),
                pl.BlockSpec((_NPOS, _CPAD, _F1PAD), lambda i: (0, 0, 0)),
                pl.BlockSpec((1, _F1PAD), lambda i: (0, 0)),
                pl.BlockSpec((_F1PAD, _F2PAD), lambda i: (0, 0)),
                pl.BlockSpec((1, _F2PAD), lambda i: (0, 0)),
            ],
            out_specs=pl.BlockSpec((tb, _F2PAD), lambda i: (i, 0)),
            scratch_shapes=[pltpu.VMEM((_NPOS * tb, _CPAD), jnp.float32)],
        ),
        compiler_params=pltpu.CompilerParams(
            dimension_semantics=("parallel",),
            vmem_limit_bytes=32 * 1024 * 1024,
        ),
    )(patches, prepared["wc"], prepared["bc"], prepared["w1"], prepared["b1"],
      prepared["w2"], prepared["b2"])

    logits = out[:b, :10]
    # TODO(synk): trw.train.OutputClassification is a training-framework
    # wrapper (loss/metric bookkeeping); the "softmax" key carries raw logits.
    return {"softmax": logits}


def _reference_forward(params, images):
    """Pure-JAX f32 reference of the PyTorch forward (for a sanity check)."""
    b = images.shape[0]
    h = lax.conv(images, params["conv_w"], (2, 2), "VALID")        # NCHW/OIHW
    h = jax.nn.relu(h + params["conv_b"][None, :, None, None])     # [B,20,12,12]
    h = h.reshape(b, 20, 6, 2, 6, 2).max(axis=(3, 5))              # [B,20,6,6]
    flat = h.reshape(b, 720)                                       # CHW flatten
    z = jax.nn.relu(flat @ params["fc1_w"].T + params["fc1_b"])
    return z @ params["fc2_w"].T + params["fc2_b"]


if __name__ == "__main__":
    key = jax.random.PRNGKey(0)
    pkey, xkey = jax.random.split(key, 2)

    params = init_params(pkey)
    prepared = prepare_params(params)        # one-time prep, not per-forward
    images = jax.random.normal(xkey, (2, 1, 28, 28), jnp.float32)   # NCHW

    fwd = jax.jit(net_forward)
    out = fwd(prepared, images)
    logits = jax.block_until_ready(out["softmax"])
    assert logits.shape == (2, 10) and logits.dtype == jnp.float32

    ref = _reference_forward(params, images)
    err = float(jnp.max(jnp.abs(logits - ref)))
    assert err < 5e-2, f"max |kernel - reference| = {err}"
    print("KERNEL_OK")
</pallas_src>

<mosaic_0001>
module attributes {stable_mosaic.version = 11 : i64} {
  func.func @_fused_net_kernel(%arg0: i32, %arg1: memref<1x4x288x32xbf16, #tpu.memory_space<vmem>>, %arg2: memref<32x32xbf16, #tpu.memory_space<vmem>>, %arg3: memref<1x32xf32, #tpu.memory_space<vmem>>, %arg4: memref<36x32x512xbf16, #tpu.memory_space<vmem>>, %arg5: memref<1x512xf32, #tpu.memory_space<vmem>>, %arg6: memref<512x128xbf16, #tpu.memory_space<vmem>>, %arg7: memref<1x128xf32, #tpu.memory_space<vmem>>, %arg8: memref<8x128xf32, #tpu.memory_space<vmem>>, %arg9: memref<288x32xf32, #tpu.memory_space<vmem>>) attributes {dimension_semantics = [#tpu.dimension_semantics<parallel>], iteration_bounds = array<i64: 1>, scalar_prefetch = 0 : i64, scratch_operands = 1 : i64, tpu.core_type = #tpu.core_type<tc>, window_params = [{transform_indices = @transform_0, window_bounds = array<i64: 1, 4, 288, 32>}, {pipeline_mode = #tpu.pipeline_mode<synchronous>, transform_indices = @transform_1, window_bounds = array<i64: 32, 32>}, {pipeline_mode = #tpu.pipeline_mode<synchronous>, transform_indices = @transform_2, window_bounds = array<i64: 1, 32>}, {pipeline_mode = #tpu.pipeline_mode<synchronous>, transform_indices = @transform_3, window_bounds = array<i64: 36, 32, 512>}, {pipeline_mode = #tpu.pipeline_mode<synchronous>, transform_indices = @transform_4, window_bounds = array<i64: 1, 512>}, {pipeline_mode = #tpu.pipeline_mode<synchronous>, transform_indices = @transform_5, window_bounds = array<i64: 512, 128>}, {pipeline_mode = #tpu.pipeline_mode<synchronous>, transform_indices = @transform_6, window_bounds = array<i64: 1, 128>}, {transform_indices = @transform_7, window_bounds = array<i64: 8, 128>}]} {
    %c0 = arith.constant 0 : index
    %c0_0 = arith.constant 0 : index
    %0 = vector.load %arg2[%c0, %c0_0] : memref<32x32xbf16, #tpu.memory_space<vmem>>, vector<32x32xbf16>
    %c0_1 = arith.constant 0 : index
    %c0_2 = arith.constant 0 : index
    %c0_3 = arith.constant 0 : index
    %c0_4 = arith.constant 0 : index
    %1 = vector.load %arg1[%c0_1, %c0_2, %c0_3, %c0_4] : memref<1x4x288x32xbf16, #tpu.memory_space<vmem>>, vector<1x1x288x32xbf16>
    %2 = vector.shape_cast %1 : vector<1x1x288x32xbf16> to vector<288x32xbf16>
    %cst = arith.constant dense<0.000000e+00> : vector<288x32xf32>
    %3 = tpu.matmul %2, %0, %cst {dimension_numbers = #tpu.dot_dimension_numbers<[1], [0], [0], [1], [0, 0, 1, 1], [], []>} : vector<288x32xbf16>, vector<32x32xbf16>, vector<288x32xf32> -> vector<288x32xf32>
    %c0_5 = arith.constant 0 : index
    %c1 = arith.constant 1 : index
    %c0_6 = arith.constant 0 : index
    %c0_7 = arith.constant 0 : index
    %4 = vector.load %arg1[%c0_5, %c1, %c0_6, %c0_7] : memref<1x4x288x32xbf16, #tpu.memory_space<vmem>>, vector<1x1x288x32xbf16>
    %5 = vector.shape_cast %4 : vector<1x1x288x32xbf16> to vector<288x32xbf16>
    %cst_8 = arith.constant dense<0.000000e+00> : vector<288x32xf32>
    %6 = tpu.matmul %5, %0, %cst_8 {dimension_numbers = #tpu.dot_dimension_numbers<[1], [0], [0], [1], [0, 0, 1, 1], [], []>} : vector<288x32xbf16>, vector<32x32xbf16>, vector<288x32xf32> -> vector<288x32xf32>
    %7 = arith.maximumf %3, %6 : vector<288x32xf32>
    %c0_9 = arith.constant 0 : index
    %c2 = arith.constant 2 : index
    %c0_10 = arith.constant 0 : index
    %c0_11 = arith.constant 0 : index
    %8 = vector.load %arg1[%c0_9, %c2, %c0_10, %c0_11] : memref<1x4x288x32xbf16, #tpu.memory_space<vmem>>, vector<1x1x288x32xbf16>
    %9 = vector.shape_cast %8 : vector<1x1x288x32xbf16> to vector<288x32xbf16>
    %cst_12 = arith.constant dense<0.000000e+00> : vector<288x32xf32>
    %10 = tpu.matmul %9, %0, %cst_12 {dimension_numbers = #tpu.dot_dimension_numbers<[1], [0], [0], [1], [0, 0, 1, 1], [], []>} : vector<288x32xbf16>, vector<32x32xbf16>, vector<288x32xf32> -> vector<288x32xf32>
    %11 = arith.maximumf %7, %10 : vector<288x32xf32>
    %c0_13 = arith.constant 0 : index
    %c3 = arith.constant 3 : index
    %c0_14 = arith.constant 0 : index
    %c0_15 = arith.constant 0 : index
    %12 = vector.load %arg1[%c0_13, %c3, %c0_14, %c0_15] : memref<1x4x288x32xbf16, #tpu.memory_space<vmem>>, vector<1x1x288x32xbf16>
    %13 = vector.shape_cast %12 : vector<1x1x288x32xbf16> to vector<288x32xbf16>
    %cst_16 = arith.constant dense<0.000000e+00> : vector<288x32xf32>
    %14 = tpu.matmul %13, %0, %cst_16 {dimension_numbers = #tpu.dot_dimension_numbers<[1], [0], [0], [1], [0, 0, 1, 1], [], []>} : vector<288x32xbf16>, vector<32x32xbf16>, vector<288x32xf32> -> vector<288x32xf32>
    %15 = arith.maximumf %11, %14 : vector<288x32xf32>
    %c0_17 = arith.constant 0 : index
    %c0_18 = arith.constant 0 : index
    %16 = vector.load %arg3[%c0_17, %c0_18] : memref<1x32xf32, #tpu.memory_space<vmem>>, vector<1x32xf32>
    %17 = vector.broadcast %16 : vector<1x32xf32> to vector<288x32xf32>
    %18 = arith.addf %15, %17 : vector<288x32xf32>
    %cst_19 = arith.constant 0.000000e+00 : f32
    %19 = vector.broadcast %cst_19 : f32 to vector<288x32xf32>
    %20 = arith.maximumf %18, %19 : vector<288x32xf32>
    %c0_20 = arith.constant 0 : index
    %c0_21 = arith.constant 0 : index
    %21 = vector.load %arg9[%c0_20, %c0_21] : memref<288x32xf32, #tpu.memory_space<vmem>>, vector<288x32xf32>
    tpu.vector_store %arg9[%c0_20, %c0_21], %20 {strides = array<i32>} : memref<288x32xf32, #tpu.memory_space<vmem>>, vector<288x32xf32>,
    %cst_22 = arith.constant 0.000000e+00 : f32
    %22 = vector.broadcast %cst_22 : f32 to vector<8x512xf32>
    %c0_23 = arith.constant 0 : index
    %c0_24 = arith.constant 0 : index
    %23 = vector.load %arg5[%c0_23, %c0_24] : memref<1x512xf32, #tpu.memory_space<vmem>>, vector<1x512xf32>
    %24 = vector.broadcast %23 : vector<1x512xf32> to vector<8x512xf32>
    %25 = arith.addf %22, %24 : vector<8x512xf32>
    %c0_25 = arith.constant 0 : index
    %c0_26 = arith.constant 0 : index
    %26 = vector.load %arg9[%c0_25, %c0_26] : memref<288x32xf32, #tpu.memory_space<vmem>>, vector<8x32xf32>
    %27 = arith.truncf %26 : vector<8x32xf32> to vector<8x32xbf16>
    %c0_27 = arith.constant 0 : index
    %c0_28 = arith.constant 0 : index
    %c0_29 = arith.constant 0 : index
    %28 = vector.load %arg4[%c0_27, %c0_28, %c0_29] : memref<36x32x512xbf16, #tpu.memory_space<vmem>>, vector<1x32x512xbf16>
    %29 = vector.shape_cast %28 : vector<1x32x512xbf16> to vector<32x512xbf16>
    %cst_30 = arith.constant dense<0.000000e+00> : vector<8x512xf32>
    %30 = tpu.matmul %27, %29, %cst_30 {dimension_numbers = #tpu.dot_dimension_numbers<[1], [0], [0], [1], [0, 0, 1, 1], [], []>} : vector<8x32xbf16>, vector<32x512xbf16>, vector<8x512xf32> -> vector<8x512xf32>
    %31 = arith.addf %25, %30 : vector<8x512xf32>
    %c8 = arith.constant 8 : index
    %c0_31 = arith.constant 0 : index
    %32 = vector.load %arg9[%c8, %c0_31] : memref<288x32xf32, #tpu.memory_space<vmem>>, vector<8x32xf32>
    %33 = arith.truncf %32 : vector<8x32xf32> to vector<8x32xbf16>
    %c1_32 = arith.constant 1 : index
    %c0_33 = arith.constant 0 : index
    %c0_34 = arith.constant 0 : index
    %34 = vector.load %arg4[%c1_32, %c0_33, %c0_34] : memref<36x32x512xbf16, #tpu.memory_space<vmem>>, vector<1x32x512xbf16>
    %35 = vector.shape_cast %34 : vector<1x32x512xbf16> to vector<32x512xbf16>
    %cst_35 = arith.constant dense<0.000000e+00> : vector<8x512xf32>
    %36 = tpu.matmul %33, %35, %cst_35 {dimension_numbers = #tpu.dot_dimension_numbers<[1], [0], [0], [1], [0, 0, 1, 1], [], []>} : vector<8x32xbf16>, vector<32x512xbf16>, vector<8x512xf32> -> vector<8x512xf32>
    %37 = arith.addf %31, %36 : vector<8x512xf32>
    %c16 = arith.constant 16 : index
    %c0_36 = arith.constant 0 : index
    %38 = vector.load %arg9[%c16, %c0_36] : memref<288x32xf32, #tpu.memory_space<vmem>>, vector<8x32xf32>
    %39 = arith.truncf %38 : vector<8x32xf32> to vector<8x32xbf16>
    %c2_37 = arith.constant 2 : index
    %c0_38 = arith.constant 0 : index
    %c0_39 = arith.constant 0 : index
    %40 = vector.load %arg4[%c2_37, %c0_38, %c0_39] : memref<36x32x512xbf16, #tpu.memory_space<vmem>>, vector<1x32x512xbf16>
    %41 = vector.shape_cast %40 : vector<1x32x512xbf16> to vector<32x512xbf16>
    %cst_40 = arith.constant dense<0.000000e+00> : vector<8x512xf32>
    %42 = tpu.matmul %39, %41, %cst_40 {dimension_numbers = #tpu.dot_dimension_numbers<[1], [0], [0], [1], [0, 0, 1, 1], [], []>} : vector<8x32xbf16>, vector<32x512xbf16>, vector<8x512xf32> -> vector<8x512xf32>
    %43 = arith.addf %37, %42 : vector<8x512xf32>
    %c24 = arith.constant 24 : index
    %c0_41 = arith.constant 0 : index
    %44 = vector.load %arg9[%c24, %c0_41] : memref<288x32xf32, #tpu.memory_space<vmem>>, vector<8x32xf32>
    %45 = arith.truncf %44 : vector<8x32xf32> to vector<8x32xbf16>
    %c3_42 = arith.constant 3 : index
    %c0_43 = arith.constant 0 : index
    %c0_44 = arith.constant 0 : index
    %46 = vector.load %arg4[%c3_42, %c0_43, %c0_44] : memref<36x32x512xbf16, #tpu.memory_space<vmem>>, vector<1x32x512xbf16>
    %47 = vector.shape_cast %46 : vector<1x32x512xbf16> to vector<32x512xbf16>
    %cst_45 = arith.constant dense<0.000000e+00> : vector<8x512xf32>
    %48 = tpu.matmul %45, %47, %cst_45 {dimension_numbers = #tpu.dot_dimension_numbers<[1], [0], [0], [1], [0, 0, 1, 1], [], []>} : vector<8x32xbf16>, vector<32x512xbf16>, vector<8x512xf32> -> vector<8x512xf32>
    %49 = arith.addf %43, %48 : vector<8x512xf32>
    %c32 = arith.constant 32 : index
    %c0_46 = arith.constant 0 : index
    %50 = vector.load %arg9[%c32, %c0_46] : memref<288x32xf32, #tpu.memory_space<vmem>>, vector<8x32xf32>
    %51 = arith.truncf %50 : vector<8x32xf32> to vector<8x32xbf16>
    %c4 = arith.constant 4 : index
    %c0_47 = arith.constant 0 : index
    %c0_48 = arith.constant 0 : index
    %52 = vector.load %arg4[%c4, %c0_47, %c0_48] : memref<36x32x512xbf16, #tpu.memory_space<vmem>>, vector<1x32x512xbf16>
    %53 = vector.shape_cast %52 : vector<1x32x512xbf16> to vector<32x512xbf16>
    %cst_49 = arith.constant dense<0.000000e+00> : vector<8x512xf32>
    %54 = tpu.matmul %51, %53, %cst_49 {dimension_numbers = #tpu.dot_dimension_numbers<[1], [0], [0], [1], [0, 0, 1, 1], [], []>} : vector<8x32xbf16>, vector<32x512xbf16>, vector<8x512xf32> -> vector<8x512xf32>
    %55 = arith.addf %49, %54 : vector<8x512xf32>
    %c40 = arith.constant 40 : index
    %c0_50 = arith.constant 0 : index
    %56 = vector.load %arg9[%c40, %c0_50] : memref<288x32xf32, #tpu.memory_space<vmem>>, vector<8x32xf32>
    %57 = arith.truncf %56 : vector<8x32xf32> to vector<8x32xbf16>
    %c5 = arith.constant 5 : index
    %c0_51 = arith.constant 0 : index
    %c0_52 = arith.constant 0 : index
    %58 = vector.load %arg4[%c5, %c0_51, %c0_52] : memref<36x32x512xbf16, #tpu.memory_space<vmem>>, vector<1x32x512xbf16>
    %59 = vector.shape_cast %58 : vector<1x32x512xbf16> to vector<32x512xbf16>
    %cst_53 = arith.constant dense<0.000000e+00> : vector<8x512xf32>
    %60 = tpu.matmul %57, %59, %cst_53 {dimension_numbers = #tpu.dot_dimension_numbers<[1], [0], [0], [1], [0, 0, 1, 1], [], []>} : vector<8x32xbf16>, vector<32x512xbf16>, vector<8x512xf32> -> vector<8x512xf32>
    %61 = arith.addf %55, %60 : vector<8x512xf32>
    %c48 = arith.constant 48 : index
    %c0_54 = arith.constant 0 : index
    %62 = vector.load %arg9[%c48, %c0_54] : memref<288x32xf32, #tpu.memory_space<vmem>>, vector<8x32xf32>
    %63 = arith.truncf %62 : vector<8x32xf32> to vector<8x32xbf16>
    %c6 = arith.constant 6 : index
    %c0_55 = arith.constant 0 : index
    %c0_56 = arith.constant 0 : index
    %64 = vector.load %arg4[%c6, %c0_55, %c0_56] : memref<36x32x512xbf16, #tpu.memory_space<vmem>>, vector<1x32x512xbf16>
    %65 = vector.shape_cast %64 : vector<1x32x512xbf16> to vector<32x512xbf16>
    %cst_57 = arith.constant dense<0.000000e+00> : vector<8x512xf32>
    %66 = tpu.matmul %63, %65, %cst_57 {dimension_numbers = #tpu.dot_dimension_numbers<[1], [0], [0], [1], [0, 0, 1, 1], [], []>} : vector<8x32xbf16>, vector<32x512xbf16>, vector<8x512xf32> -> vector<8x512xf32>
    %67 = arith.addf %61, %66 : vector<8x512xf32>
    %c56 = arith.constant 56 : index
    %c0_58 = arith.constant 0 : index
    %68 = vector.load %arg9[%c56, %c0_58] : memref<288x32xf32, #tpu.memory_space<vmem>>, vector<8x32xf32>
    %69 = arith.truncf %68 : vector<8x32xf32> to vector<8x32xbf16>
    %c7 = arith.constant 7 : index
    %c0_59 = arith.constant 0 : index
    %c0_60 = arith.constant 0 : index
    %70 = vector.load %arg4[%c7, %c0_59, %c0_60] : memref<36x32x512xbf16, #tpu.memory_space<vmem>>, vector<1x32x512xbf16>
    %71 = vector.shape_cast %70 : vector<1x32x512xbf16> to vector<32x512xbf16>
    %cst_61 = arith.constant dense<0.000000e+00> : vector<8x512xf32>
    %72 = tpu.matmul %69, %71, %cst_61 {dimension_numbers = #tpu.dot_dimension_numbers<[1], [0], [0], [1], [0, 0, 1, 1], [], []>} : vector<8x32xbf16>, vector<32x512xbf16>, vector<8x512xf32> -> vector<8x512xf32>
    %73 = arith.addf %67, %72 : vector<8x512xf32>
    %c64 = arith.constant 64 : index
    %c0_62 = arith.constant 0 : index
    %74 = vector.load %arg9[%c64, %c0_62] : memref<288x32xf32, #tpu.memory_space<vmem>>, vector<8x32xf32>
    %75 = arith.truncf %74 : vector<8x32xf32> to vector<8x32xbf16>
    %c8_63 = arith.constant 8 : index
    %c0_64 = arith.constant 0 : index
    %c0_65 = arith.constant 0 : index
    %76 = vector.load %arg4[%c8_63, %c0_64, %c0_65] : memref<36x32x512xbf16, #tpu.memory_space<vmem>>, vector<1x32x512xbf16>
    %77 = vector.shape_cast %76 : vector<1x32x512xbf16> to vector<32x512xbf16>
    %cst_66 = arith.constant dense<0.000000e+00> : vector<8x512xf32>
    %78 = tpu.matmul %75, %77, %cst_66 {dimension_numbers = #tpu.dot_dimension_numbers<[1], [0], [0], [1], [0, 0, 1, 1], [], []>} : vector<8x32xbf16>, vector<32x512xbf16>, vector<8x512xf32> -> vector<8x512xf32>
    %79 = arith.addf %73, %78 : vector<8x512xf32>
    %c72 = arith.constant 72 : index
    %c0_67 = arith.constant 0 : index
    %80 = vector.load %arg9[%c72, %c0_67] : memref<288x32xf32, #tpu.memory_space<vmem>>, vector<8x32xf32>
    %81 = arith.truncf %80 : vector<8x32xf32> to vector<8x32xbf16>
    %c9 = arith.constant 9 : index
    %c0_68 = arith.constant 0 : index
    %c0_69 = arith.constant 0 : index
    %82 = vector.load %arg4[%c9, %c0_68, %c0_69] : memref<36x32x512xbf16, #tpu.memory_space<vmem>>, vector<1x32x512xbf16>
    %83 = vector.shape_cast %82 : vector<1x32x512xbf16> to vector<32x512xbf16>
    %cst_70 = arith.constant dense<0.000000e+00> : vector<8x512xf32>
    %84 = tpu.matmul %81, %83, %cst_70 {dimension_numbers = #tpu.dot_dimension_numbers<[1], [0], [0], [1], [0, 0, 1, 1], [], []>} : vector<8x32xbf16>, vector<32x512xbf16>, vector<8x512xf32> -> vector<8x512xf32>
    %85 = arith.addf %79, %84 : vector<8x512xf32>
    %c80 = arith.constant 80 : index
    %c0_71 = arith.constant 0 : index
    %86 = vector.load %arg9[%c80, %c0_71] : memref<288x32xf32, #tpu.memory_space<vmem>>, vector<8x32xf32>
    %87 = arith.truncf %86 : vector<8x32xf32> to vector<8x32xbf16>
    %c10 = arith.constant 10 : index
    %c0_72 = arith.constant 0 : index
    %c0_73 = arith.constant 0 : index
    %88 = vector.load %arg4[%c10, %c0_72, %c0_73] : memref<36x32x512xbf16, #tpu.memory_space<vmem>>, vector<1x32x512xbf16>
    %89 = vector.shape_cast %88 : vector<1x32x512xbf16> to vector<32x512xbf16>
    %cst_74 = arith.constant dense<0.000000e+00> : vector<8x512xf32>
    %90 = tpu.matmul %87, %89, %cst_74 {dimension_numbers = #tpu.dot_dimension_numbers<[1], [0], [0], [1], [0, 0, 1, 1], [], []>} : vector<8x32xbf16>, vector<32x512xbf16>, vector<8x512xf32> -> vector<8x512xf32>
    %91 = arith.addf %85, %90 : vector<8x512xf32>
    %c88 = arith.constant 88 : index
    %c0_75 = arith.constant 0 : index
    %92 = vector.load %arg9[%c88, %c0_75] : memref<288x32xf32, #tpu.memory_space<vmem>>, vector<8x32xf32>
    %93 = arith.truncf %92 : vector<8x32xf32> to vector<8x32xbf16>
    %c11 = arith.constant 11 : index
    %c0_76 = arith.constant 0 : index
    %c0_77 = arith.constant 0 : index
    %94 = vector.load %arg4[%c11, %c0_76, %c0_77] : memref<36x32x512xbf16, #tpu.memory_space<vmem>>, vector<1x32x512xbf16>
    %95 = vector.shape_cast %94 : vector<1x32x512xbf16> to vector<32x512xbf16>
    %cst_78 = arith.constant dense<0.000000e+00> : vector<8x512xf32>
    %96 = tpu.matmul %93, %95, %cst_78 {dimension_numbers = #tpu.dot_dimension_numbers<[1], [0], [0], [1], [0, 0, 1, 1], [], []>} : vector<8x32xbf16>, vector<32x512xbf16>, vector<8x512xf32> -> vector<8x512xf32>
    %97 = arith.addf %91, %96 : vector<8x512xf32>
    %c96 = arith.constant 96 : index
    %c0_79 = arith.constant 0 : index
    %98 = vector.load %arg9[%c96, %c0_79] : memref<288x32xf32, #tpu.memory_space<vmem>>, vector<8x32xf32>
    %99 = arith.truncf %98 : vector<8x32xf32> to vector<8x32xbf16>
    %c12 = arith.constant 12 : index
    %c0_80 = arith.constant 0 : index
    %c0_81 = arith.constant 0 : index
    %100 = vector.load %arg4[%c12, %c0_80, %c0_81] : memref<36x32x512xbf16, #tpu.memory_space<vmem>>, vector<1x32x512xbf16>
    %101 = vector.shape_cast %100 : vector<1x32x512xbf16> to vector<32x512xbf16>
    %cst_82 = arith.constant dense<0.000000e+00> : vector<8x512xf32>
    %102 = tpu.matmul %99, %101, %cst_82 {dimension_numbers = #tpu.dot_dimension_numbers<[1], [0], [0], [1], [0, 0, 1, 1], [], []>} : vector<8x32xbf16>, vector<32x512xbf16>, vector<8x512xf32> -> vector<8x512xf32>
    %103 = arith.addf %97, %102 : vector<8x512xf32>
    %c104 = arith.constant 104 : index
    %c0_83 = arith.constant 0 : index
    %104 = vector.load %arg9[%c104, %c0_83] : memref<288x32xf32, #tpu.memory_space<vmem>>, vector<8x32xf32>
    %105 = arith.truncf %104 : vector<8x32xf32> to vector<8x32xbf16>
    %c13 = arith.constant 13 : index
    %c0_84 = arith.constant 0 : index
    %c0_85 = arith.constant 0 : index
    %106 = vector.load %arg4[%c13, %c0_84, %c0_85] : memref<36x32x512xbf16, #tpu.memory_space<vmem>>, vector<1x32x512xbf16>
    %107 = vector.shape_cast %106 : vector<1x32x512xbf16> to vector<32x512xbf16>
    %cst_86 = arith.constant dense<0.000000e+00> : vector<8x512xf32>
    %108 = tpu.matmul %105, %107, %cst_86 {dimension_numbers = #tpu.dot_dimension_numbers<[1], [0], [0], [1], [0, 0, 1, 1], [], []>} : vector<8x32xbf16>, vector<32x512xbf16>, vector<8x512xf32> -> vector<8x512xf32>
    %109 = arith.addf %103, %108 : vector<8x512xf32>
    %c112 = arith.constant 112 : index
    %c0_87 = arith.constant 0 : index
    %110 = vector.load %arg9[%c112, %c0_87] : memref<288x32xf32, #tpu.memory_space<vmem>>, vector<8x32xf32>
    %111 = arith.truncf %110 : vector<8x32xf32> to vector<8x32xbf16>
    %c14 = arith.constant 14 : index
    %c0_88 = arith.constant 0 : index
    %c0_89 = arith.constant 0 : index
    %112 = vector.load %arg4[%c14, %c0_88, %c0_89] : memref<36x32x512xbf16, #tpu.memory_space<vmem>>, vector<1x32x512xbf16>
    %113 = vector.shape_cast %112 : vector<1x32x512xbf16> to vector<32x512xbf16>
    %cst_90 = arith.constant dense<0.000000e+00> : vector<8x512xf32>
    %114 = tpu.matmul %111, %113, %cst_90 {dimension_numbers = #tpu.dot_dimension_numbers<[1], [0], [0], [1], [0, 0, 1, 1], [], []>} : vector<8x32xbf16>, vector<32x512xbf16>, vector<8x512xf32> -> vector<8x512xf32>
    %115 = arith.addf %109, %114 : vector<8x512xf32>
    %c120 = arith.constant 120 : index
    %c0_91 = arith.constant 0 : index
    %116 = vector.load %arg9[%c120, %c0_91] : memref<288x32xf32, #tpu.memory_space<vmem>>, vector<8x32xf32>
    %117 = arith.truncf %116 : vector<8x32xf32> to vector<8x32xbf16>
    %c15 = arith.constant 15 : index
    %c0_92 = arith.constant 0 : index
    %c0_93 = arith.constant 0 : index
    %118 = vector.load %arg4[%c15, %c0_92, %c0_93] : memref<36x32x512xbf16, #tpu.memory_space<vmem>>, vector<1x32x512xbf16>
    %119 = vector.shape_cast %118 : vector<1x32x512xbf16> to vector<32x512xbf16>
    %cst_94 = arith.constant dense<0.000000e+00> : vector<8x512xf32>
    %120 = tpu.matmul %117, %119, %cst_94 {dimension_numbers = #tpu.dot_dimension_numbers<[1], [0], [0], [1], [0, 0, 1, 1], [], []>} : vector<8x32xbf16>, vector<32x512xbf16>, vector<8x512xf32> -> vector<8x512xf32>
    %121 = arith.addf %115, %120 : vector<8x512xf32>
    %c128 = arith.constant 128 : index
    %c0_95 = arith.constant 0 : index
    %122 = vector.load %arg9[%c128, %c0_95] : memref<288x32xf32, #tpu.memory_space<vmem>>, vector<8x32xf32>
    %123 = arith.truncf %122 : vector<8x32xf32> to vector<8x32xbf16>
    %c16_96 = arith.constant 16 : index
    %c0_97 = arith.constant 0 : index
    %c0_98 = arith.constant 0 : index
    %124 = vector.load %arg4[%c16_96, %c0_97, %c0_98] : memref<36x32x512xbf16, #tpu.memory_space<vmem>>, vector<1x32x512xbf16>
    %125 = vector.shape_cast %124 : vector<1x32x512xbf16> to vector<32x512xbf16>
    %cst_99 = arith.constant dense<0.000000e+00> : vector<8x512xf32>
    %126 = tpu.matmul %123, %125, %cst_99 {dimension_numbers = #tpu.dot_dimension_numbers<[1], [0], [0], [1], [0, 0, 1, 1], [], []>} : vector<8x32xbf16>, vector<32x512xbf16>, vector<8x512xf32> -> vector<8x512xf32>
    %127 = arith.addf %121, %126 : vector<8x512xf32>
    %c136 = arith.constant 136 : index
    %c0_100 = arith.constant 0 : index
    %128 = vector.load %arg9[%c136, %c0_100] : memref<288x32xf32, #tpu.memory_space<vmem>>, vector<8x32xf32>
    %129 = arith.truncf %128 : vector<8x32xf32> to vector<8x32xbf16>
    %c17 = arith.constant 17 : index
    %c0_101 = arith.constant 0 : index
    %c0_102 = arith.constant 0 : index
    %130 = vector.load %arg4[%c17, %c0_101, %c0_102] : memref<36x32x512xbf16, #tpu.memory_space<vmem>>, vector<1x32x512xbf16>
    %131 = vector.shape_cast %130 : vector<1x32x512xbf16> to vector<32x512xbf16>
    %cst_103 = arith.constant dense<0.000000e+00> : vector<8x512xf32>
    %132 = tpu.matmul %129, %131, %cst_103 {dimension_numbers = #tpu.dot_dimension_numbers<[1], [0], [0], [1], [0, 0, 1, 1], [], []>} : vector<8x32xbf16>, vector<32x512xbf16>, vector<8x512xf32> -> vector<8x512xf32>
    %133 = arith.addf %127, %132 : vector<8x512xf32>
    %c144 = arith.constant 144 : index
    %c0_104 = arith.constant 0 : index
    %134 = vector.load %arg9[%c144, %c0_104] : memref<288x32xf32, #tpu.memory_space<vmem>>, vector<8x32xf32>
    %135 = arith.truncf %134 : vector<8x32xf32> to vector<8x32xbf16>
    %c18 = arith.constant 18 : index
    %c0_105 = arith.constant 0 : index
    %c0_106 = arith.constant 0 : index
    %136 = vector.load %arg4[%c18, %c0_105, %c0_106] : memref<36x32x512xbf16, #tpu.memory_space<vmem>>, vector<1x32x512xbf16>
    %137 = vector.shape_cast %136 : vector<1x32x512xbf16> to vector<32x512xbf16>
    %cst_107 = arith.constant dense<0.000000e+00> : vector<8x512xf32>
    %138 = tpu.matmul %135, %137, %cst_107 {dimension_numbers = #tpu.dot_dimension_numbers<[1], [0], [0], [1], [0, 0, 1, 1], [], []>} : vector<8x32xbf16>, vector<32x512xbf16>, vector<8x512xf32> -> vector<8x512xf32>
    %139 = arith.addf %133, %138 : vector<8x512xf32>
    %c152 = arith.constant 152 : index
    %c0_108 = arith.constant 0 : index
    %140 = vector.load %arg9[%c152, %c0_108] : memref<288x32xf32, #tpu.memory_space<vmem>>, vector<8x32xf32>
    %141 = arith.truncf %140 : vector<8x32xf32> to vector<8x32xbf16>
    %c19 = arith.constant 19 : index
    %c0_109 = arith.constant 0 : index
    %c0_110 = arith.constant 0 : index
    %142 = vector.load %arg4[%c19, %c0_109, %c0_110] : memref<36x32x512xbf16, #tpu.memory_space<vmem>>, vector<1x32x512xbf16>
    %143 = vector.shape_cast %142 : vector<1x32x512xbf16> to vector<32x512xbf16>
    %cst_111 = arith.constant dense<0.000000e+00> : vector<8x512xf32>
    %144 = tpu.matmul %141, %143, %cst_111 {dimension_numbers = #tpu.dot_dimension_numbers<[1], [0], [0], [1], [0, 0, 1, 1], [], []>} : vector<8x32xbf16>, vector<32x512xbf16>, vector<8x512xf32> -> vector<8x512xf32>
    %145 = arith.addf %139, %144 : vector<8x512xf32>
    %c160 = arith.constant 160 : index
    %c0_112 = arith.constant 0 : index
    %146 = vector.load %arg9[%c160, %c0_112] : memref<288x32xf32, #tpu.memory_space<vmem>>, vector<8x32xf32>
    %147 = arith.truncf %146 : vector<8x32xf32> to vector<8x32xbf16>
    %c20 = arith.constant 20 : index
    %c0_113 = arith.constant 0 : index
    %c0_114 = arith.constant 0 : index
    %148 = vector.load %arg4[%c20, %c0_113, %c0_114] : memref<36x32x512xbf16, #tpu.memory_space<vmem>>, vector<1x32x512xbf16>
    %149 = vector.shape_cast %148 : vector<1x32x512xbf16> to vector<32x512xbf16>
    %cst_115 = arith.constant dense<0.000000e+00> : vector<8x512xf32>
    %150 = tpu.matmul %147, %149, %cst_115 {dimension_numbers = #tpu.dot_dimension_numbers<[1], [0], [0], [1], [0, 0, 1, 1], [], []>} : vector<8x32xbf16>, vector<32x512xbf16>, vector<8x512xf32> -> vector<8x512xf32>
    %151 = arith.addf %145, %150 : vector<8x512xf32>
    %c168 = arith.constant 168 : index
    %c0_116 = arith.constant 0 : index
    %152 = vector.load %arg9[%c168, %c0_116] : memref<288x32xf32, #tpu.memory_space<vmem>>, vector<8x32xf32>
    %153 = arith.truncf %152 : vector<8x32xf32> to vector<8x32xbf16>
    %c21 = arith.constant 21 : index
    %c0_117 = arith.constant 0 : index
    %c0_118 = arith.constant 0 : index
    %154 = vector.load %arg4[%c21, %c0_117, %c0_118] : memref<36x32x512xbf16, #tpu.memory_space<vmem>>, vector<1x32x512xbf16>
    %155 = vector.shape_cast %154 : vector<1x32x512xbf16> to vector<32x512xbf16>
    %cst_119 = arith.constant dense<0.000000e+00> : vector<8x512xf32>
    %156 = tpu.matmul %153, %155, %cst_119 {dimension_numbers = #tpu.dot_dimension_numbers<[1], [0], [0], [1], [0, 0, 1, 1], [], []>} : vector<8x32xbf16>, vector<32x512xbf16>, vector<8x512xf32> -> vector<8x512xf32>
    %157 = arith.addf %151, %156 : vector<8x512xf32>
    %c176 = arith.constant 176 : index
    %c0_120 = arith.constant 0 : index
    %158 = vector.load %arg9[%c176, %c0_120] : memref<288x32xf32, #tpu.memory_space<vmem>>, vector<8x32xf32>
    %159 = arith.truncf %158 : vector<8x32xf32> to vector<8x32xbf16>
    %c22 = arith.constant 22 : index
    %c0_121 = arith.constant 0 : index
    %c0_122 = arith.constant 0 : index
    %160 = vector.load %arg4[%c22, %c0_121, %c0_122] : memref<36x32x512xbf16, #tpu.memory_space<vmem>>, vector<1x32x512xbf16>
    %161 = vector.shape_cast %160 : vector<1x32x512xbf16> to vector<32x512xbf16>
    %cst_123 = arith.constant dense<0.000000e+00> : vector<8x512xf32>
    %162 = tpu.matmul %159, %161, %cst_123 {dimension_numbers = #tpu.dot_dimension_numbers<[1], [0], [0], [1], [0, 0, 1, 1], [], []>} : vector<8x32xbf16>, vector<32x512xbf16>, vector<8x512xf32> -> vector<8x512xf32>
    %163 = arith.addf %157, %162 : vector<8x512xf32>
    %c184 = arith.constant 184 : index
    %c0_124 = arith.constant 0 : index
    %164 = vector.load %arg9[%c184, %c0_124] : memref<288x32xf32, #tpu.memory_space<vmem>>, vector<8x32xf32>
    %165 = arith.truncf %164 : vector<8x32xf32> to vector<8x32xbf16>
    %c23 = arith.constant 23 : index
    %c0_125 = arith.constant 0 : index
    %c0_126 = arith.constant 0 : index
    %166 = vector.load %arg4[%c23, %c0_125, %c0_126] : memref<36x32x512xbf16, #tpu.memory_space<vmem>>, vector<1x32x512xbf16>
    %167 = vector.shape_cast %166 : vector<1x32x512xbf16> to vector<32x512xbf16>
    %cst_127 = arith.constant dense<0.000000e+00> : vector<8x512xf32>
    %168 = tpu.matmul %165, %167, %cst_127 {dimension_numbers = #tpu.dot_dimension_numbers<[1], [0], [0], [1], [0, 0, 1, 1], [], []>} : vector<8x32xbf16>, vector<32x512xbf16>, vector<8x512xf32> -> vector<8x512xf32>
    %169 = arith.addf %163, %168 : vector<8x512xf32>
    %c192 = arith.constant 192 : index
    %c0_128 = arith.constant 0 : index
    %170 = vector.load %arg9[%c192, %c0_128] : memref<288x32xf32, #tpu.memory_space<vmem>>, vector<8x32xf32>
    %171 = arith.truncf %170 : vector<8x32xf32> to vector<8x32xbf16>
    %c24_129 = arith.constant 24 : index
    %c0_130 = arith.constant 0 : index
    %c0_131 = arith.constant 0 : index
    %172 = vector.load %arg4[%c24_129, %c0_130, %c0_131] : memref<36x32x512xbf16, #tpu.memory_space<vmem>>, vector<1x32x512xbf16>
    %173 = vector.shape_cast %172 : vector<1x32x512xbf16> to vector<32x512xbf16>
    %cst_132 = arith.constant dense<0.000000e+00> : vector<8x512xf32>
    %174 = tpu.matmul %171, %173, %cst_132 {dimension_numbers = #tpu.dot_dimension_numbers<[1], [0], [0], [1], [0, 0, 1, 1], [], []>} : vector<8x32xbf16>, vector<32x512xbf16>, vector<8x512xf32> -> vector<8x512xf32>
    %175 = arith.addf %169, %174 : vector<8x512xf32>
    %c200 = arith.constant 200 : index
    %c0_133 = arith.constant 0 : index
    %176 = vector.load %arg9[%c200, %c0_133] : memref<288x32xf32, #tpu.memory_space<vmem>>, vector<8x32xf32>
    %177 = arith.truncf %176 : vector<8x32xf32> to vector<8x32xbf16>
    %c25 = arith.constant 25 : index
    %c0_134 = arith.constant 0 : index
    %c0_135 = arith.constant 0 : index
    %178 = vector.load %arg4[%c25, %c0_134, %c0_135] : memref<36x32x512xbf16, #tpu.memory_space<vmem>>, vector<1x32x512xbf16>
    %179 = vector.shape_cast %178 : vector<1x32x512xbf16> to vector<32x512xbf16>
    %cst_136 = arith.constant dense<0.000000e+00> : vector<8x512xf32>
    %180 = tpu.matmul %177, %179, %cst_136 {dimension_numbers = #tpu.dot_dimension_numbers<[1], [0], [0], [1], [0, 0, 1, 1], [], []>} : vector<8x32xbf16>, vector<32x512xbf16>, vector<8x512xf32> -> vector<8x512xf32>
    %181 = arith.addf %175, %180 : vector<8x512xf32>
    %c208 = arith.constant 208 : index
    %c0_137 = arith.constant 0 : index
    %182 = vector.load %arg9[%c208, %c0_137] : memref<288x32xf32, #tpu.memory_space<vmem>>, vector<8x32xf32>
    %183 = arith.truncf %182 : vector<8x32xf32> to vector<8x32xbf16>
    %c26 = arith.constant 26 : index
    %c0_138 = arith.constant 0 : index
    %c0_139 = arith.constant 0 : index
    %184 = vector.load %arg4[%c26, %c0_138, %c0_139] : memref<36x32x512xbf16, #tpu.memory_space<vmem>>, vector<1x32x512xbf16>
    %185 = vector.shape_cast %184 : vector<1x32x512xbf16> to vector<32x512xbf16>
    %cst_140 = arith.constant dense<0.000000e+00> : vector<8x512xf32>
    %186 = tpu.matmul %183, %185, %cst_140 {dimension_numbers = #tpu.dot_dimension_numbers<[1], [0], [0], [1], [0, 0, 1, 1], [], []>} : vector<8x32xbf16>, vector<32x512xbf16>, vector<8x512xf32> -> vector<8x512xf32>
    %187 = arith.addf %181, %186 : vector<8x512xf32>
    %c216 = arith.constant 216 : index
    %c0_141 = arith.constant 0 : index
    %188 = vector.load %arg9[%c216, %c0_141] : memref<288x32xf32, #tpu.memory_space<vmem>>, vector<8x32xf32>
    %189 = arith.truncf %188 : vector<8x32xf32> to vector<8x32xbf16>
    %c27 = arith.constant 27 : index
    %c0_142 = arith.constant 0 : index
    %c0_143 = arith.constant 0 : index
    %190 = vector.load %arg4[%c27, %c0_142, %c0_143] : memref<36x32x512xbf16, #tpu.memory_space<vmem>>, vector<1x32x512xbf16>
    %191 = vector.shape_cast %190 : vector<1x32x512xbf16> to vector<32x512xbf16>
    %cst_144 = arith.constant dense<0.000000e+00> : vector<8x512xf32>
    %192 = tpu.matmul %189, %191, %cst_144 {dimension_numbers = #tpu.dot_dimension_numbers<[1], [0], [0], [1], [0, 0, 1, 1], [], []>} : vector<8x32xbf16>, vector<32x512xbf16>, vector<8x512xf32> -> vector<8x512xf32>
    %193 = arith.addf %187, %192 : vector<8x512xf32>
    %c224 = arith.constant 224 : index
    %c0_145 = arith.constant 0 : index
    %194 = vector.load %arg9[%c224, %c0_145] : memref<288x32xf32, #tpu.memory_space<vmem>>, vector<8x32xf32>
    %195 = arith.truncf %194 : vector<8x32xf32> to vector<8x32xbf16>
    %c28 = arith.constant 28 : index
    %c0_146 = arith.constant 0 : index
    %c0_147 = arith.constant 0 : index
    %196 = vector.load %arg4[%c28, %c0_146, %c0_147] : memref<36x32x512xbf16, #tpu.memory_space<vmem>>, vector<1x32x512xbf16>
    %197 = vector.shape_cast %196 : vector<1x32x512xbf16> to vector<32x512xbf16>
    %cst_148 = arith.constant dense<0.000000e+00> : vector<8x512xf32>
    %198 = tpu.matmul %195, %197, %cst_148 {dimension_numbers = #tpu.dot_dimension_numbers<[1], [0], [0], [1], [0, 0, 1, 1], [], []>} : vector<8x32xbf16>, vector<32x512xbf16>, vector<8x512xf32> -> vector<8x512xf32>
    %199 = arith.addf %193, %198 : vector<8x512xf32>
    %c232 = arith.constant 232 : index
    %c0_149 = arith.constant 0 : index
    %200 = vector.load %arg9[%c232, %c0_149] : memref<288x32xf32, #tpu.memory_space<vmem>>, vector<8x32xf32>
    %201 = arith.truncf %200 : vector<8x32xf32> to vector<8x32xbf16>
    %c29 = arith.constant 29 : index
    %c0_150 = arith.constant 0 : index
    %c0_151 = arith.constant 0 : index
    %202 = vector.load %arg4[%c29, %c0_150, %c0_151] : memref<36x32x512xbf16, #tpu.memory_space<vmem>>, vector<1x32x512xbf16>
    %203 = vector.shape_cast %202 : vector<1x32x512xbf16> to vector<32x512xbf16>
    %cst_152 = arith.constant dense<0.000000e+00> : vector<8x512xf32>
    %204 = tpu.matmul %201, %203, %cst_152 {dimension_numbers = #tpu.dot_dimension_numbers<[1], [0], [0], [1], [0, 0, 1, 1], [], []>} : vector<8x32xbf16>, vector<32x512xbf16>, vector<8x512xf32> -> vector<8x512xf32>
    %205 = arith.addf %199, %204 : vector<8x512xf32>
    %c240 = arith.constant 240 : index
    %c0_153 = arith.constant 0 : index
    %206 = vector.load %arg9[%c240, %c0_153] : memref<288x32xf32, #tpu.memory_space<vmem>>, vector<8x32xf32>
    %207 = arith.truncf %206 : vector<8x32xf32> to vector<8x32xbf16>
    %c30 = arith.constant 30 : index
    %c0_154 = arith.constant 0 : index
    %c0_155 = arith.constant 0 : index
    %208 = vector.load %arg4[%c30, %c0_154, %c0_155] : memref<36x32x512xbf16, #tpu.memory_space<vmem>>, vector<1x32x512xbf16>
    %209 = vector.shape_cast %208 : vector<1x32x512xbf16> to vector<32x512xbf16>
    %cst_156 = arith.constant dense<0.000000e+00> : vector<8x512xf32>
    %210 = tpu.matmul %207, %209, %cst_156 {dimension_numbers = #tpu.dot_dimension_numbers<[1], [0], [0], [1], [0, 0, 1, 1], [], []>} : vector<8x32xbf16>, vector<32x512xbf16>, vector<8x512xf32> -> vector<8x512xf32>
    %211 = arith.addf %205, %210 : vector<8x512xf32>
    %c248 = arith.constant 248 : index
    %c0_157 = arith.constant 0 : index
    %212 = vector.load %arg9[%c248, %c0_157] : memref<288x32xf32, #tpu.memory_space<vmem>>, vector<8x32xf32>
    %213 = arith.truncf %212 : vector<8x32xf32> to vector<8x32xbf16>
    %c31 = arith.constant 31 : index
    %c0_158 = arith.constant 0 : index
    %c0_159 = arith.constant 0 : index
    %214 = vector.load %arg4[%c31, %c0_158, %c0_159] : memref<36x32x512xbf16, #tpu.memory_space<vmem>>, vector<1x32x512xbf16>
    %215 = vector.shape_cast %214 : vector<1x32x512xbf16> to vector<32x512xbf16>
    %cst_160 = arith.constant dense<0.000000e+00> : vector<8x512xf32>
    %216 = tpu.matmul %213, %215, %cst_160 {dimension_numbers = #tpu.dot_dimension_numbers<[1], [0], [0], [1], [0, 0, 1, 1], [], []>} : vector<8x32xbf16>, vector<32x512xbf16>, vector<8x512xf32> -> vector<8x512xf32>
    %217 = arith.addf %211, %216 : vector<8x512xf32>
    %c256 = arith.constant 256 : index
    %c0_161 = arith.constant 0 : index
    %218 = vector.load %arg9[%c256, %c0_161] : memref<288x32xf32, #tpu.memory_space<vmem>>, vector<8x32xf32>
    %219 = arith.truncf %218 : vector<8x32xf32> to vector<8x32xbf16>
    %c32_162 = arith.constant 32 : index
    %c0_163 = arith.constant 0 : index
    %c0_164 = arith.constant 0 : index
    %220 = vector.load %arg4[%c32_162, %c0_163, %c0_164] : memref<36x32x512xbf16, #tpu.memory_space<vmem>>, vector<1x32x512xbf16>
    %221 = vector.shape_cast %220 : vector<1x32x512xbf16> to vector<32x512xbf16>
    %cst_165 = arith.constant dense<0.000000e+00> : vector<8x512xf32>
    %222 = tpu.matmul %219, %221, %cst_165 {dimension_numbers = #tpu.dot_dimension_numbers<[1], [0], [0], [1], [0, 0, 1, 1], [], []>} : vector<8x32xbf16>, vector<32x512xbf16>, vector<8x512xf32> -> vector<8x512xf32>
    %223 = arith.addf %217, %222 : vector<8x512xf32>
    %c264 = arith.constant 264 : index
    %c0_166 = arith.constant 0 : index
    %224 = vector.load %arg9[%c264, %c0_166] : memref<288x32xf32, #tpu.memory_space<vmem>>, vector<8x32xf32>
    %225 = arith.truncf %224 : vector<8x32xf32> to vector<8x32xbf16>
    %c33 = arith.constant 33 : index
    %c0_167 = arith.constant 0 : index
    %c0_168 = arith.constant 0 : index
    %226 = vector.load %arg4[%c33, %c0_167, %c0_168] : memref<36x32x512xbf16, #tpu.memory_space<vmem>>, vector<1x32x512xbf16>
    %227 = vector.shape_cast %226 : vector<1x32x512xbf16> to vector<32x512xbf16>
    %cst_169 = arith.constant dense<0.000000e+00> : vector<8x512xf32>
    %228 = tpu.matmul %225, %227, %cst_169 {dimension_numbers = #tpu.dot_dimension_numbers<[1], [0], [0], [1], [0, 0, 1, 1], [], []>} : vector<8x32xbf16>, vector<32x512xbf16>, vector<8x512xf32> -> vector<8x512xf32>
    %229 = arith.addf %223, %228 : vector<8x512xf32>
    %c272 = arith.constant 272 : index
    %c0_170 = arith.constant 0 : index
    %230 = vector.load %arg9[%c272, %c0_170] : memref<288x32xf32, #tpu.memory_space<vmem>>, vector<8x32xf32>
    %231 = arith.truncf %230 : vector<8x32xf32> to vector<8x32xbf16>
    %c34 = arith.constant 34 : index
    %c0_171 = arith.constant 0 : index
    %c0_172 = arith.constant 0 : index
    %232 = vector.load %arg4[%c34, %c0_171, %c0_172] : memref<36x32x512xbf16, #tpu.memory_space<vmem>>, vector<1x32x512xbf16>
    %233 = vector.shape_cast %232 : vector<1x32x512xbf16> to vector<32x512xbf16>
    %cst_173 = arith.constant dense<0.000000e+00> : vector<8x512xf32>
    %234 = tpu.matmul %231, %233, %cst_173 {dimension_numbers = #tpu.dot_dimension_numbers<[1], [0], [0], [1], [0, 0, 1, 1], [], []>} : vector<8x32xbf16>, vector<32x512xbf16>, vector<8x512xf32> -> vector<8x512xf32>
    %235 = arith.addf %229, %234 : vector<8x512xf32>
    %c280 = arith.constant 280 : index
    %c0_174 = arith.constant 0 : index
    %236 = vector.load %arg9[%c280, %c0_174] : memref<288x32xf32, #tpu.memory_space<vmem>>, vector<8x32xf32>
    %237 = arith.truncf %236 : vector<8x32xf32> to vector<8x32xbf16>
    %c35 = arith.constant 35 : index
    %c0_175 = arith.constant 0 : index
    %c0_176 = arith.constant 0 : index
    %238 = vector.load %arg4[%c35, %c0_175, %c0_176] : memref<36x32x512xbf16, #tpu.memory_space<vmem>>, vector<1x32x512xbf16>
    %239 = vector.shape_cast %238 : vector<1x32x512xbf16> to vector<32x512xbf16>
    %cst_177 = arith.constant dense<0.000000e+00> : vector<8x512xf32>
    %240 = tpu.matmul %237, %239, %cst_177 {dimension_numbers = #tpu.dot_dimension_numbers<[1], [0], [0], [1], [0, 0, 1, 1], [], []>} : vector<8x32xbf16>, vector<32x512xbf16>, vector<8x512xf32> -> vector<8x512xf32>
    %241 = arith.addf %235, %240 : vector<8x512xf32>
    %cst_178 = arith.constant 0.000000e+00 : f32
    %242 = vector.broadcast %cst_178 : f32 to vector<8x512xf32>
    %243 = arith.maximumf %241, %242 : vector<8x512xf32>
    %244 = arith.truncf %243 : vector<8x512xf32> to vector<8x512xbf16>
    %c0_179 = arith.constant 0 : index
    %c0_180 = arith.constant 0 : index
    %245 = vector.load %arg6[%c0_179, %c0_180] : memref<512x128xbf16, #tpu.memory_space<vmem>>, vector<512x128xbf16>
    %cst_181 = arith.constant dense<0.000000e+00> : vector<8x128xf32>
    %246 = tpu.matmul %244, %245, %cst_181 {dimension_numbers = #tpu.dot_dimension_numbers<[1], [0], [0], [1], [0, 0, 1, 1], [], []>} : vector<8x512xbf16>, vector<512x128xbf16>, vector<8x128xf32> -> vector<8x128xf32>
    %c0_182 = arith.constant 0 : index
    %c0_183 = arith.constant 0 : index
    %247 = vector.load %arg7[%c0_182, %c0_183] : memref<1x128xf32, #tpu.memory_space<vmem>>, vector<1x128xf32>
    %248 = vector.broadcast %247 : vector<1x128xf32> to vector<8x128xf32>
    %249 = arith.addf %246, %248 : vector<8x128xf32>
    %c0_184 = arith.constant 0 : index
    %c0_185 = arith.constant 0 : index
    %250 = vector.load %arg8[%c0_184, %c0_185] : memref<8x128xf32, #tpu.memory_space<vmem>>, vector<8x128xf32>
    tpu.vector_store %arg8[%c0_184, %c0_185], %249 {strides = array<i32>} : memref<8x128xf32, #tpu.memory_space<vmem>>, vector<8x128xf32>,
    return
  }
  func.func @transform_0(%arg0: i32) -> (i32, i32, i32, i32) {
    %c0_i32 = arith.constant 0 : i32
    %c0_i32_0 = arith.constant 0 : i32
    %c0_i32_1 = arith.constant 0 : i32
    %c0_i32_2 = arith.constant 0 : i32
    return %arg0, %c0_i32, %c0_i32_0, %c0_i32_1 : i32, i32, i32, i32
  }
  func.func @transform_1(%arg0: i32) -> (i32, i32) {
    %c0_i32 = arith.constant 0 : i32
    %c0_i32_0 = arith.constant 0 : i32
    %c0_i32_1 = arith.constant 0 : i32
    return %c0_i32, %c0_i32_0 : i32, i32
  }
  func.func @transform_2(%arg0: i32) -> (i32, i32) {
    %c0_i32 = arith.constant 0 : i32
    %c0_i32_0 = arith.constant 0 : i32
    %c0_i32_1 = arith.constant 0 : i32
    return %c0_i32, %c0_i32_0 : i32, i32
  }
  func.func @transform_3(%arg0: i32) -> (i32, i32, i32) {
    %c0_i32 = arith.constant 0 : i32
    %c0_i32_0 = arith.constant 0 : i32
    %c0_i32_1 = arith.constant 0 : i32
    %c0_i32_2 = arith.constant 0 : i32
    return %c0_i32, %c0_i32_0, %c0_i32_1 : i32, i32, i32
  }
  func.func @transform_4(%arg0: i32) -> (i32, i32) {
    %c0_i32 = arith.constant 0 : i32
    %c0_i32_0 = arith.constant 0 : i32
    %c0_i32_1 = arith.constant 0 : i32
    return %c0_i32, %c0_i32_0 : i32, i32
  }
  func.func @transform_5(%arg0: i32) -> (i32, i32) {
    %c0_i32 = arith.constant 0 : i32
    %c0_i32_0 = arith.constant 0 : i32
    %c0_i32_1 = arith.constant 0 : i32
    return %c0_i32, %c0_i32_0 : i32, i32
  }
  func.func @transform_6(%arg0: i32) -> (i32, i32) {
    %c0_i32 = arith.constant 0 : i32
    %c0_i32_0 = arith.constant 0 : i32
    %c0_i32_1 = arith.constant 0 : i32
    return %c0_i32, %c0_i32_0 : i32, i32
  }
  func.func @transform_7(%arg0: i32) -> (i32, i32) {
    %c0_i32 = arith.constant 0 : i32
    %c0_i32_0 = arith.constant 0 : i32
    return %arg0, %c0_i32 : i32, i32
  }
}

</mosaic_0001>

<bundles_post_ra>
// kernel: net_forward.1
= control target key start
LH: loop header
LB: loop body
LE: loop exit
PB: predicated region body
PF: predicated region fallthrough
CT: control target
= control target key end

     0   :  { %vm169_vm0 = vcmask 261120   ;;  %s10687_s1 = inlined_call_operand.vmem [shape: bf16[32,32], index: 1, kind: input, shape index: {}]   ;;  %s10688_s3 = inlined_call_operand.vmem [shape: bf16[36,32,512], index: 3, kind: input, shape index: {}]   ;;  %s10689_s0 = inlined_call_operand.vmem [shape: bf16[1,4,288,32], index: 0, kind: input, shape index: {}]   ;;  %s10690_s2 = inlined_call_operand.vmem [shape: f32[1,32], index: 2, kind: input, shape index: {}]   ;;  %s10691_s4 = inlined_call_operand.vmem [shape: f32[1,512], index: 4, kind: input, shape index: {}]   ;;  %s10692_s6 = inlined_call_operand.vmem [shape: f32[1,128], index: 6, kind: input, shape index: {}]   ;;  %s10693_s5 = inlined_call_operand.vmem [shape: bf16[512,128], index: 5, kind: input, shape index: {}]   ;;  %s10694_s7 = inlined_call_operand.vmem [shape: f32[8,128], index: 7, kind: output, shape index: {}]  }
   0x1   :  { %v7862_v0 = vld [vmem:[%s10687_s1 + $0x8] sm:$0xff]  ;;  %v7861_v1 = vld [vmem:[%s10687_s1] sm:$0xff]  ;;  %v7942_v3 = vld [vmem:[%s10688_s3 + $0x34] sm:$0xf0] }
   0x2   :  { %230 = vmatpush.bf16.msra.mxu0 %v7862_v0  ;;  %510 = vmatpush.bf16.msra.mxu1 %v7862_v0  ;;  %v6183_v2 = vld [vmem:[%s10688_s3 + $0x28] sm:$0xf]  ;;  %v7940_v4 = vld [vmem:[%s10688_s3 + $0x2c] sm:$0xf]  ;;  %v6185_v5 = vld [vmem:[%s10688_s3 + $0x38] sm:$0xf0] }
   0x3   :  { %826 = vmatpush.bf16.msra.mxu2 %v7862_v0  ;;  %1142 = vmatpush.bf16.msra.mxu3 %v7862_v0  ;;  %v6175_v6 = vld [vmem:[%s10688_s3 + $0x20] sm:$0xf]  ;;  %v6184_v7 = vor.u32 %v7942_v3, %v6183_v2  ;;  %v6188_v8 = vor.u32 %v7940_v4, %v6185_v5  ;;  %v7941_v9 = vld [vmem:[%s10688_s3 + $0x2c] sm:$0xf0]  ;;  %v7939_v10 = vld [vmem:[%s10688_s3 + $0x24] sm:$0xf] }
   0x4   :  { %v6177_v11 = vld [vmem:[%s10688_s3 + $0x30] sm:$0xf0]  ;;  %v7863_v12 = vld [vmem:[%s10689_s0] sm:$0xff]  ;;  %v6176_v16 = vor.u32 %v7941_v9, %v6175_v6  ;;  %v7864_v18 = vld [vmem:[%s10689_s0 + $0x8] sm:$0xff] }
   0x5   :  { %v7881_v13 = vld [vmem:[%s10689_s0 + $0x90] sm:$0xff]  ;;  %v7899_v14 = vld [vmem:[%s10689_s0 + $0x120] sm:$0xff]  ;;  %v6180_v17 = vor.u32 %v7939_v10, %v6177_v11  ;;  %v7882_v19 = vld [vmem:[%s10689_s0 + $0x98] sm:$0xff] }
   0x6   :  { %231 = vmatpush.bf16.msra.mxu0 %v7861_v1  ;;  %511 = vmatpush.bf16.msra.mxu1 %v7861_v1  ;;  %v7917_v15 = vld [vmem:[%s10689_s0 + $0x1b0] sm:$0xff]  ;;  %v7900_v20 = vld [vmem:[%s10689_s0 + $0x128] sm:$0xff]  ;;  %v7918_v21 = vld [vmem:[%s10689_s0 + $0x1b8] sm:$0xff] }
   0x7   :  { %827 = vmatpush.bf16.msra.mxu2 %v7861_v1  ;;  %1143 = vmatpush.bf16.msra.mxu3 %v7861_v1  ;;  %v7865_v22 = vld [vmem:[%s10689_s0 + $0x10] sm:$0xff]  ;;  %v7883_v23 = vld [vmem:[%s10689_s0 + $0xa0] sm:$0xff]  ;;  %v7866_v26 = vld [vmem:[%s10689_s0 + $0x18] sm:$0xff] }
   0x8   :  { %v7901_v24 = vld [vmem:[%s10689_s0 + $0x130] sm:$0xff]  ;;  %v7919_v25 = vld [vmem:[%s10689_s0 + $0x1c0] sm:$0xff]  ;;  %v7884_v27 = vld [vmem:[%s10689_s0 + $0xa8] sm:$0xff] }
   0x9   :  { %5761 = vmatmul.msk.bf16.vlgmr.msra.gmra.mxu0 %vm169_vm0, %v7863_v12  ;;  %5887 = vmatmul.msk.bf16.vlgmr.msra.gmra.mxu1 %vm169_vm0, %v7881_v13  ;;  %v7902_v28 = vld [vmem:[%s10689_s0 + $0x138] sm:$0xff]  ;;  %v7920_v29 = vld [vmem:[%s10689_s0 + $0x1c8] sm:$0xff]  ;;  %v7867_v30 = vld [vmem:[%s10689_s0 + $0x20] sm:$0xff] }
   0xa   :  { %6013 = vmatmul.msk.bf16.vlgmr.msra.gmra.mxu2 %vm169_vm0, %v7899_v14  ;;  %6139 = vmatmul.msk.bf16.vlgmr.msra.gmra.mxu3 %vm169_vm0, %v7917_v15  ;;  %v7885_v31 = vld [vmem:[%s10689_s0 + $0xb0] sm:$0xff]  ;;  %v7903_v32 = vld [vmem:[%s10689_s0 + $0x140] sm:$0xff]  ;;  %v7868_v34 = vld [vmem:[%s10689_s0 + $0x28] sm:$0xff] }
   0xb   :  { %1482 = vmatpush.bf16.msrb.mxu2 %v6184_v7  ;;  %1495 = vmatpush.bf16.msrb.mxu3 %v6188_v8  ;;  %v7921_v33 = vld [vmem:[%s10689_s0 + $0x1d0] sm:$0xff]  ;;  %v7886_v35 = vld [vmem:[%s10689_s0 + $0xb8] sm:$0xff]  ;;  %v7904_v36 = vld [vmem:[%s10689_s0 + $0x148] sm:$0xff] }
   0xc   :  { %1456 = vmatpush.bf16.msrb.mxu0 %v6176_v16  ;;  %1469 = vmatpush.bf16.msrb.mxu1 %v6180_v17  ;;  %v7922_v37 = vld [vmem:[%s10689_s0 + $0x1d8] sm:$0xff]  ;;  %v7869_v38 = vld [vmem:[%s10689_s0 + $0x30] sm:$0xff]  ;;  %v7887_v39 = vld [vmem:[%s10689_s0 + $0xc0] sm:$0xff] }
   0xd   :  { %v7905_v40 = vld [vmem:[%s10689_s0 + $0x150] sm:$0xff]  ;;  %v7923_v41 = vld [vmem:[%s10689_s0 + $0x1e0] sm:$0xff]  ;;  %v7870_v42 = vld [vmem:[%s10689_s0 + $0x38] sm:$0xff] }
   0xe   :  { %v7888_v43 = vld [vmem:[%s10689_s0 + $0xc8] sm:$0xff]  ;;  %v7906_v44 = vld [vmem:[%s10689_s0 + $0x158] sm:$0xff]  ;;  %v7871_v52 = vld [vmem:[%s10689_s0 + $0x40] sm:$0xff] }
   0xf   :  { %v7924_v45 = vld [vmem:[%s10689_s0 + $0x1e8] sm:$0xff]  ;;  %v7938_v47 = vld [vmem:[%s10688_s3 + $0x14] sm:$0xf0]  ;;  %v6169_v50 = vld [vmem:[%s10688_s3 + $0x18] sm:$0xf0] }
  0x10   :  { %v6167_v46 = vld [vmem:[%s10688_s3 + $0x8] sm:$0xf]  ;;  %v7936_v48 = vld [vmem:[%s10688_s3 + $0xc] sm:$0xf]  ;;  %v7889_v53 = vld [vmem:[%s10689_s0 + $0xd0] sm:$0xff] }
  0x11   :  { %v6168_v49 = vor.u32 %v7938_v47, %v6167_v46  ;;  %v6172_v51 = vor.u32 %v7936_v48, %v6169_v50  ;;  %v7907_v56 = vld [vmem:[%s10689_s0 + $0x160] sm:$0xff]  ;;  %v7925_v57 = vld [vmem:[%s10689_s0 + $0x1f0] sm:$0xff]  ;;  %v7872_v13 = vld [vmem:[%s10689_s0 + $0x48] sm:$0xff] }
  0x12   :  { %v8487_v61 = vld [vmem:[%s10690_s2] ss:$0 sm:$0xff]  ;;  %v7937_v2 = vld [vmem:[%s10688_s3 + $0xc] sm:$0xf0]  ;;  %v7935_v3 = vld [vmem:[%s10688_s3 + $0x4] sm:$0xf] }
  0x13   :  { %1483 = vmatpush.bf16.msrb.mxu2 %v6168_v49  ;;  %1496 = vmatpush.bf16.msrb.mxu3 %v6172_v51  ;;  %v6159_v1 = vld [vmem:[%s10688_s3] sm:$0xf]  ;;  %v6161_v5 = vld [vmem:[%s10688_s3 + $0x10] sm:$0xf0]  ;;  %v7890_v14 = vld [vmem:[%s10689_s0 + $0xd8] sm:$0xff] }
  0x14   :  { %v6160_v4 = vor.u32 %v7937_v2, %v6159_v1  ;;  %v6164_v7 = vor.u32 %v7935_v3, %v6161_v5 }
  0x16   :  { %1457 = vmatpush.bf16.msrb.mxu0 %v6160_v4  ;;  %1470 = vmatpush.bf16.msrb.mxu1 %v6164_v7 }
  0x19   :  { %5762 = vmatmul.msk.bf16.gmra.mxu0 %vm169_vm0, %v7864_v18  ;;  %5888 = vmatmul.msk.bf16.gmra.mxu1 %vm169_vm0, %v7882_v19  ;;  %v7908_v18 = vld [vmem:[%s10689_s0 + $0x168] sm:$0xff]  ;;  %v7926_v19 = vld [vmem:[%s10689_s0 + $0x1f8] sm:$0xff] }
  0x1a   :  { %6014 = vmatmul.msk.bf16.gmra.mxu2 %vm169_vm0, %v7900_v20  ;;  %6140 = vmatmul.msk.bf16.gmra.mxu3 %vm169_vm0, %v7918_v21 }
  0x29   :  { %5763 = vmatmul.msk.bf16.gmra.mxu0 %vm169_vm0, %v7865_v22  ;;  %5889 = vmatmul.msk.bf16.gmra.mxu1 %vm169_vm0, %v7883_v23 }
  0x2a   :  { %6015 = vmatmul.msk.bf16.gmra.mxu2 %vm169_vm0, %v7901_v24  ;;  %6141 = vmatmul.msk.bf16.gmra.mxu3 %vm169_vm0, %v7919_v25 }
  0x39   :  { %5764 = vmatmul.msk.bf16.gmra.mxu0 %vm169_vm0, %v7866_v26  ;;  %5890 = vmatmul.msk.bf16.gmra.mxu1 %vm169_vm0, %v7884_v27 }
  0x3a   :  { %6016 = vmatmul.msk.bf16.gmra.mxu2 %vm169_vm0, %v7902_v28  ;;  %6142 = vmatmul.msk.bf16.gmra.mxu3 %vm169_vm0, %v7920_v29 }
  0x49   :  { %5765 = vmatmul.msk.bf16.gmra.mxu0 %vm169_vm0, %v7867_v30  ;;  %5891 = vmatmul.msk.bf16.gmra.mxu1 %vm169_vm0, %v7885_v31 }
  0x4a   :  { %6017 = vmatmul.msk.bf16.gmra.mxu2 %vm169_vm0, %v7903_v32  ;;  %6143 = vmatmul.msk.bf16.gmra.mxu3 %vm169_vm0, %v7921_v33 }
  0x59   :  { %5766 = vmatmul.msk.bf16.gmra.mxu0 %vm169_vm0, %v7868_v34  ;;  %5892 = vmatmul.msk.bf16.gmra.mxu1 %vm169_vm0, %v7886_v35  ;;  %v7873_v35 = vld [vmem:[%s10689_s0 + $0x50] sm:$0xff] }
  0x5a   :  { %6018 = vmatmul.msk.bf16.gmra.mxu2 %vm169_vm0, %v7904_v36  ;;  %6144 = vmatmul.msk.bf16.gmra.mxu3 %vm169_vm0, %v7922_v37  ;;  %v7891_v36 = vld [vmem:[%s10689_s0 + $0xe0] sm:$0xff] }
  0x69   :  { %5767 = vmatmul.msk.bf16.gmra.mxu0 %vm169_vm0, %v7869_v38  ;;  %5893 = vmatmul.msk.bf16.gmra.mxu1 %vm169_vm0, %v7887_v39 }
  0x6a   :  { %6019 = vmatmul.msk.bf16.gmra.mxu2 %vm169_vm0, %v7905_v40  ;;  %6145 = vmatmul.msk.bf16.gmra.mxu3 %vm169_vm0, %v7923_v41  ;;  %v7909_v40 = vld [vmem:[%s10689_s0 + $0x170] sm:$0xff]  ;;  %v7927_v41 = vld [vmem:[%s10689_s0 + $0x200] sm:$0xff] }
  0x79   :  { %5768 = vmatmul.msk.bf16.gmra.mxu0 %vm169_vm0, %v7870_v42  ;;  %5894 = vmatmul.msk.bf16.gmra.mxu1 %vm169_vm0, %v7888_v43 }
  0x7a   :  { %6020 = vmatmul.msk.bf16.gmra.mxu2 %vm169_vm0, %v7906_v44  ;;  %6146 = vmatmul.msk.bf16.gmra.mxu3 %vm169_vm0, %v7924_v45 }
  0x86   :  { %v233_v54 = vpop.f32.mrf.mxu0  ;;  %v513_v55 = vpop.f32.mrf.mxu1 }
  0x87   :  { %v603_v58 = vmax.f32 %v233_v54, %v513_v55 }
  0x89   :  { %5769 = vmatmul.msk.bf16.gmra.mxu0 %vm169_vm0, %v7871_v52  ;;  %5895 = vmatmul.msk.bf16.gmra.mxu1 %vm169_vm0, %v7889_v53 }
  0x8a   :  { %6021 = vmatmul.msk.bf16.gmra.mxu2 %vm169_vm0, %v7907_v56  ;;  %6147 = vmatmul.msk.bf16.gmra.mxu3 %vm169_vm0, %v7925_v57  ;;  %v7874_v57 = vld [vmem:[%s10689_s0 + $0x58] sm:$0xff] }
  0x8d   :  { %v829_v59 = vpop.f32.mrf.mxu2  ;;  %v1145_v60 = vpop.f32.mrf.mxu3 }
  0x8e   :  { %v919_v62 = vmax.f32 %v603_v58, %v829_v59  ;;  %v235_v63 = vpop.f32.mrf.mxu0  ;;  %v515_v0 = vpop.f32.mrf.mxu1  ;;  %v7892_v58 = vld [vmem:[%s10689_s0 + $0xe8] sm:$0xff] }
  0x8f   :  { %v604_v9 = vmax.f32 %v235_v63, %v515_v0  ;;  %v7910_v63 = vld [vmem:[%s10689_s0 + $0x178] sm:$0xff]  ;;  %v7928_v0 = vld [vmem:[%s10689_s0 + $0x208] sm:$0xff] }
  0x90   :  { %v1235_v6 = vmax.f32 %v919_v62, %v1145_v60 }
  0x92   :  { %v1275_v8 = vadd.f32 %v8487_v61, %v1235_v6 }
  0x94   :  { %v1311_v10 = vmax.f32 %v1275_v8, 0.0 }
  0x95   :  { %v831_v11 = vpop.f32.mrf.mxu2  ;;  %v1147_v12 = vpop.f32.mrf.mxu3 }
  0x96   :  { %1347 = vst.msk [vmem:[#allocation2] sm:$0xff] %vm169_vm0, %v1311_v10  ;;  %v920_v15 = vmax.f32 %v604_v9, %v831_v11  ;;  %v238_v16 = vpop.f32.mrf.mxu0  ;;  %v518_v17 = vpop.f32.mrf.mxu1 }
  0x97   :  { %v605_v22 = vmax.f32 %v238_v16, %v518_v17  ;;  %v7875_v16 = vld [vmem:[%s10689_s0 + $0x60] sm:$0xff]  ;;  %v7893_v17 = vld [vmem:[%s10689_s0 + $0xf0] sm:$0xff] }
  0x98   :  { %v1236_v20 = vmax.f32 %v920_v15, %v1147_v12 }
  0x99   :  { %5770 = vmatmul.msk.bf16.gmra.mxu0 %vm169_vm0, %v7872_v13  ;;  %5896 = vmatmul.msk.bf16.gmra.mxu1 %vm169_vm0, %v7890_v14 }
  0x9a   :  { %v1276_v21 = vadd.f32 %v8487_v61, %v1236_v20  ;;  %6022 = vmatmul.msk.bf16.gmra.mxu2 %vm169_vm0, %v7908_v18  ;;  %6148 = vmatmul.msk.bf16.gmra.mxu3 %vm169_vm0, %v7926_v19 }
  0x9c   :  { %v1312_v23 = vmax.f32 %v1276_v21, 0.0  ;;  %v7911_v21 = vld [vmem:[%s10689_s0 + $0x180] sm:$0xff] }
  0x9d   :  { %v834_v24 = vpop.f32.mrf.mxu2  ;;  %v1150_v25 = vpop.f32.mrf.mxu3 }
  0x9e   :  { %1348 = vst.msk [vmem:[#allocation2 + $0x8] sm:$0xff] %vm169_vm0, %v1312_v23  ;;  %v921_v26 = vmax.f32 %v605_v22, %v834_v24  ;;  %v240_v27 = vpop.f32.mrf.mxu0  ;;  %v520_v28 = vpop.f32.mrf.mxu1  ;;  %v7929_v22 = vld [vmem:[%s10689_s0 + $0x210] sm:$0xff] }
  0x9f   :  { %v606_v31 = vmax.f32 %v240_v27, %v520_v28 }
  0xa0   :  { %v1237_v29 = vmax.f32 %v921_v26, %v1150_v25 }
  0xa2   :  { %v1277_v30 = vadd.f32 %v8487_v61, %v1237_v29 }
  0xa4   :  { %v1313_v32 = vmax.f32 %v1277_v30, 0.0 }
  0xa5   :  { %v836_v33 = vpop.f32.mrf.mxu2  ;;  %v1152_v34 = vpop.f32.mrf.mxu3 }
  0xa6   :  { %1349 = vst.msk [vmem:[#allocation2 + $0x10] sm:$0xff] %vm169_vm0, %v1313_v32  ;;  %v922_v37 = vmax.f32 %v606_v31, %v836_v33  ;;  %v243_v38 = vpop.f32.mrf.mxu0  ;;  %v523_v39 = vpop.f32.mrf.mxu1 }
  0xa7   :  { %v607_v44 = vmax.f32 %v243_v38, %v523_v39  ;;  %v7876_v38 = vld [vmem:[%s10689_s0 + $0x68] sm:$0xff]  ;;  %v7894_v39 = vld [vmem:[%s10689_s0 + $0xf8] sm:$0xff] }
  0xa8   :  { %v1238_v42 = vmax.f32 %v922_v37, %v1152_v34 }
  0xa9   :  { %5771 = vmatmul.msk.bf16.gmra.mxu0 %vm169_vm0, %v7873_v35  ;;  %5897 = vmatmul.msk.bf16.gmra.mxu1 %vm169_vm0, %v7891_v36 }
  0xaa   :  { %v1278_v43 = vadd.f32 %v8487_v61, %v1238_v42  ;;  %6023 = vmatmul.msk.bf16.gmra.mxu2 %vm169_vm0, %v7909_v40  ;;  %6149 = vmatmul.msk.bf16.gmra.mxu3 %vm169_vm0, %v7927_v41 }
  0xac   :  { %v1314_v45 = vmax.f32 %v1278_v43, 0.0  ;;  %v7912_v43 = vld [vmem:[%s10689_s0 + $0x188] sm:$0xff] }
  0xad   :  { %v839_v46 = vpop.f32.mrf.mxu2  ;;  %v1155_v47 = vpop.f32.mrf.mxu3 }
  0xae   :  { %1350 = vst.msk [vmem:[#allocation2 + $0x18] sm:$0xff] %vm169_vm0, %v1314_v45  ;;  %v923_v48 = vmax.f32 %v607_v44, %v839_v46  ;;  %v245_v49 = vpop.f32.mrf.mxu0  ;;  %v525_v50 = vpop.f32.mrf.mxu1  ;;  %v7930_v44 = vld [vmem:[%s10689_s0 + $0x218] sm:$0xff] }
  0xaf   :  { %v608_v53 = vmax.f32 %v245_v49, %v525_v50 }
  0xb0   :  { %v1239_v51 = vmax.f32 %v923_v48, %v1155_v47 }
  0xb2   :  { %v1279_v52 = vadd.f32 %v8487_v61, %v1239_v51 }
  0xb4   :  { %v1315_v54 = vmax.f32 %v1279_v52, 0.0 }
  0xb5   :  { %v841_v55 = vpop.f32.mrf.mxu2  ;;  %v1157_v56 = vpop.f32.mrf.mxu3 }
  0xb6   :  { %1351 = vst.msk [vmem:[#allocation2 + $0x20] sm:$0xff] %vm169_vm0, %v1315_v54  ;;  %v924_v59 = vmax.f32 %v608_v53, %v841_v55  ;;  %v248_v60 = vpop.f32.mrf.mxu0  ;;  %v528_v62 = vpop.f32.mrf.mxu1 }
  0xb7   :  { %v609_v3 = vmax.f32 %v248_v60, %v528_v62  ;;  %v7877_v60 = vld [vmem:[%s10689_s0 + $0x70] sm:$0xff]  ;;  %v7895_v62 = vld [vmem:[%s10689_s0 + $0x100] sm:$0xff] }
  0xb8   :  { %v1240_v1 = vmax.f32 %v924_v59, %v1157_v56 }
  0xb9   :  { %5772 = vmatmul.msk.bf16.gmra.mxu0 %vm169_vm0, %v7874_v57  ;;  %5898 = vmatmul.msk.bf16.gmra.mxu1 %vm169_vm0, %v7892_v58 }
  0xba   :  { %v1280_v2 = vadd.f32 %v8487_v61, %v1240_v1  ;;  %6024 = vmatmul.msk.bf16.gmra.mxu2 %vm169_vm0, %v7910_v63  ;;  %6150 = vmatmul.msk.bf16.gmra.mxu3 %vm169_vm0, %v7928_v0 }
  0xbc   :  { %v1316_v4 = vmax.f32 %v1280_v2, 0.0  ;;  %v7913_v2 = vld [vmem:[%s10689_s0 + $0x190] sm:$0xff] }
  0xbd   :  { %v844_v5 = vpop.f32.mrf.mxu2  ;;  %v1160_v6 = vpop.f32.mrf.mxu3 }
  0xbe   :  { %1352 = vst.msk [vmem:[#allocation2 + $0x28] sm:$0xff] %vm169_vm0, %v1316_v4  ;;  %v925_v7 = vmax.f32 %v609_v3, %v844_v5  ;;  %v250_v8 = vpop.f32.mrf.mxu0  ;;  %v530_v9 = vpop.f32.mrf.mxu1  ;;  %v7931_v3 = vld [vmem:[%s10689_s0 + $0x220] sm:$0xff] }
  0xbf   :  { %v610_v12 = vmax.f32 %v250_v8, %v530_v9 }
  0xc0   :  { %v1241_v10 = vmax.f32 %v925_v7, %v1160_v6 }
  0xc2   :  { %v1281_v11 = vadd.f32 %v8487_v61, %v1241_v10 }
  0xc4   :  { %v1317_v13 = vmax.f32 %v1281_v11, 0.0 }
  0xc5   :  { %v846_v14 = vpop.f32.mrf.mxu2  ;;  %v1162_v15 = vpop.f32.mrf.mxu3 }
  0xc6   :  { %1353 = vst.msk [vmem:[#allocation2 + $0x30] sm:$0xff] %vm169_vm0, %v1317_v13  ;;  %v926_v18 = vmax.f32 %v610_v12, %v846_v14  ;;  %v253_v19 = vpop.f32.mrf.mxu0  ;;  %v533_v20 = vpop.f32.mrf.mxu1 }
  0xc7   :  { %v611_v25 = vmax.f32 %v253_v19, %v533_v20  ;;  %v7878_v19 = vld [vmem:[%s10689_s0 + $0x78] sm:$0xff]  ;;  %v7896_v20 = vld [vmem:[%s10689_s0 + $0x108] sm:$0xff] }
  0xc8   :  { %v1242_v23 = vmax.f32 %v926_v18, %v1162_v15 }
  0xc9   :  { %5773 = vmatmul.msk.bf16.gmra.mxu0 %vm169_vm0, %v7875_v16  ;;  %5899 = vmatmul.msk.bf16.gmra.mxu1 %vm169_vm0, %v7893_v17 }
  0xca   :  { %v1282_v24 = vadd.f32 %v8487_v61, %v1242_v23  ;;  %6025 = vmatmul.msk.bf16.gmra.mxu2 %vm169_vm0, %v7911_v21  ;;  %6151 = vmatmul.msk.bf16.gmra.mxu3 %vm169_vm0, %v7929_v22 }
  0xcc   :  { %v1318_v26 = vmax.f32 %v1282_v24, 0.0  ;;  %v7914_v24 = vld [vmem:[%s10689_s0 + $0x198] sm:$0xff] }
  0xcd   :  { %v849_v27 = vpop.f32.mrf.mxu2  ;;  %v1165_v28 = vpop.f32.mrf.mxu3 }
  0xce   :  { %1354 = vst.msk [vmem:[#allocation2 + $0x38] sm:$0xff] %vm169_vm0, %v1318_v26  ;;  %v927_v29 = vmax.f32 %v611_v25, %v849_v27  ;;  %v255_v30 = vpop.f32.mrf.mxu0  ;;  %v535_v31 = vpop.f32.mrf.mxu1  ;;  %v7932_v25 = vld [vmem:[%s10689_s0 + $0x228] sm:$0xff] }
  0xcf   :  { %v612_v34 = vmax.f32 %v255_v30, %v535_v31 }
  0xd0   :  { %v1243_v32 = vmax.f32 %v927_v29, %v1165_v28 }
  0xd2   :  { %v1283_v33 = vadd.f32 %v8487_v61, %v1243_v32 }
  0xd4   :  { %v1319_v35 = vmax.f32 %v1283_v33, 0.0 }
  0xd5   :  { %v851_v36 = vpop.f32.mrf.mxu2  ;;  %v1167_v37 = vpop.f32.mrf.mxu3 }
  0xd6   :  { %1355 = vst.msk [vmem:[#allocation2 + $0x40] sm:$0xff] %vm169_vm0, %v1319_v35  ;;  %v928_v40 = vmax.f32 %v612_v34, %v851_v36  ;;  %v258_v41 = vpop.f32.mrf.mxu0  ;;  %v538_v42 = vpop.f32.mrf.mxu1 }
  0xd7   :  { %v613_v47 = vmax.f32 %v258_v41, %v538_v42  ;;  %v7879_v41 = vld [vmem:[%s10689_s0 + $0x80] sm:$0xff]  ;;  %v7897_v42 = vld [vmem:[%s10689_s0 + $0x110] sm:$0xff] }
  0xd8   :  { %v1244_v45 = vmax.f32 %v928_v40, %v1167_v37 }
  0xd9   :  { %5774 = vmatmul.msk.bf16.gmra.mxu0 %vm169_vm0, %v7876_v38  ;;  %5900 = vmatmul.msk.bf16.gmra.mxu1 %vm169_vm0, %v7894_v39 }
  0xda   :  { %v1284_v46 = vadd.f32 %v8487_v61, %v1244_v45  ;;  %6026 = vmatmul.msk.bf16.gmra.mxu2 %vm169_vm0, %v7912_v43  ;;  %6152 = vmatmul.msk.bf16.gmra.mxu3 %vm169_vm0, %v7930_v44 }
  0xdc   :  { %v1320_v48 = vmax.f32 %v1284_v46, 0.0  ;;  %v7915_v46 = vld [vmem:[%s10689_s0 + $0x1a0] sm:$0xff] }
  0xdd   :  { %v854_v49 = vpop.f32.mrf.mxu2  ;;  %v1170_v50 = vpop.f32.mrf.mxu3 }
  0xde   :  { %1356 = vst.msk [vmem:[#allocation2 + $0x48] sm:$0xff] %vm169_vm0, %v1320_v48  ;;  %v929_v51 = vmax.f32 %v613_v47, %v854_v49  ;;  %v260_v52 = vpop.f32.mrf.mxu0  ;;  %v540_v53 = vpop.f32.mrf.mxu1  ;;  %v7933_v47 = vld [vmem:[%s10689_s0 + $0x230] sm:$0xff] }
  0xdf   :  { %v614_v56 = vmax.f32 %v260_v52, %v540_v53 }
  0xe0   :  { %v1245_v54 = vmax.f32 %v929_v51, %v1170_v50 }
  0xe2   :  { %v1285_v55 = vadd.f32 %v8487_v61, %v1245_v54 }
  0xe4   :  { %v1321_v57 = vmax.f32 %v1285_v55, 0.0 }
  0xe5   :  { %v856_v58 = vpop.f32.mrf.mxu2  ;;  %v1172_v59 = vpop.f32.mrf.mxu3 }
  0xe6   :  { %1357 = vst.msk [vmem:[#allocation2 + $0x50] sm:$0xff] %vm169_vm0, %v1321_v57  ;;  %v930_v63 = vmax.f32 %v614_v56, %v856_v58  ;;  %v263_v0 = vpop.f32.mrf.mxu0  ;;  %v543_v1 = vpop.f32.mrf.mxu1  ;;  %v6227_v57 = vld [vmem:[%s10688_s3 + $0x68] sm:$0xf]  ;;  %v7950_v58 = vld [vmem:[%s10688_s3 + $0x74] sm:$0xf0] }
  0xe7   :  { %v615_v6 = vmax.f32 %v263_v0, %v543_v1  ;;  %v6219_v1 = vld [vmem:[%s10688_s3 + $0x60] sm:$0xf] }
  0xe8   :  { %v1246_v4 = vmax.f32 %v930_v63, %v1172_v59  ;;  %v6228_v59 = vor.u32 %v7950_v58, %v6227_v57 }
  0xe9   :  { %5775 = vmatmul.msk.bf16.gmra.mxu0 %vm169_vm0, %v7877_v60  ;;  %5901 = vmatmul.msk.bf16.gmra.mxu1 %vm169_vm0, %v7895_v62  ;;  %v7948_v60 = vld [vmem:[%s10688_s3 + $0x6c] sm:$0xf]  ;;  %v6229_v62 = vld [vmem:[%s10688_s3 + $0x78] sm:$0xf0] }
  0xea   :  { %v1286_v5 = vadd.f32 %v8487_v61, %v1246_v4  ;;  %6027 = vmatmul.msk.bf16.gmra.mxu2 %vm169_vm0, %v7913_v2  ;;  %6153 = vmatmul.msk.bf16.gmra.mxu3 %vm169_vm0, %v7931_v3  ;;  %v6232_v0 = vor.u32 %v7948_v60, %v6229_v62  ;;  %v7949_v2 = vld [vmem:[%s10688_s3 + $0x6c] sm:$0xf0]  ;;  %v7947_v3 = vld [vmem:[%s10688_s3 + $0x64] sm:$0xf]  ;;  %v6255_v62 = vld [vmem:[%s10688_s3 + $0x88] sm:$0xf] }
  0xeb   :  { %1592 = vmatpush.bf16.msra.mxu2 %v6228_v59  ;;  %v6220_v4 = vor.u32 %v7949_v2, %v6219_v1  ;;  %v7952_v1 = vld [vmem:[%s10688_s3 + $0x8c] sm:$0xf]  ;;  %v6257_v2 = vld [vmem:[%s10688_s3 + $0x98] sm:$0xf0] }
  0xec   :  { %v1322_v7 = vmax.f32 %v1286_v5, 0.0  ;;  %v6221_v5 = vld [vmem:[%s10688_s3 + $0x70] sm:$0xf0]  ;;  %1605 = vmatpush.bf16.msra.mxu3 %v6232_v0 }
  0xed   :  { %v859_v8 = vpop.f32.mrf.mxu2  ;;  %v1175_v9 = vpop.f32.mrf.mxu3  ;;  %1566 = vmatpush.bf16.msra.mxu0 %v6220_v4 }
  0xee   :  { %1358 = vst.msk [vmem:[#allocation2 + $0x58] sm:$0xff] %vm169_vm0, %v1322_v7  ;;  %v931_v10 = vmax.f32 %v615_v6, %v859_v8  ;;  %v265_v11 = vpop.f32.mrf.mxu0  ;;  %v545_v12 = vpop.f32.mrf.mxu1  ;;  %v6224_v8 = vor.u32 %v7947_v3, %v6221_v5  ;;  %v6247_v5 = vld [vmem:[%s10688_s3 + $0x80] sm:$0xf] }
  0xef   :  { %v616_v15 = vmax.f32 %v265_v11, %v545_v12  ;;  %v7916_v12 = vld [vmem:[%s10689_s0 + $0x1a8] sm:$0xff] }
  0xf0   :  { %v1247_v13 = vmax.f32 %v931_v10, %v1175_v9  ;;  %v7880_v9 = vld [vmem:[%s10689_s0 + $0x88] sm:$0xff]  ;;  %v7898_v10 = vld [vmem:[%s10689_s0 + $0x118] sm:$0xff]  ;;  %1579 = vmatpush.bf16.msra.mxu1 %v6224_v8  ;;  %v6249_v8 = vld [vmem:[%s10688_s3 + $0x90] sm:$0xf0] }
  0xf2   :  { %v1287_v14 = vadd.f32 %v8487_v61, %v1247_v13  ;;  %v6211_v13 = vld [vmem:[%s10688_s3 + $0x48] sm:$0xf] }
  0xf4   :  { %v1323_v16 = vmax.f32 %v1287_v14, 0.0  ;;  %v7946_v14 = vld [vmem:[%s10688_s3 + $0x54] sm:$0xf0] }
  0xf5   :  { %v861_v17 = vpop.f32.mrf.mxu2  ;;  %v1177_v18 = vpop.f32.mrf.mxu3 }
  0xf6   :  { %1359 = vst.msk [vmem:[#allocation2 + $0x60] sm:$0xff] %vm169_vm0, %v1323_v16  ;;  %v932_v21 = vmax.f32 %v616_v15, %v861_v17  ;;  %v268_v22 = vpop.f32.mrf.mxu0  ;;  %v548_v23 = vpop.f32.mrf.mxu1  ;;  %v6212_v17 = vor.u32 %v7946_v14, %v6211_v13 }
  0xf7   :  { %v617_v28 = vmax.f32 %v268_v22, %v548_v23 }
  0xf8   :  { %v1248_v26 = vmax.f32 %v932_v21, %v1177_v18  ;;  %v7944_v18 = vld [vmem:[%s10688_s3 + $0x4c] sm:$0xf]  ;;  %1593 = vmatpush.bf16.msra.mxu2 %v6212_v17 }
  0xf9   :  { %5776 = vmatmul.msk.bf16.gmra.mxu0 %vm169_vm0, %v7878_v19  ;;  %5902 = vmatmul.msk.bf16.gmra.mxu1 %vm169_vm0, %v7896_v20  ;;  %v6213_v19 = vld [vmem:[%s10688_s3 + $0x58] sm:$0xf0]  ;;  %v6203_v20 = vld [vmem:[%s10688_s3 + $0x40] sm:$0xf] }
  0xfa   :  { %v1288_v27 = vadd.f32 %v8487_v61, %v1248_v26  ;;  %6028 = vmatmul.msk.bf16.gmra.mxu2 %vm169_vm0, %v7914_v24  ;;  %6154 = vmatmul.msk.bf16.gmra.mxu3 %vm169_vm0, %v7932_v25  ;;  %v7934_v24 = vld [vmem:[%s10689_s0 + $0x238] sm:$0xff]  ;;  %v6216_v25 = vor.u32 %v7944_v18, %v6213_v19  ;;  %v7945_v26 = vld [vmem:[%s10688_s3 + $0x4c] sm:$0xf0] }
  0xfc   :  { %v1324_v29 = vmax.f32 %v1288_v27, 0.0  ;;  %v7943_v27 = vld [vmem:[%s10688_s3 + $0x44] sm:$0xf]  ;;  %1606 = vmatpush.bf16.msra.mxu3 %v6216_v25  ;;  %v7966_v25 = vld [vmem:[%s10688_s3 + $0xf4] sm:$0xf0] }
  0xfd   :  { %v864_v30 = vpop.f32.mrf.mxu2  ;;  %v1180_v31 = vpop.f32.mrf.mxu3 }
  0xfe   :  { %1360 = vst.msk [vmem:[#allocation2 + $0x68] sm:$0xff] %vm169_vm0, %v1324_v29  ;;  %v933_v32 = vmax.f32 %v617_v28, %v864_v30  ;;  %v270_v33 = vpop.f32.mrf.mxu0  ;;  %v550_v34 = vpop.f32.mrf.mxu1  ;;  %v6204_v28 = vor.u32 %v7945_v26, %v6203_v20  ;;  %v6205_v29 = vld [vmem:[%s10688_s3 + $0x50] sm:$0xf0]  ;;  %v7964_v26 = vld [vmem:[%s10688_s3 + $0xec] sm:$0xf] }
  0xff   :  { %v618_v37 = vmax.f32 %v270_v33, %v550_v34 }
 0x100   :  { %v1249_v35 = vmax.f32 %v933_v32, %v1180_v31  ;;  %v6208_v31 = vor.u32 %v7943_v27, %v6205_v29  ;;  %1567 = vmatpush.bf16.msra.mxu0 %v6204_v28  ;;  %v1506_v28 = vld [vmem:[#allocation2 + $0x8] sm:$0xff]  ;;  %v6317_v29 = vld [vmem:[%s10688_s3 + $0xf8] sm:$0xf0] }
 0x102   :  { %v1289_v36 = vadd.f32 %v8487_v61, %v1249_v35  ;;  %1580 = vmatpush.bf16.msra.mxu1 %v6208_v31 }
 0x104   :  { %v1325_v38 = vmax.f32 %v1289_v36, 0.0 }
 0x105   :  { %v866_v39 = vpop.f32.mrf.mxu2  ;;  %v1182_v40 = vpop.f32.mrf.mxu3 }
 0x106   :  { %1361 = vst.msk [vmem:[#allocation2 + $0x70] sm:$0xff] %vm169_vm0, %v1325_v38  ;;  %v934_v43 = vmax.f32 %v618_v37, %v866_v39  ;;  %v273_v44 = vpop.f32.mrf.mxu0  ;;  %v553_v45 = vpop.f32.mrf.mxu1 }
 0x107   :  { %v619_v50 = vmax.f32 %v273_v44, %v553_v45  ;;  %v7958_v44 = vld [vmem:[%s10688_s3 + $0xb4] sm:$0xf0]  ;;  %v7956_v45 = vld [vmem:[%s10688_s3 + $0xac] sm:$0xf] }
 0x108   :  { %v1250_v48 = vmax.f32 %v934_v43, %v1182_v40  ;;  %v6271_v43 = vld [vmem:[%s10688_s3 + $0xa8] sm:$0xf] }
 0x109   :  { %5777 = vmatmul.msk.bf16.gmra.mxu0 %vm169_vm0, %v7879_v41  ;;  %5903 = vmatmul.msk.bf16.gmra.mxu1 %vm169_vm0, %v7897_v42  ;;  %v6272_v59 = vor.u32 %v7958_v44, %v6271_v43  ;;  %v7962_v43 = vld [vmem:[%s10688_s3 + $0xd4] sm:$0xf0] }
 0x10a   :  { %v1290_v49 = vadd.f32 %v8487_v61, %v1250_v48  ;;  %6029 = vmatmul.msk.bf16.gmra.mxu2 %vm169_vm0, %v7915_v46  ;;  %6155 = vmatmul.msk.bf16.gmra.mxu3 %vm169_vm0, %v7933_v47  ;;  %v1397_v47 = vld [vmem:[#allocation2] sm:$0xff]  ;;  %v6273_v48 = vld [vmem:[%s10688_s3 + $0xb8] sm:$0xf0] }
 0x10b   :  { %v1398_v58 = vpack.c.bf16 %v1397_v47, %v1397_v47  ;;  %v6276_v60 = vor.u32 %v7956_v45, %v6273_v48  ;;  %v7960_v45 = vld [vmem:[%s10688_s3 + $0xcc] sm:$0xf] }
 0x10c   :  { %v1326_v51 = vmax.f32 %v1290_v49, 0.0  ;;  %v6263_v49 = vld [vmem:[%s10688_s3 + $0xa0] sm:$0xf] }
 0x10d   :  { %v869_v52 = vpop.f32.mrf.mxu2  ;;  %v1185_v53 = vpop.f32.mrf.mxu3 }
 0x10e   :  { %1362 = vst.msk [vmem:[#allocation2 + $0x78] sm:$0xff] %vm169_vm0, %v1326_v51  ;;  %v935_v54 = vmax.f32 %v619_v50, %v869_v52  ;;  %v275_v55 = vpop.f32.mrf.mxu0  ;;  %v555_v56 = vpop.f32.mrf.mxu1  ;;  %v7957_v52 = vld [vmem:[%s10688_s3 + $0xac] sm:$0xf0] }
 0x10f   :  { %v620_v7 = vmax.f32 %v275_v55, %v555_v56  ;;  %v6264_v3 = vor.u32 %v7957_v52, %v6263_v49  ;;  %v6291_v49 = vld [vmem:[%s10688_s3 + $0xc0] sm:$0xf]  ;;  %v6293_v52 = vld [vmem:[%s10688_s3 + $0xd0] sm:$0xf0] }
 0x110   :  { %v1251_v63 = vmax.f32 %v935_v54, %v1185_v53  ;;  %v7955_v53 = vld [vmem:[%s10688_s3 + $0xa4] sm:$0xf]  ;;  %v6265_v54 = vld [vmem:[%s10688_s3 + $0xb0] sm:$0xf0] }
 0x111   :  { %v6268_v4 = vor.u32 %v7955_v53, %v6265_v54 }
 0x112   :  { %v1291_v6 = vadd.f32 %v8487_v61, %v1251_v63  ;;  %v7954_v63 = vld [vmem:[%s10688_s3 + $0x94] sm:$0xf0] }
 0x114   :  { %v1327_v11 = vmax.f32 %v1291_v6, 0.0  ;;  %v7953_v6 = vld [vmem:[%s10688_s3 + $0x8c] sm:$0xf0] }
 0x115   :  { %v871_v15 = vpop.f32.mrf.mxu2  ;;  %v1187_v16 = vpop.f32.mrf.mxu3  ;;  %v6248_v14 = vor.u32 %v7953_v6, %v6247_v5  ;;  %v6359_v5 = vld [vmem:[%s10688_s3 + $0x128] sm:$0xf]  ;;  %v7974_v6 = vld [vmem:[%s10688_s3 + $0x134] sm:$0xf0] }
 0x116   :  { %1363 = vst.msk [vmem:[#allocation2 + $0x80] sm:$0xff] %vm169_vm0, %v1327_v11  ;;  %v936_v21 = vmax.f32 %v620_v7, %v871_v15  ;;  %v278_v22 = vpop.f32.mrf.mxu0  ;;  %v558_v23 = vpop.f32.mrf.mxu1  ;;  %v7951_v7 = vld [vmem:[%s10688_s3 + $0x84] sm:$0xf]  ;;  %v6256_v11 = vor.u32 %v7954_v63, %v6255_v62 }
 0x117   :  { %v621_v33 = vmax.f32 %v278_v22, %v558_v23  ;;  %v6252_v15 = vor.u32 %v7951_v7, %v6249_v8  ;;  %v7972_v7 = vld [vmem:[%s10688_s3 + $0x12c] sm:$0xf] }
 0x118   :  { %v1252_v30 = vmax.f32 %v936_v21, %v1187_v16 }
 0x119   :  { %5778 = vmatmul.msk.bf16.gmra.mxu0 %vm169_vm0, %v7880_v9  ;;  %5904 = vmatmul.msk.bf16.gmra.mxu1 %vm169_vm0, %v7898_v10 }
 0x11a   :  { %v1292_v32 = vadd.f32 %v8487_v61, %v1252_v30  ;;  %6030 = vmatmul.msk.bf16.gmra.mxu2 %vm169_vm0, %v7916_v12  ;;  %6156 = vmatmul.msk.bf16.gmra.mxu3 %vm169_vm0, %v7934_v24  ;;  %v6260_v12 = vor.u32 %v7952_v1, %v6257_v2  ;;  %v6315_v24 = vld [vmem:[%s10688_s3 + $0xe8] sm:$0xf]  ;;  %v6307_v30 = vld [vmem:[%s10688_s3 + $0xe0] sm:$0xf] }
 0x11c   :  { %v1328_v34 = vmax.f32 %v1292_v32, 0.0 }
 0x11d   :  { %v874_v35 = vpop.f32.mrf.mxu2  ;;  %v1190_v36 = vpop.f32.mrf.mxu3 }
 0x11e   :  { %1364 = vst.msk [vmem:[#allocation2 + $0x88] sm:$0xff] %vm169_vm0, %v1328_v34  ;;  %v937_v37 = vmax.f32 %v621_v33, %v874_v35  ;;  %v280_v38 = vpop.f32.mrf.mxu0  ;;  %v560_v39 = vpop.f32.mrf.mxu1  ;;  %v7965_v33 = vld [vmem:[%s10688_s3 + $0xec] sm:$0xf0]  ;;  %v7963_v34 = vld [vmem:[%s10688_s3 + $0xe4] sm:$0xf] }
 0x11f   :  { %v622_v42 = vmax.f32 %v280_v38, %v560_v39  ;;  %v6309_v35 = vld [vmem:[%s10688_s3 + $0xf0] sm:$0xf0]  ;;  %v1507_v39 = vpack.c.bf16 %v1506_v28, %v1506_v28  ;;  %v6308_v47 = vor.u32 %v7965_v33, %v6307_v30  ;;  %v6335_v30 = vld [vmem:[%s10688_s3 + $0x100] sm:$0xf] }
 0x120   :  { %v1253_v40 = vmax.f32 %v937_v37, %v1190_v36  ;;  %v6312_v48 = vor.u32 %v7963_v34, %v6309_v35  ;;  %v6337_v33 = vld [vmem:[%s10688_s3 + $0x110] sm:$0xf0] }
 0x122   :  { %v1293_v41 = vadd.f32 %v8487_v61, %v1253_v40  ;;  %v6316_v40 = vor.u32 %v7966_v25, %v6315_v24  ;;  %v7970_v24 = vld [vmem:[%s10688_s3 + $0x114] sm:$0xf0] }
 0x124   :  { %v1329_v46 = vmax.f32 %v1293_v41, 0.0  ;;  %v6320_v41 = vor.u32 %v7964_v26, %v6317_v29  ;;  %v7968_v26 = vld [vmem:[%s10688_s3 + $0x10c] sm:$0xf] }
 0x125   :  { %v876_v50 = vpop.f32.mrf.mxu2  ;;  %v1192_v51 = vpop.f32.mrf.mxu3 }
 0x126   :  { %1365 = vst.msk [vmem:[#allocation2 + $0x90] sm:$0xff] %vm169_vm0, %v1329_v46  ;;  %v938_v55 = vmax.f32 %v622_v42, %v876_v50  ;;  %v283_v56 = vpop.f32.mrf.mxu0  ;;  %v563_v57 = vpop.f32.mrf.mxu1  ;;  %v6299_v42 = vld [vmem:[%s10688_s3 + $0xc8] sm:$0xf]  ;;  %v6301_v46 = vld [vmem:[%s10688_s3 + $0xd8] sm:$0xf0] }
 0x127   :  { %v623_v10 = vmax.f32 %v283_v56, %v563_v57  ;;  %v7961_v50 = vld [vmem:[%s10688_s3 + $0xcc] sm:$0xf0]  ;;  %v6304_v56 = vor.u32 %v7960_v45, %v6301_v46 }
 0x128   :  { %v1254_v0 = vmax.f32 %v938_v55, %v1192_v51  ;;  %v7959_v51 = vld [vmem:[%s10688_s3 + $0xc4] sm:$0xf]  ;;  %v6300_v55 = vor.u32 %v7962_v43, %v6299_v42 }
 0x129   :  { %6189 = vmatmul.msk.bf16.vlgmr.msrb.gmra.mxu0 %vm169_vm0, %v1398_v58  ;;  %6190 = vmatmul.msk.bf16.vlgmr.msrb.gmra.mxu1 %vm169_vm0, %v1398_v58 }
 0x12a   :  { %v1294_v9 = vadd.f32 %v8487_v61, %v1254_v0  ;;  %6191 = vmatmul.msk.bf16.vlgmr.msrb.gmra.mxu2 %vm169_vm0, %v1398_v58  ;;  %6192 = vmatmul.msk.bf16.vlgmr.msrb.gmra.mxu3 %vm169_vm0, %v1398_v58  ;;  %v6292_v58 = vor.u32 %v7961_v50, %v6291_v49  ;;  %v6403_v49 = vld [vmem:[%s10688_s3 + $0x168] sm:$0xf]  ;;  %v7982_v50 = vld [vmem:[%s10688_s3 + $0x174] sm:$0xf0] }
 0x12b   :  { %1702 = vmatpush.bf16.msrb.mxu2 %v6272_v59  ;;  %1715 = vmatpush.bf16.msrb.mxu3 %v6276_v60  ;;  %v6296_v59 = vor.u32 %v7959_v51, %v6293_v52  ;;  %v7980_v51 = vld [vmem:[%s10688_s3 + $0x16c] sm:$0xf] }
 0x12c   :  { %v1330_v13 = vmax.f32 %v1294_v9, 0.0  ;;  %1676 = vmatpush.bf16.msrb.mxu0 %v6264_v3  ;;  %1689 = vmatpush.bf16.msrb.mxu1 %v6268_v4  ;;  %v1616_v9 = vld [vmem:[#allocation2 + $0x10] sm:$0xff] }
 0x12d   :  { %v879_v16 = vpop.f32.mrf.mxu2  ;;  %v1195_v17 = vpop.f32.mrf.mxu3 }
 0x12e   :  { %1366 = vst.msk [vmem:[#allocation2 + $0x98] sm:$0xff] %vm169_vm0, %v1330_v13  ;;  %v939_v18 = vmax.f32 %v623_v10, %v879_v16  ;;  %v285_v19 = vpop.f32.mrf.mxu0  ;;  %v565_v20 = vpop.f32.mrf.mxu1  ;;  %v6361_v10 = vld [vmem:[%s10688_s3 + $0x138] sm:$0xf0]  ;;  %v6353_v16 = vld [vmem:[%s10688_s3 + $0x130] sm:$0xf0] }
 0x12f   :  { %1703 = vmatpush.bf16.msrb.mxu2 %v6256_v11  ;;  %1716 = vmatpush.bf16.msrb.mxu3 %v6260_v12  ;;  %v624_v23 = vmax.f32 %v285_v19, %v565_v20  ;;  %v6351_v11 = vld [vmem:[%s10688_s3 + $0x120] sm:$0xf]  ;;  %v1617_v20 = vpack.c.bf16 %v1616_v9, %v1616_v9 }
 0x130   :  { %v1255_v21 = vmax.f32 %v939_v18, %v1195_v17  ;;  %1677 = vmatpush.bf16.msrb.mxu0 %v6248_v14  ;;  %1690 = vmatpush.bf16.msrb.mxu1 %v6252_v15  ;;  %v7973_v14 = vld [vmem:[%s10688_s3 + $0x12c] sm:$0xf0]  ;;  %v7971_v15 = vld [vmem:[%s10688_s3 + $0x124] sm:$0xf] }
 0x131   :  { %v6352_v28 = vor.u32 %v7973_v14, %v6351_v11  ;;  %v6356_v29 = vor.u32 %v7971_v15, %v6353_v16  ;;  %v6379_v11 = vld [vmem:[%s10688_s3 + $0x140] sm:$0xf]  ;;  %v6381_v14 = vld [vmem:[%s10688_s3 + $0x150] sm:$0xf0] }
 0x132   :  { %v1295_v22 = vadd.f32 %v8487_v61, %v1255_v21  ;;  %v6360_v21 = vor.u32 %v7974_v6, %v6359_v5  ;;  %v7978_v5 = vld [vmem:[%s10688_s3 + $0x154] sm:$0xf0] }
 0x134   :  { %v1331_v27 = vmax.f32 %v1295_v22, 0.0  ;;  %v6364_v22 = vor.u32 %v7972_v7, %v6361_v10  ;;  %v7976_v7 = vld [vmem:[%s10688_s3 + $0x14c] sm:$0xf] }
 0x135   :  { %v881_v31 = vpop.f32.mrf.mxu2  ;;  %v1197_v32 = vpop.f32.mrf.mxu3 }
 0x136   :  { %1367 = vst.msk [vmem:[#allocation2 + $0xa0] sm:$0xff] %vm169_vm0, %v1331_v27  ;;  %v940_v36 = vmax.f32 %v624_v23, %v881_v31  ;;  %v288_v37 = vpop.f32.mrf.mxu0  ;;  %v568_v38 = vpop.f32.mrf.mxu1  ;;  %v6343_v23 = vld [vmem:[%s10688_s3 + $0x108] sm:$0xf]  ;;  %v6345_v27 = vld [vmem:[%s10688_s3 + $0x118] sm:$0xf0] }
 0x137   :  { %v625_v54 = vmax.f32 %v288_v37, %v568_v38  ;;  %v7969_v31 = vld [vmem:[%s10688_s3 + $0x10c] sm:$0xf0]  ;;  %v6348_v37 = vor.u32 %v7968_v26, %v6345_v27  ;;  %v8956_v27 = vld [vmem:[%s10690_s2] ss:$0 sm:$0xff] }
 0x138   :  { %v1256_v44 = vmax.f32 %v940_v36, %v1197_v32  ;;  %v7967_v32 = vld [vmem:[%s10688_s3 + $0x104] sm:$0xf]  ;;  %v6344_v36 = vor.u32 %v7970_v24, %v6343_v23 }
 0x139   :  { %6233 = vmatmul.msk.bf16.vlgmr.msra.gmra.mxu0 %vm169_vm0, %v1507_v39  ;;  %6234 = vmatmul.msk.bf16.vlgmr.msra.gmra.mxu1 %vm169_vm0, %v1507_v39 }
 0x13a   :  { %v1296_v53 = vadd.f32 %v8487_v61, %v1256_v44  ;;  %6235 = vmatmul.msk.bf16.vlgmr.msra.gmra.mxu2 %vm169_vm0, %v1507_v39  ;;  %6236 = vmatmul.msk.bf16.vlgmr.msra.gmra.mxu3 %vm169_vm0, %v1507_v39  ;;  %v6336_v39 = vor.u32 %v7969_v31, %v6335_v30  ;;  %v6447_v30 = vld [vmem:[%s10688_s3 + $0x1a8] sm:$0xf]  ;;  %v7990_v31 = vld [vmem:[%s10688_s3 + $0x1b4] sm:$0xf0] }
 0x13b   :  { %1812 = vmatpush.bf16.msra.mxu2 %v6316_v40  ;;  %1825 = vmatpush.bf16.msra.mxu3 %v6320_v41  ;;  %v6340_v40 = vor.u32 %v7967_v32, %v6337_v33  ;;  %v7988_v32 = vld [vmem:[%s10688_s3 + $0x1ac] sm:$0xf] }
 0x13c   :  { %v1332_v57 = vmax.f32 %v1296_v53, 0.0  ;;  %1786 = vmatpush.bf16.msra.mxu0 %v6308_v47  ;;  %1799 = vmatpush.bf16.msra.mxu1 %v6312_v48  ;;  %v1726_v53 = vld [vmem:[#allocation2 + $0x18] sm:$0xff] }
 0x13d   :  { %v884_v60 = vpop.f32.mrf.mxu2  ;;  %v1200_v62 = vpop.f32.mrf.mxu3 }
 0x13e   :  { %1368 = vst.msk [vmem:[#allocation2 + $0xa8] sm:$0xff] %vm169_vm0, %v1332_v57  ;;  %v941_v63 = vmax.f32 %v625_v54, %v884_v60  ;;  %v290_v0 = vpop.f32.mrf.mxu0  ;;  %v570_v1 = vpop.f32.mrf.mxu1  ;;  %v6405_v54 = vld [vmem:[%s10688_s3 + $0x178] sm:$0xf0]  ;;  %v6397_v60 = vld [vmem:[%s10688_s3 + $0x170] sm:$0xf0] }
 0x13f   :  { %1813 = vmatpush.bf16.msra.mxu2 %v6300_v55  ;;  %1826 = vmatpush.bf16.msra.mxu3 %v6304_v56  ;;  %v626_v4 = vmax.f32 %v290_v0, %v570_v1  ;;  %v6395_v55 = vld [vmem:[%s10688_s3 + $0x160] sm:$0xf]  ;;  %v1727_v1 = vpack.c.bf16 %v1726_v53, %v1726_v53 }
 0x140   :  { %v1257_v2 = vmax.f32 %v941_v63, %v1200_v62  ;;  %1787 = vmatpush.bf16.msra.mxu0 %v6292_v58  ;;  %1800 = vmatpush.bf16.msra.mxu1 %v6296_v59  ;;  %v7981_v58 = vld [vmem:[%s10688_s3 + $0x16c] sm:$0xf0]  ;;  %v7979_v59 = vld [vmem:[%s10688_s3 + $0x164] sm:$0xf] }
 0x141   :  { %v6396_v9 = vor.u32 %v7981_v58, %v6395_v55  ;;  %v6400_v10 = vor.u32 %v7979_v59, %v6397_v60  ;;  %v6423_v55 = vld [vmem:[%s10688_s3 + $0x180] sm:$0xf]  ;;  %v6425_v58 = vld [vmem:[%s10688_s3 + $0x190] sm:$0xf0] }
 0x142   :  { %v1297_v3 = vadd.f32 %v8487_v61, %v1257_v2  ;;  %v6404_v2 = vor.u32 %v7982_v50, %v6403_v49  ;;  %v7986_v49 = vld [vmem:[%s10688_s3 + $0x194] sm:$0xf0] }
 0x144   :  { %v1333_v8 = vmax.f32 %v1297_v3, 0.0  ;;  %v6408_v3 = vor.u32 %v7980_v51, %v6405_v54  ;;  %v7984_v51 = vld [vmem:[%s10688_s3 + $0x18c] sm:$0xf] }
 0x145   :  { %v886_v12 = vpop.f32.mrf.mxu2  ;;  %v1202_v13 = vpop.f32.mrf.mxu3 }
 0x146   :  { %1369 = vst.msk [vmem:[#allocation2 + $0xb0] sm:$0xff] %vm169_vm0, %v1333_v8  ;;  %v942_v17 = vmax.f32 %v626_v4, %v886_v12  ;;  %v293_v18 = vpop.f32.mrf.mxu0  ;;  %v573_v19 = vpop.f32.mrf.mxu1  ;;  %v6387_v4 = vld [vmem:[%s10688_s3 + $0x148] sm:$0xf]  ;;  %v6389_v8 = vld [vmem:[%s10688_s3 + $0x158] sm:$0xf0] }
 0x147   :  { %v627_v35 = vmax.f32 %v293_v18, %v573_v19  ;;  %v7977_v12 = vld [vmem:[%s10688_s3 + $0x14c] sm:$0xf0]  ;;  %v6392_v18 = vor.u32 %v7976_v7, %v6389_v8 }
 0x148   :  { %v1258_v25 = vmax.f32 %v942_v17, %v1202_v13  ;;  %v7975_v13 = vld [vmem:[%s10688_s3 + $0x144] sm:$0xf]  ;;  %v6388_v17 = vor.u32 %v7978_v5, %v6387_v4 }
 0x149   :  { %6277 = vmatmul.msk.bf16.vlgmr.msrb.gmra.mxu0 %vm169_vm0, %v1617_v20  ;;  %6278 = vmatmul.msk.bf16.vlgmr.msrb.gmra.mxu1 %vm169_vm0, %v1617_v20 }
 0x14a   :  { %v1298_v34 = vadd.f32 %v8487_v61, %v1258_v25  ;;  %6279 = vmatmul.msk.bf16.vlgmr.msrb.gmra.mxu2 %vm169_vm0, %v1617_v20  ;;  %6280 = vmatmul.msk.bf16.vlgmr.msrb.gmra.mxu3 %vm169_vm0, %v1617_v20  ;;  %v6380_v20 = vor.u32 %v7977_v12, %v6379_v11  ;;  %v6491_v11 = vld [vmem:[%s10688_s3 + $0x1e8] sm:$0xf]  ;;  %v7998_v12 = vld [vmem:[%s10688_s3 + $0x1f4] sm:$0xf0] }
 0x14b   :  { %1922 = vmatpush.bf16.msrb.mxu2 %v6360_v21  ;;  %1935 = vmatpush.bf16.msrb.mxu3 %v6364_v22  ;;  %v6384_v21 = vor.u32 %v7975_v13, %v6381_v14  ;;  %v7996_v13 = vld [vmem:[%s10688_s3 + $0x1ec] sm:$0xf] }
 0x14c   :  { %v1334_v38 = vmax.f32 %v1298_v34, 0.0  ;;  %1896 = vmatpush.bf16.msrb.mxu0 %v6352_v28  ;;  %1909 = vmatpush.bf16.msrb.mxu1 %v6356_v29  ;;  %v1836_v34 = vld [vmem:[#allocation2 + $0x20] sm:$0xff] }
 0x14d   :  { %v889_v41 = vpop.f32.mrf.mxu2  ;;  %v1205_v42 = vpop.f32.mrf.mxu3 }
 0x14e   :  { %1370 = vst.msk [vmem:[#allocation2 + $0xb8] sm:$0xff] %vm169_vm0, %v1334_v38  ;;  %v943_v43 = vmax.f32 %v627_v35, %v889_v41  ;;  %v295_v44 = vpop.f32.mrf.mxu0  ;;  %v575_v45 = vpop.f32.mrf.mxu1  ;;  %v6449_v35 = vld [vmem:[%s10688_s3 + $0x1b8] sm:$0xf0]  ;;  %v6441_v41 = vld [vmem:[%s10688_s3 + $0x1b0] sm:$0xf0] }
 0x14f   :  { %1923 = vmatpush.bf16.msrb.mxu2 %v6344_v36  ;;  %1936 = vmatpush.bf16.msrb.mxu3 %v6348_v37  ;;  %v628_v48 = vmax.f32 %v295_v44, %v575_v45  ;;  %v6439_v36 = vld [vmem:[%s10688_s3 + $0x1a0] sm:$0xf]  ;;  %v1837_v45 = vpack.c.bf16 %v1836_v34, %v1836_v34 }
 0x150   :  { %v1259_v46 = vmax.f32 %v943_v43, %v1205_v42  ;;  %1897 = vmatpush.bf16.msrb.mxu0 %v6336_v39  ;;  %1910 = vmatpush.bf16.msrb.mxu1 %v6340_v40  ;;  %v7989_v39 = vld [vmem:[%s10688_s3 + $0x1ac] sm:$0xf0]  ;;  %v7987_v40 = vld [vmem:[%s10688_s3 + $0x1a4] sm:$0xf] }
 0x151   :  { %v6440_v53 = vor.u32 %v7989_v39, %v6439_v36  ;;  %v6444_v54 = vor.u32 %v7987_v40, %v6441_v41  ;;  %v6467_v36 = vld [vmem:[%s10688_s3 + $0x1c0] sm:$0xf]  ;;  %v6469_v39 = vld [vmem:[%s10688_s3 + $0x1d0] sm:$0xf0] }
 0x152   :  { %v1299_v47 = vadd.f32 %v8487_v61, %v1259_v46  ;;  %v6448_v46 = vor.u32 %v7990_v31, %v6447_v30  ;;  %v7994_v30 = vld [vmem:[%s10688_s3 + $0x1d4] sm:$0xf0] }
 0x154   :  { %v1335_v52 = vmax.f32 %v1299_v47, 0.0  ;;  %v6452_v47 = vor.u32 %v7988_v32, %v6449_v35  ;;  %v7992_v32 = vld [vmem:[%s10688_s3 + $0x1cc] sm:$0xf] }
 0x155   :  { %v891_v56 = vpop.f32.mrf.mxu2  ;;  %v1207_v57 = vpop.f32.mrf.mxu3 }
 0x156   :  { %1371 = vst.msk [vmem:[#allocation2 + $0xc0] sm:$0xff] %vm169_vm0, %v1335_v52  ;;  %v944_v62 = vmax.f32 %v628_v48, %v891_v56  ;;  %v298_v63 = vpop.f32.mrf.mxu0  ;;  %v578_v0 = vpop.f32.mrf.mxu1  ;;  %v6431_v48 = vld [vmem:[%s10688_s3 + $0x188] sm:$0xf]  ;;  %v6433_v52 = vld [vmem:[%s10688_s3 + $0x198] sm:$0xf0] }
 0x157   :  { %v629_v16 = vmax.f32 %v298_v63, %v578_v0  ;;  %v7985_v56 = vld [vmem:[%s10688_s3 + $0x18c] sm:$0xf0]  ;;  %v6436_v63 = vor.u32 %v7984_v51, %v6433_v52 }
 0x158   :  { %v1260_v6 = vmax.f32 %v944_v62, %v1207_v57  ;;  %v7983_v57 = vld [vmem:[%s10688_s3 + $0x184] sm:$0xf]  ;;  %v6432_v62 = vor.u32 %v7986_v49, %v6431_v48 }
 0x159   :  { %6321 = vmatmul.msk.bf16.vlgmr.msra.gmra.mxu0 %vm169_vm0, %v1727_v1  ;;  %6322 = vmatmul.msk.bf16.vlgmr.msra.gmra.mxu1 %vm169_vm0, %v1727_v1 }
 0x15a   :  { %v1300_v15 = vadd.f32 %v8487_v61, %v1260_v6  ;;  %6323 = vmatmul.msk.bf16.vlgmr.msra.gmra.mxu2 %vm169_vm0, %v1727_v1  ;;  %6324 = vmatmul.msk.bf16.vlgmr.msra.gmra.mxu3 %vm169_vm0, %v1727_v1  ;;  %v6424_v1 = vor.u32 %v7985_v56, %v6423_v55  ;;  %v6535_v55 = vld [vmem:[%s10688_s3 + $0x228] sm:$0xf]  ;;  %v8006_v56 = vld [vmem:[%s10688_s3 + $0x234] sm:$0xf0] }
 0x15b   :  { %2032 = vmatpush.bf16.msra.mxu2 %v6404_v2  ;;  %2045 = vmatpush.bf16.msra.mxu3 %v6408_v3  ;;  %v6428_v2 = vor.u32 %v7983_v57, %v6425_v58  ;;  %v8004_v57 = vld [vmem:[%s10688_s3 + $0x22c] sm:$0xf] }
 0x15c   :  { %v1336_v19 = vmax.f32 %v1300_v15, 0.0  ;;  %2006 = vmatpush.bf16.msra.mxu0 %v6396_v9  ;;  %2019 = vmatpush.bf16.msra.mxu1 %v6400_v10  ;;  %v1946_v15 = vld [vmem:[#allocation2 + $0x28] sm:$0xff] }
 0x15d   :  { %v894_v22 = vpop.f32.mrf.mxu2  ;;  %v1210_v23 = vpop.f32.mrf.mxu3 }
 0x15e   :  { %1372 = vst.msk [vmem:[#allocation2 + $0xc8] sm:$0xff] %vm169_vm0, %v1336_v19  ;;  %v945_v24 = vmax.f32 %v629_v16, %v894_v22  ;;  %v300_v61 = vpop.f32.mrf.mxu0  ;;  %v580_v25 = vpop.f32.mrf.mxu1  ;;  %v6493_v16 = vld [vmem:[%s10688_s3 + $0x1f8] sm:$0xf0]  ;;  %v6485_v22 = vld [vmem:[%s10688_s3 + $0x1f0] sm:$0xf0] }
 0x15f   :  { %2033 = vmatpush.bf16.msra.mxu2 %v6388_v17  ;;  %2046 = vmatpush.bf16.msra.mxu3 %v6392_v18  ;;  %v630_v29 = vmax.f32 %v300_v61, %v580_v25  ;;  %v6483_v17 = vld [vmem:[%s10688_s3 + $0x1e0] sm:$0xf]  ;;  %v1947_v25 = vpack.c.bf16 %v1946_v15, %v1946_v15 }
 0x160   :  { %v1261_v26 = vmax.f32 %v945_v24, %v1210_v23  ;;  %2007 = vmatpush.bf16.msra.mxu0 %v6380_v20  ;;  %2020 = vmatpush.bf16.msra.mxu1 %v6384_v21  ;;  %v7997_v20 = vld [vmem:[%s10688_s3 + $0x1ec] sm:$0xf0]  ;;  %v7995_v21 = vld [vmem:[%s10688_s3 + $0x1e4] sm:$0xf] }
 0x161   :  { %v6484_v34 = vor.u32 %v7997_v20, %v6483_v17  ;;  %v6488_v35 = vor.u32 %v7995_v21, %v6485_v22  ;;  %v6511_v17 = vld [vmem:[%s10688_s3 + $0x200] sm:$0xf]  ;;  %v6513_v20 = vld [vmem:[%s10688_s3 + $0x210] sm:$0xf0] }
 0x162   :  { %v1301_v28 = vadd.f32 %v8956_v27, %v1261_v26  ;;  %v6492_v26 = vor.u32 %v7998_v12, %v6491_v11  ;;  %v8002_v11 = vld [vmem:[%s10688_s3 + $0x214] sm:$0xf0] }
 0x164   :  { %v1337_v33 = vmax.f32 %v1301_v28, 0.0  ;;  %v6496_v28 = vor.u32 %v7996_v13, %v6493_v16  ;;  %v8000_v13 = vld [vmem:[%s10688_s3 + $0x20c] sm:$0xf] }
 0x165   :  { %v896_v37 = vpop.f32.mrf.mxu2  ;;  %v1212_v38 = vpop.f32.mrf.mxu3 }
 0x166   :  { %1373 = vst.msk [vmem:[#allocation2 + $0xd0] sm:$0xff] %vm169_vm0, %v1337_v33  ;;  %v946_v42 = vmax.f32 %v630_v29, %v896_v37  ;;  %v303_v43 = vpop.f32.mrf.mxu0  ;;  %v583_v44 = vpop.f32.mrf.mxu1  ;;  %v6475_v29 = vld [vmem:[%s10688_s3 + $0x1c8] sm:$0xf]  ;;  %v6477_v33 = vld [vmem:[%s10688_s3 + $0x1d8] sm:$0xf0] }
 0x167   :  { %v631_v60 = vmax.f32 %v303_v43, %v583_v44  ;;  %v7993_v37 = vld [vmem:[%s10688_s3 + $0x1cc] sm:$0xf0]  ;;  %v6480_v43 = vor.u32 %v7992_v32, %v6477_v33 }
 0x168   :  { %v1262_v50 = vmax.f32 %v946_v42, %v1212_v38  ;;  %v7991_v38 = vld [vmem:[%s10688_s3 + $0x1c4] sm:$0xf]  ;;  %v6476_v42 = vor.u32 %v7994_v30, %v6475_v29 }
 0x169   :  { %6365 = vmatmul.msk.bf16.vlgmr.msrb.gmra.mxu0 %vm169_vm0, %v1837_v45  ;;  %6366 = vmatmul.msk.bf16.vlgmr.msrb.gmra.mxu1 %vm169_vm0, %v1837_v45 }
 0x16a   :  { %v1302_v59 = vadd.f32 %v8956_v27, %v1262_v50  ;;  %6367 = vmatmul.msk.bf16.vlgmr.msrb.gmra.mxu2 %vm169_vm0, %v1837_v45  ;;  %6368 = vmatmul.msk.bf16.vlgmr.msrb.gmra.mxu3 %vm169_vm0, %v1837_v45  ;;  %v6468_v45 = vor.u32 %v7993_v37, %v6467_v36  ;;  %v6579_v36 = vld [vmem:[%s10688_s3 + $0x268] sm:$0xf]  ;;  %v8014_v37 = vld [vmem:[%s10688_s3 + $0x274] sm:$0xf0] }
 0x16b   :  { %2142 = vmatpush.bf16.msrb.mxu2 %v6448_v46  ;;  %2155 = vmatpush.bf16.msrb.mxu3 %v6452_v47  ;;  %v6472_v46 = vor.u32 %v7991_v38, %v6469_v39  ;;  %v8012_v38 = vld [vmem:[%s10688_s3 + $0x26c] sm:$0xf] }
 0x16c   :  { %v1338_v0 = vmax.f32 %v1302_v59, 0.0  ;;  %2116 = vmatpush.bf16.msrb.mxu0 %v6440_v53  ;;  %2129 = vmatpush.bf16.msrb.mxu1 %v6444_v54  ;;  %v2056_v59 = vld [vmem:[#allocation2 + $0x30] sm:$0xff] }
 0x16d   :  { %v899_v3 = vpop.f32.mrf.mxu2  ;;  %v1215_v4 = vpop.f32.mrf.mxu3 }
 0x16e   :  { %1374 = vst.msk [vmem:[#allocation2 + $0xd8] sm:$0xff] %vm169_vm0, %v1338_v0  ;;  %v947_v5 = vmax.f32 %v631_v60, %v899_v3  ;;  %v305_v6 = vpop.f32.mrf.mxu0  ;;  %v585_v7 = vpop.f32.mrf.mxu1  ;;  %v6537_v60 = vld [vmem:[%s10688_s3 + $0x238] sm:$0xf0]  ;;  %v6529_v3 = vld [vmem:[%s10688_s3 + $0x230] sm:$0xf0] }
 0x16f   :  { %2143 = vmatpush.bf16.msrb.mxu2 %v6432_v62  ;;  %2156 = vmatpush.bf16.msrb.mxu3 %v6436_v63  ;;  %v632_v10 = vmax.f32 %v305_v6, %v585_v7  ;;  %v6527_v62 = vld [vmem:[%s10688_s3 + $0x220] sm:$0xf]  ;;  %v2057_v7 = vpack.c.bf16 %v2056_v59, %v2056_v59 }
 0x170   :  { %v1263_v8 = vmax.f32 %v947_v5, %v1215_v4  ;;  %2117 = vmatpush.bf16.msrb.mxu0 %v6424_v1  ;;  %2130 = vmatpush.bf16.msrb.mxu1 %v6428_v2  ;;  %v8005_v1 = vld [vmem:[%s10688_s3 + $0x22c] sm:$0xf0]  ;;  %v8003_v2 = vld [vmem:[%s10688_s3 + $0x224] sm:$0xf] }
 0x171   :  { %v6528_v15 = vor.u32 %v8005_v1, %v6527_v62  ;;  %v6532_v16 = vor.u32 %v8003_v2, %v6529_v3  ;;  %v6555_v62 = vld [vmem:[%s10688_s3 + $0x240] sm:$0xf]  ;;  %v6557_v1 = vld [vmem:[%s10688_s3 + $0x250] sm:$0xf0] }
 0x172   :  { %v1303_v9 = vadd.f32 %v8956_v27, %v1263_v8  ;;  %v6536_v8 = vor.u32 %v8006_v56, %v6535_v55  ;;  %v8010_v55 = vld [vmem:[%s10688_s3 + $0x254] sm:$0xf0] }
 0x174   :  { %v1339_v14 = vmax.f32 %v1303_v9, 0.0  ;;  %v6540_v9 = vor.u32 %v8004_v57, %v6537_v60  ;;  %v8008_v57 = vld [vmem:[%s10688_s3 + $0x24c] sm:$0xf] }
 0x175   :  { %v901_v18 = vpop.f32.mrf.mxu2  ;;  %v1217_v19 = vpop.f32.mrf.mxu3 }
 0x176   :  { %1375 = vst.msk [vmem:[#allocation2 + $0xe0] sm:$0xff] %vm169_vm0, %v1339_v14  ;;  %v948_v23 = vmax.f32 %v632_v10, %v901_v18  ;;  %v308_v24 = vpop.f32.mrf.mxu0  ;;  %v588_v61 = vpop.f32.mrf.mxu1  ;;  %v6519_v10 = vld [vmem:[%s10688_s3 + $0x208] sm:$0xf]  ;;  %v6521_v14 = vld [vmem:[%s10688_s3 + $0x218] sm:$0xf0] }
 0x177   :  { %v633_v41 = vmax.f32 %v308_v24, %v588_v61  ;;  %v8001_v18 = vld [vmem:[%s10688_s3 + $0x20c] sm:$0xf0]  ;;  %v6524_v24 = vor.u32 %v8000_v13, %v6521_v14 }
 0x178   :  { %v1264_v31 = vmax.f32 %v948_v23, %v1217_v19  ;;  %v7999_v19 = vld [vmem:[%s10688_s3 + $0x204] sm:$0xf]  ;;  %v6520_v23 = vor.u32 %v8002_v11, %v6519_v10 }
 0x179   :  { %6409 = vmatmul.msk.bf16.vlgmr.msra.gmra.mxu0 %vm169_vm0, %v1947_v25  ;;  %6410 = vmatmul.msk.bf16.vlgmr.msra.gmra.mxu1 %vm169_vm0, %v1947_v25 }
 0x17a   :  { %v1304_v40 = vadd.f32 %v8956_v27, %v1264_v31  ;;  %6411 = vmatmul.msk.bf16.vlgmr.msra.gmra.mxu2 %vm169_vm0, %v1947_v25  ;;  %6412 = vmatmul.msk.bf16.vlgmr.msra.gmra.mxu3 %vm169_vm0, %v1947_v25  ;;  %v6512_v25 = vor.u32 %v8001_v18, %v6511_v17  ;;  %v6623_v17 = vld [vmem:[%s10688_s3 + $0x2a8] sm:$0xf]  ;;  %v8022_v18 = vld [vmem:[%s10688_s3 + $0x2b4] sm:$0xf0] }
 0x17b   :  { %2252 = vmatpush.bf16.msra.mxu2 %v6492_v26  ;;  %2265 = vmatpush.bf16.msra.mxu3 %v6496_v28  ;;  %v6516_v26 = vor.u32 %v7999_v19, %v6513_v20  ;;  %v8020_v19 = vld [vmem:[%s10688_s3 + $0x2ac] sm:$0xf] }
 0x17c   :  { %v1340_v44 = vmax.f32 %v1304_v40, 0.0  ;;  %2226 = vmatpush.bf16.msra.mxu0 %v6484_v34  ;;  %2239 = vmatpush.bf16.msra.mxu1 %v6488_v35  ;;  %v2166_v40 = vld [vmem:[#allocation2 + $0x38] sm:$0xff] }
 0x17d   :  { %v904_v47 = vpop.f32.mrf.mxu2  ;;  %v1220_v48 = vpop.f32.mrf.mxu3 }
 0x17e   :  { %1376 = vst.msk [vmem:[#allocation2 + $0xe8] sm:$0xff] %vm169_vm0, %v1340_v44  ;;  %v949_v49 = vmax.f32 %v633_v41, %v904_v47  ;;  %v310_v50 = vpop.f32.mrf.mxu0  ;;  %v590_v51 = vpop.f32.mrf.mxu1  ;;  %v6581_v41 = vld [vmem:[%s10688_s3 + $0x278] sm:$0xf0]  ;;  %v6573_v47 = vld [vmem:[%s10688_s3 + $0x270] sm:$0xf0] }
 0x17f   :  { %2253 = vmatpush.bf16.msra.mxu2 %v6476_v42  ;;  %2266 = vmatpush.bf16.msra.mxu3 %v6480_v43  ;;  %v634_v54 = vmax.f32 %v310_v50, %v590_v51  ;;  %v6571_v42 = vld [vmem:[%s10688_s3 + $0x260] sm:$0xf]  ;;  %v2167_v51 = vpack.c.bf16 %v2166_v40, %v2166_v40 }
 0x180   :  { %v1265_v52 = vmax.f32 %v949_v49, %v1220_v48  ;;  %2227 = vmatpush.bf16.msra.mxu0 %v6468_v45  ;;  %2240 = vmatpush.bf16.msra.mxu1 %v6472_v46  ;;  %v8013_v45 = vld [vmem:[%s10688_s3 + $0x26c] sm:$0xf0]  ;;  %v8011_v46 = vld [vmem:[%s10688_s3 + $0x264] sm:$0xf] }
 0x181   :  { %v6572_v59 = vor.u32 %v8013_v45, %v6571_v42  ;;  %v6576_v60 = vor.u32 %v8011_v46, %v6573_v47  ;;  %v6599_v42 = vld [vmem:[%s10688_s3 + $0x280] sm:$0xf]  ;;  %v6601_v45 = vld [vmem:[%s10688_s3 + $0x290] sm:$0xf0] }
 0x182   :  { %v1305_v53 = vadd.f32 %v8956_v27, %v1265_v52  ;;  %v6580_v52 = vor.u32 %v8014_v37, %v6579_v36  ;;  %v8018_v36 = vld [vmem:[%s10688_s3 + $0x294] sm:$0xf0] }
 0x184   :  { %v1341_v58 = vmax.f32 %v1305_v53, 0.0  ;;  %v6584_v53 = vor.u32 %v8012_v38, %v6581_v41  ;;  %v8016_v38 = vld [vmem:[%s10688_s3 + $0x28c] sm:$0xf] }
 0x185   :  { %v906_v63 = vpop.f32.mrf.mxu2  ;;  %v1222_v0 = vpop.f32.mrf.mxu3 }
 0x186   :  { %1377 = vst.msk [vmem:[#allocation2 + $0xf0] sm:$0xff] %vm169_vm0, %v1341_v58  ;;  %v950_v4 = vmax.f32 %v634_v54, %v906_v63  ;;  %v313_v5 = vpop.f32.mrf.mxu0  ;;  %v593_v6 = vpop.f32.mrf.mxu1  ;;  %v6563_v54 = vld [vmem:[%s10688_s3 + $0x248] sm:$0xf]  ;;  %v6565_v58 = vld [vmem:[%s10688_s3 + $0x258] sm:$0xf0] }
 0x187   :  { %v635_v22 = vmax.f32 %v313_v5, %v593_v6  ;;  %v8009_v63 = vld [vmem:[%s10688_s3 + $0x24c] sm:$0xf0]  ;;  %v6568_v5 = vor.u32 %v8008_v57, %v6565_v58  ;;  %v2386_v58 = vld [vmem:[#allocation2 + $0x48] sm:$0xff] }
 0x188   :  { %v1266_v12 = vmax.f32 %v950_v4, %v1222_v0  ;;  %v8007_v0 = vld [vmem:[%s10688_s3 + $0x244] sm:$0xf]  ;;  %v6564_v4 = vor.u32 %v8010_v55, %v6563_v54 }
 0x189   :  { %6453 = vmatmul.msk.bf16.vlgmr.msrb.gmra.mxu0 %vm169_vm0, %v2057_v7  ;;  %6454 = vmatmul.msk.bf16.vlgmr.msrb.gmra.mxu1 %vm169_vm0, %v2057_v7 }
 0x18a   :  { %v1306_v21 = vadd.f32 %v8956_v27, %v1266_v12  ;;  %6455 = vmatmul.msk.bf16.vlgmr.msrb.gmra.mxu2 %vm169_vm0, %v2057_v7  ;;  %6456 = vmatmul.msk.bf16.vlgmr.msrb.gmra.mxu3 %vm169_vm0, %v2057_v7  ;;  %v6556_v7 = vor.u32 %v8009_v63, %v6555_v62  ;;  %v8028_v62 = vld [vmem:[%s10688_s3 + $0x2ec] sm:$0xf]  ;;  %v6669_v63 = vld [vmem:[%s10688_s3 + $0x2f8] sm:$0xf0] }
 0x18b   :  { %2362 = vmatpush.bf16.msrb.mxu2 %v6536_v8  ;;  %2375 = vmatpush.bf16.msrb.mxu3 %v6540_v9  ;;  %v6560_v8 = vor.u32 %v8007_v0, %v6557_v1  ;;  %v6659_v0 = vld [vmem:[%s10688_s3 + $0x2e0] sm:$0xf] }
 0x18c   :  { %v1342_v61 = vmax.f32 %v1306_v21, 0.0  ;;  %2336 = vmatpush.bf16.msrb.mxu0 %v6528_v15  ;;  %2349 = vmatpush.bf16.msrb.mxu1 %v6532_v16  ;;  %v2276_v21 = vld [vmem:[#allocation2 + $0x40] sm:$0xff] }
 0x18d   :  { %v909_v28 = vpop.f32.mrf.mxu2  ;;  %v1225_v29 = vpop.f32.mrf.mxu3 }
 0x18e   :  { %1378 = vst.msk [vmem:[#allocation2 + $0xf8] sm:$0xff] %vm169_vm0, %v1342_v61  ;;  %v951_v30 = vmax.f32 %v635_v22, %v909_v28  ;;  %v315_v31 = vpop.f32.mrf.mxu0  ;;  %v595_v32 = vpop.f32.mrf.mxu1  ;;  %v6625_v22 = vld [vmem:[%s10688_s3 + $0x2b8] sm:$0xf0]  ;;  %v6617_v28 = vld [vmem:[%s10688_s3 + $0x2b0] sm:$0xf0] }
 0x18f   :  { %2363 = vmatpush.bf16.msrb.mxu2 %v6520_v23  ;;  %2376 = vmatpush.bf16.msrb.mxu3 %v6524_v24  ;;  %v636_v35 = vmax.f32 %v315_v31, %v595_v32  ;;  %v6615_v23 = vld [vmem:[%s10688_s3 + $0x2a0] sm:$0xf]  ;;  %v2277_v32 = vpack.c.bf16 %v2276_v21, %v2276_v21 }
 0x190   :  { %v1267_v33 = vmax.f32 %v951_v30, %v1225_v29  ;;  %2337 = vmatpush.bf16.msrb.mxu0 %v6512_v25  ;;  %2350 = vmatpush.bf16.msrb.mxu1 %v6516_v26  ;;  %v8021_v25 = vld [vmem:[%s10688_s3 + $0x2ac] sm:$0xf0]  ;;  %v8019_v26 = vld [vmem:[%s10688_s3 + $0x2a4] sm:$0xf] }
 0x191   :  { %v6616_v40 = vor.u32 %v8021_v25, %v6615_v23  ;;  %v6620_v41 = vor.u32 %v8019_v26, %v6617_v28  ;;  %v6643_v23 = vld [vmem:[%s10688_s3 + $0x2c0] sm:$0xf]  ;;  %v6645_v25 = vld [vmem:[%s10688_s3 + $0x2d0] sm:$0xf0] }
 0x192   :  { %v1307_v34 = vadd.f32 %v8956_v27, %v1267_v33  ;;  %v6624_v33 = vor.u32 %v8022_v18, %v6623_v17  ;;  %v6651_v17 = vld [vmem:[%s10688_s3 + $0x2c8] sm:$0xf]  ;;  %v8026_v18 = vld [vmem:[%s10688_s3 + $0x2d4] sm:$0xf0] }
 0x193   :  { %v6652_v28 = vor.u32 %v8026_v18, %v6651_v17  ;;  %v6757_v17 = vld [vmem:[%s10688_s3 + $0x378] sm:$0xf0]  ;;  %v6747_v18 = vld [vmem:[%s10688_s3 + $0x360] sm:$0xf] }
 0x194   :  { %v1343_v39 = vmax.f32 %v1307_v34, 0.0  ;;  %v6628_v34 = vor.u32 %v8020_v19, %v6625_v22  ;;  %v8024_v19 = vld [vmem:[%s10688_s3 + $0x2cc] sm:$0xf] }
 0x195   :  { %v911_v43 = vpop.f32.mrf.mxu2  ;;  %v1227_v44 = vpop.f32.mrf.mxu3 }
 0x196   :  { %1379 = vst.msk [vmem:[#allocation2 + $0x100] sm:$0xff] %vm169_vm0, %v1343_v39  ;;  %v952_v48 = vmax.f32 %v636_v35, %v911_v43  ;;  %v318_v49 = vpop.f32.mrf.mxu0  ;;  %v598_v50 = vpop.f32.mrf.mxu1  ;;  %v6607_v35 = vld [vmem:[%s10688_s3 + $0x288] sm:$0xf]  ;;  %v6609_v39 = vld [vmem:[%s10688_s3 + $0x298] sm:$0xf0] }
 0x197   :  { %v637_v3 = vmax.f32 %v318_v49, %v598_v50  ;;  %v8017_v43 = vld [vmem:[%s10688_s3 + $0x28c] sm:$0xf0]  ;;  %v6608_v47 = vor.u32 %v8018_v36, %v6607_v35 }
 0x198   :  { %v1268_v56 = vmax.f32 %v952_v48, %v1227_v44  ;;  %v8015_v44 = vld [vmem:[%s10688_s3 + $0x284] sm:$0xf]  ;;  %v6612_v48 = vor.u32 %v8016_v38, %v6609_v39  ;;  %v6600_v50 = vor.u32 %v8017_v43, %v6599_v42  ;;  %v2496_v39 = vld [vmem:[#allocation2 + $0x50] sm:$0xff]  ;;  %v8036_v42 = vld [vmem:[%s10688_s3 + $0x32c] sm:$0xf] }
 0x199   :  { %6497 = vmatmul.msk.bf16.vlgmr.msra.gmra.mxu0 %vm169_vm0, %v2167_v51  ;;  %6498 = vmatmul.msk.bf16.vlgmr.msra.gmra.mxu1 %vm169_vm0, %v2167_v51  ;;  %v6713_v43 = vld [vmem:[%s10688_s3 + $0x338] sm:$0xf0] }
 0x19a   :  { %v1308_v2 = vadd.f32 %v8956_v27, %v1268_v56  ;;  %6499 = vmatmul.msk.bf16.vlgmr.msra.gmra.mxu2 %vm169_vm0, %v2167_v51  ;;  %6500 = vmatmul.msk.bf16.vlgmr.msra.gmra.mxu3 %vm169_vm0, %v2167_v51  ;;  %v6604_v51 = vor.u32 %v8015_v44, %v6601_v45  ;;  %v6703_v44 = vld [vmem:[%s10688_s3 + $0x320] sm:$0xf] }
 0x19b   :  { %2472 = vmatpush.bf16.msra.mxu2 %v6580_v52  ;;  %2485 = vmatpush.bf16.msra.mxu3 %v6584_v53 }
 0x19c   :  { %v1344_v6 = vmax.f32 %v1308_v2, 0.0  ;;  %2446 = vmatpush.bf16.msra.mxu0 %v6572_v59  ;;  %2459 = vmatpush.bf16.msra.mxu1 %v6576_v60  ;;  %v6667_v59 = vld [vmem:[%s10688_s3 + $0x2e8] sm:$0xf]  ;;  %v8030_v60 = vld [vmem:[%s10688_s3 + $0x2f4] sm:$0xf0] }
 0x19d   :  { %v914_v9 = vpop.f32.mrf.mxu2  ;;  %v1230_v10 = vpop.f32.mrf.mxu3 }
 0x19e   :  { %1380 = vst.msk [vmem:[#allocation2 + $0x108] sm:$0xff] %vm169_vm0, %v1344_v6  ;;  %v953_v11 = vmax.f32 %v637_v3, %v914_v9  ;;  %v320_v12 = vpop.f32.mrf.mxu0  ;;  %v600_v13 = vpop.f32.mrf.mxu1  ;;  %v8027_v6 = vld [vmem:[%s10688_s3 + $0x2e4] sm:$0xf] }
 0x19f   :  { %2473 = vmatpush.bf16.msra.mxu2 %v6564_v4  ;;  %2486 = vmatpush.bf16.msra.mxu3 %v6568_v5  ;;  %v638_v16 = vmax.f32 %v320_v12, %v600_v13  ;;  %v8029_v5 = vld [vmem:[%s10688_s3 + $0x2ec] sm:$0xf0]  ;;  %v2387_v12 = vpack.c.bf16 %v2386_v58, %v2386_v58  ;;  %v8032_v58 = vld [vmem:[%s10688_s3 + $0x30c] sm:$0xf] }
 0x1a0   :  { %v1269_v14 = vmax.f32 %v953_v11, %v1230_v10  ;;  %2447 = vmatpush.bf16.msra.mxu0 %v6556_v7  ;;  %2460 = vmatpush.bf16.msra.mxu1 %v6560_v8  ;;  %v6661_v7 = vld [vmem:[%s10688_s3 + $0x2f0] sm:$0xf0]  ;;  %v6660_v21 = vor.u32 %v8029_v5, %v6659_v0  ;;  %v8033_v0 = vld [vmem:[%s10688_s3 + $0x30c] sm:$0xf0] }
 0x1a1   :  { %v6664_v22 = vor.u32 %v8027_v6, %v6661_v7 }
 0x1a2   :  { %v1309_v15 = vadd.f32 %v8956_v27, %v1269_v14 }
 0x1a4   :  { %v1345_v20 = vmax.f32 %v1309_v15, 0.0  ;;  %v6668_v15 = vor.u32 %v8030_v60, %v6667_v59  ;;  %v6697_v59 = vld [vmem:[%s10688_s3 + $0x318] sm:$0xf0] }
 0x1a5   :  { %v916_v24 = vpop.f32.mrf.mxu2  ;;  %v1232_v61 = vpop.f32.mrf.mxu3 }
 0x1a6   :  { %1381 = vst.msk [vmem:[#allocation2 + $0x110] sm:$0xff] %vm169_vm0, %v1345_v20  ;;  %v954_v29 = vmax.f32 %v638_v16, %v916_v24  ;;  %v1459_v30 = vpop.f32.mrf.mxu0  ;;  %v1472_v31 = vpop.f32.mrf.mxu1  ;;  %v6672_v16 = vor.u32 %v8028_v62, %v6669_v63  ;;  %v6653_v20 = vld [vmem:[%s10688_s3 + $0x2d8] sm:$0xf0]  ;;  %v8025_v24 = vld [vmem:[%s10688_s3 + $0x2cc] sm:$0xf0] }
 0x1a7   :  { %v6687_v63 = vld [vmem:[%s10688_s3 + $0x300] sm:$0xf] }
 0x1a8   :  { %v1270_v37 = vmax.f32 %v954_v29, %v1232_v61  ;;  %v8023_v61 = vld [vmem:[%s10688_s3 + $0x2c4] sm:$0xf]  ;;  %v6656_v29 = vor.u32 %v8024_v19, %v6653_v20  ;;  %v6688_v5 = vor.u32 %v8033_v0, %v6687_v63 }
 0x1a9   :  { %6541 = vmatmul.msk.bf16.vlgmr.msrb.gmra.mxu0 %vm169_vm0, %v2277_v32  ;;  %6542 = vmatmul.msk.bf16.vlgmr.msrb.gmra.mxu1 %vm169_vm0, %v2277_v32 }
 0x1aa   :  { %v1310_v46 = vadd.f32 %v8956_v27, %v1270_v37  ;;  %6543 = vmatmul.msk.bf16.vlgmr.msrb.gmra.mxu2 %vm169_vm0, %v2277_v32  ;;  %6544 = vmatmul.msk.bf16.vlgmr.msrb.gmra.mxu3 %vm169_vm0, %v2277_v32  ;;  %v1383_v27 = vld [vmem:[%s10691_s4] sm:$0xf]  ;;  %v6648_v32 = vor.u32 %v8023_v61, %v6645_v25 }
 0x1ab   :  { %2582 = vmatpush.bf16.msrb.mxu2 %v6624_v33  ;;  %2595 = vmatpush.bf16.msrb.mxu3 %v6628_v34  ;;  %v1385_v56 = vperm.slane %v1383_v27, 0  ;;  %v1386_v57 = vperm.slane %v1383_v27, 1  ;;  %v1387_v8 = vperm.slane %v1383_v27, 2  ;;  %v1388_v9 = vperm.slane %v1383_v27, 3 }
 0x1ac   :  { %v1346_v49 = vmax.f32 %v1310_v46, 0.0  ;;  %2556 = vmatpush.bf16.msrb.mxu0 %v6616_v40  ;;  %2569 = vmatpush.bf16.msrb.mxu1 %v6620_v41  ;;  %v6711_v40 = vld [vmem:[%s10688_s3 + $0x328] sm:$0xf]  ;;  %v8038_v41 = vld [vmem:[%s10688_s3 + $0x334] sm:$0xf0] }
 0x1ad   :  { %v1485_v52 = vpop.f32.mrf.mxu2  ;;  %v1498_v53 = vpop.f32.mrf.mxu3  ;;  %v1502_v1 = vadd.f32 %v1459_v30, %v1385_v56  ;;  %v1503_v2 = vadd.f32 %v1472_v31, %v1386_v57  ;;  %v6644_v31 = vor.u32 %v8025_v24, %v6643_v23  ;;  %v6695_v56 = vld [vmem:[%s10688_s3 + $0x308] sm:$0xf]  ;;  %v8034_v57 = vld [vmem:[%s10688_s3 + $0x314] sm:$0xf0]  ;;  %v6749_v23 = vld [vmem:[%s10688_s3 + $0x370] sm:$0xf0] }
 0x1ae   :  { %1382 = vst.msk [vmem:[#allocation2 + $0x118] sm:$0xff] %vm169_vm0, %v1346_v49  ;;  %v1461_v54 = vpop.f32.mrf.mxu0  ;;  %v1474_v55 = vpop.f32.mrf.mxu1  ;;  %v1504_v26 = vadd.f32 %v1485_v52, %v1387_v8  ;;  %v1505_v30 = vadd.f32 %v1498_v53, %v1388_v9  ;;  %v6705_v49 = vld [vmem:[%s10688_s3 + $0x330] sm:$0xf0]  ;;  %v2497_v52 = vpack.c.bf16 %v2496_v39, %v2496_v39  ;;  %v8039_v39 = vld [vmem:[%s10688_s3 + $0x344] sm:$0xf] }
 0x1af   :  { %2583 = vmatpush.bf16.msrb.mxu2 %v6608_v47  ;;  %2596 = vmatpush.bf16.msrb.mxu3 %v6612_v48  ;;  %v8037_v47 = vld [vmem:[%s10688_s3 + $0x32c] sm:$0xf0]  ;;  %v8035_v48 = vld [vmem:[%s10688_s3 + $0x324] sm:$0xf]  ;;  %v6712_v54 = vor.u32 %v8038_v41, %v6711_v40  ;;  %v6716_v55 = vor.u32 %v8036_v42, %v6713_v43  ;;  %v6733_v40 = vld [vmem:[%s10688_s3 + $0x350] sm:$0xf0] }
 0x1b0   :  { %2557 = vmatpush.bf16.msrb.mxu0 %v6600_v50  ;;  %2570 = vmatpush.bf16.msrb.mxu1 %v6604_v51  ;;  %v6704_v60 = vor.u32 %v8037_v47, %v6703_v44  ;;  %v6708_v62 = vor.u32 %v8035_v48, %v6705_v49  ;;  %v6736_v44 = vor.u32 %v8039_v39, %v6733_v40 }
 0x1b5   :  { %v1487_v3 = vpop.f32.mrf.mxu2  ;;  %v1500_v4 = vpop.f32.mrf.mxu3 }
 0x1b6   :  { %v1569_v10 = vpop.f32.mrf.mxu0  ;;  %v1582_v11 = vpop.f32.mrf.mxu1  ;;  %v6696_v3 = vor.u32 %v8034_v57, %v6695_v56  ;;  %v6700_v4 = vor.u32 %v8032_v58, %v6697_v59  ;;  %v8053_v58 = vld [vmem:[%s10688_s3 + $0x3ac] sm:$0xf0]  ;;  %v8051_v59 = vld [vmem:[%s10688_s3 + $0x3a4] sm:$0xf] }
 0x1b7   :  { %v1612_v13 = vadd.f32 %v1569_v10, %v1502_v1  ;;  %v1613_v14 = vadd.f32 %v1582_v11, %v1503_v2  ;;  %v8031_v1 = vld [vmem:[%s10688_s3 + $0x304] sm:$0xf]  ;;  %v6689_v2 = vld [vmem:[%s10688_s3 + $0x310] sm:$0xf0] }
 0x1b8   :  { %v6692_v6 = vor.u32 %v8031_v1, %v6689_v2 }
 0x1b9   :  { %6585 = vmatmul.msk.bf16.vlgmr.msra.gmra.mxu0 %vm169_vm0, %v2387_v12  ;;  %6586 = vmatmul.msk.bf16.vlgmr.msra.gmra.mxu1 %vm169_vm0, %v2387_v12 }
 0x1ba   :  { %6587 = vmatmul.msk.bf16.vlgmr.msra.gmra.mxu2 %vm169_vm0, %v2387_v12  ;;  %6588 = vmatmul.msk.bf16.vlgmr.msra.gmra.mxu3 %vm169_vm0, %v2387_v12 }
 0x1bb   :  { %2692 = vmatpush.bf16.msra.mxu2 %v6668_v15  ;;  %2705 = vmatpush.bf16.msra.mxu3 %v6672_v16  ;;  %v8046_v15 = vld [vmem:[%s10688_s3 + $0x374] sm:$0xf0]  ;;  %v8044_v16 = vld [vmem:[%s10688_s3 + $0x36c] sm:$0xf] }
 0x1bc   :  { %2666 = vmatpush.bf16.msra.mxu0 %v6660_v21  ;;  %2679 = vmatpush.bf16.msra.mxu1 %v6664_v22  ;;  %v8045_v21 = vld [vmem:[%s10688_s3 + $0x36c] sm:$0xf0]  ;;  %v8043_v22 = vld [vmem:[%s10688_s3 + $0x364] sm:$0xf] }
 0x1bd   :  { %v1595_v33 = vpop.f32.mrf.mxu2  ;;  %v1608_v34 = vpop.f32.mrf.mxu3 }
 0x1be   :  { %v1614_v35 = vadd.f32 %v1595_v33, %v1504_v26  ;;  %v1615_v36 = vadd.f32 %v1608_v34, %v1505_v30  ;;  %v1571_v37 = vpop.f32.mrf.mxu0  ;;  %v1584_v38 = vpop.f32.mrf.mxu1  ;;  %v6760_v30 = vor.u32 %v8044_v16, %v6757_v17  ;;  %v8040_v33 = vld [vmem:[%s10688_s3 + $0x34c] sm:$0xf]  ;;  %v6741_v34 = vld [vmem:[%s10688_s3 + $0x358] sm:$0xf0] }
 0x1bf   :  { %2693 = vmatpush.bf16.msra.mxu2 %v6652_v28  ;;  %2706 = vmatpush.bf16.msra.mxu3 %v6656_v29  ;;  %v6731_v37 = vld [vmem:[%s10688_s3 + $0x340] sm:$0xf]  ;;  %v8041_v38 = vld [vmem:[%s10688_s3 + $0x34c] sm:$0xf0]  ;;  %v6744_v42 = vor.u32 %v8040_v33, %v6741_v34  ;;  %v8059_v34 = vld [vmem:[%s10688_s3 + $0x3e4] sm:$0xf] }
 0x1c0   :  { %2667 = vmatpush.bf16.msra.mxu0 %v6644_v31  ;;  %2680 = vmatpush.bf16.msra.mxu1 %v6648_v32  ;;  %v6739_v31 = vld [vmem:[%s10688_s3 + $0x348] sm:$0xf]  ;;  %v8042_v32 = vld [vmem:[%s10688_s3 + $0x354] sm:$0xf0]  ;;  %v6732_v43 = vor.u32 %v8041_v38, %v6731_v37  ;;  %v8061_v33 = vld [vmem:[%s10688_s3 + $0x3ec] sm:$0xf0] }
 0x1c1   :  { %v6740_v41 = vor.u32 %v8042_v32, %v6739_v31 }
 0x1c5   :  { %v1597_v45 = vpop.f32.mrf.mxu2  ;;  %v1610_v46 = vpop.f32.mrf.mxu3 }
 0x1c6   :  { %v1679_v50 = vpop.f32.mrf.mxu0  ;;  %v1692_v51 = vpop.f32.mrf.mxu1 }
 0x1c7   :  { %v1722_v53 = vadd.f32 %v1679_v50, %v1612_v13  ;;  %v1723_v27 = vadd.f32 %v1692_v51, %v1613_v14  ;;  %v2606_v13 = vld [vmem:[#allocation2 + $0x58] sm:$0xff]  ;;  %v6755_v14 = vld [vmem:[%s10688_s3 + $0x368] sm:$0xf]  ;;  %v2716_v51 = vld [vmem:[#allocation2 + $0x60] sm:$0xff] }
 0x1c8   :  { %v2607_v25 = vpack.c.bf16 %v2606_v13, %v2606_v13  ;;  %v6756_v29 = vor.u32 %v8046_v15, %v6755_v14  ;;  %v2717_v0 = vpack.c.bf16 %v2716_v51, %v2716_v51  ;;  %v8047_v13 = vld [vmem:[%s10688_s3 + $0x384] sm:$0xf]  ;;  %v6777_v14 = vld [vmem:[%s10688_s3 + $0x390] sm:$0xf0] }
 0x1c9   :  { %6629 = vmatmul.msk.bf16.vlgmr.msrb.gmra.mxu0 %vm169_vm0, %v2497_v52  ;;  %6630 = vmatmul.msk.bf16.vlgmr.msrb.gmra.mxu1 %vm169_vm0, %v2497_v52  ;;  %v8055_v51 = vld [vmem:[%s10688_s3 + $0x3c4] sm:$0xf] }
 0x1ca   :  { %6631 = vmatmul.msk.bf16.vlgmr.msrb.gmra.mxu2 %vm169_vm0, %v2497_v52  ;;  %6632 = vmatmul.msk.bf16.vlgmr.msrb.gmra.mxu3 %vm169_vm0, %v2497_v52  ;;  %v6799_v52 = vld [vmem:[%s10688_s3 + $0x3a8] sm:$0xf] }
 0x1cb   :  { %2802 = vmatpush.bf16.msrb.mxu2 %v6712_v54  ;;  %2815 = vmatpush.bf16.msrb.mxu3 %v6716_v55  ;;  %v6801_v54 = vld [vmem:[%s10688_s3 + $0x3b8] sm:$0xf0]  ;;  %v6791_v55 = vld [vmem:[%s10688_s3 + $0x3a0] sm:$0xf] }
 0x1cc   :  { %2776 = vmatpush.bf16.msrb.mxu0 %v6704_v60  ;;  %2789 = vmatpush.bf16.msrb.mxu1 %v6708_v62  ;;  %v6793_v60 = vld [vmem:[%s10688_s3 + $0x3b0] sm:$0xf0] }
 0x1cd   :  { %v1705_v7 = vpop.f32.mrf.mxu2  ;;  %v1718_v8 = vpop.f32.mrf.mxu3 }
 0x1ce   :  { %v1724_v9 = vadd.f32 %v1705_v7, %v1614_v35  ;;  %v1725_v10 = vadd.f32 %v1718_v8, %v1615_v36  ;;  %v1681_v11 = vpop.f32.mrf.mxu0  ;;  %v1694_v12 = vpop.f32.mrf.mxu1  ;;  %v6748_v35 = vor.u32 %v8045_v21, %v6747_v18  ;;  %v6752_v36 = vor.u32 %v8043_v22, %v6749_v23  ;;  %v8048_v7 = vld [vmem:[%s10688_s3 + $0x38c] sm:$0xf]  ;;  %v6785_v8 = vld [vmem:[%s10688_s3 + $0x398] sm:$0xf0] }
 0x1cf   :  { %2803 = vmatpush.bf16.msrb.mxu2 %v6696_v3  ;;  %2816 = vmatpush.bf16.msrb.mxu3 %v6700_v4  ;;  %v6775_v11 = vld [vmem:[%s10688_s3 + $0x380] sm:$0xf]  ;;  %v8049_v12 = vld [vmem:[%s10688_s3 + $0x38c] sm:$0xf0]  ;;  %v6788_v16 = vor.u32 %v8048_v7, %v6785_v8  ;;  %v6780_v18 = vor.u32 %v8047_v13, %v6777_v14  ;;  %v8067_v8 = vld [vmem:[%s10688_s3 + $0x424] sm:$0xf] }
 0x1d0   :  { %2777 = vmatpush.bf16.msrb.mxu0 %v6688_v5  ;;  %2790 = vmatpush.bf16.msrb.mxu1 %v6692_v6  ;;  %v6783_v5 = vld [vmem:[%s10688_s3 + $0x388] sm:$0xf]  ;;  %v8050_v6 = vld [vmem:[%s10688_s3 + $0x394] sm:$0xf0]  ;;  %v6776_v17 = vor.u32 %v8049_v12, %v6775_v11  ;;  %v8069_v7 = vld [vmem:[%s10688_s3 + $0x42c] sm:$0xf0] }
 0x1d1   :  { %v6784_v15 = vor.u32 %v8050_v6, %v6783_v5 }
 0x1d5   :  { %v1707_v19 = vpop.f32.mrf.mxu2  ;;  %v1720_v20 = vpop.f32.mrf.mxu3 }
 0x1d6   :  { %v1789_v24 = vpop.f32.mrf.mxu0  ;;  %v1802_v61 = vpop.f32.mrf.mxu1 }
 0x1d7   :  { %v1832_v26 = vadd.f32 %v1789_v24, %v1722_v53  ;;  %v1833_v28 = vadd.f32 %v1802_v61, %v1723_v27  ;;  %v8054_v53 = vld [vmem:[%s10688_s3 + $0x3b4] sm:$0xf0]  ;;  %v8052_v27 = vld [vmem:[%s10688_s3 + $0x3ac] sm:$0xf] }
 0x1d8   :  { %v6800_v3 = vor.u32 %v8054_v53, %v6799_v52  ;;  %v6804_v4 = vor.u32 %v8052_v27, %v6801_v54  ;;  %v2826_v61 = vld [vmem:[#allocation2 + $0x68] sm:$0xff]  ;;  %v6821_v52 = vld [vmem:[%s10688_s3 + $0x3d0] sm:$0xf0] }
 0x1d9   :  { %6673 = vmatmul.msk.bf16.vlgmr.msra.gmra.mxu0 %vm169_vm0, %v2607_v25  ;;  %6674 = vmatmul.msk.bf16.vlgmr.msra.gmra.mxu1 %vm169_vm0, %v2607_v25  ;;  %v2827_v38 = vpack.c.bf16 %v2826_v61, %v2826_v61  ;;  %v8063_v61 = vld [vmem:[%s10688_s3 + $0x404] sm:$0xf] }
 0x1da   :  { %6675 = vmatmul.msk.bf16.vlgmr.msra.gmra.mxu2 %vm169_vm0, %v2607_v25  ;;  %6676 = vmatmul.msk.bf16.vlgmr.msra.gmra.mxu3 %vm169_vm0, %v2607_v25  ;;  %v6843_v25 = vld [vmem:[%s10688_s3 + $0x3e8] sm:$0xf] }
 0x1db   :  { %2912 = vmatpush.bf16.msra.mxu2 %v6756_v29  ;;  %2925 = vmatpush.bf16.msra.mxu3 %v6760_v30  ;;  %v6845_v29 = vld [vmem:[%s10688_s3 + $0x3f8] sm:$0xf0]  ;;  %v6835_v30 = vld [vmem:[%s10688_s3 + $0x3e0] sm:$0xf] }
 0x1dc   :  { %2886 = vmatpush.bf16.msra.mxu0 %v6748_v35  ;;  %2899 = vmatpush.bf16.msra.mxu1 %v6752_v36  ;;  %v6837_v35 = vld [vmem:[%s10688_s3 + $0x3f0] sm:$0xf0] }
 0x1dd   :  { %v1815_v45 = vpop.f32.mrf.mxu2  ;;  %v1828_v46 = vpop.f32.mrf.mxu3 }
 0x1de   :  { %v1834_v47 = vadd.f32 %v1815_v45, %v1724_v9  ;;  %v1835_v48 = vadd.f32 %v1828_v46, %v1725_v10  ;;  %v1791_v49 = vpop.f32.mrf.mxu0  ;;  %v1804_v50 = vpop.f32.mrf.mxu1  ;;  %v6792_v9 = vor.u32 %v8053_v58, %v6791_v55  ;;  %v6796_v10 = vor.u32 %v8051_v59, %v6793_v60  ;;  %v8056_v45 = vld [vmem:[%s10688_s3 + $0x3cc] sm:$0xf]  ;;  %v6829_v46 = vld [vmem:[%s10688_s3 + $0x3d8] sm:$0xf0] }
 0x1df   :  { %2913 = vmatpush.bf16.msra.mxu2 %v6740_v41  ;;  %2926 = vmatpush.bf16.msra.mxu3 %v6744_v42  ;;  %v6819_v49 = vld [vmem:[%s10688_s3 + $0x3c0] sm:$0xf]  ;;  %v8057_v50 = vld [vmem:[%s10688_s3 + $0x3cc] sm:$0xf0]  ;;  %v6832_v27 = vor.u32 %v8056_v45, %v6829_v46  ;;  %v6824_v55 = vor.u32 %v8055_v51, %v6821_v52  ;;  %v8075_v46 = vld [vmem:[%s10688_s3 + $0x464] sm:$0xf] }
 0x1e0   :  { %2887 = vmatpush.bf16.msra.mxu0 %v6732_v43  ;;  %2900 = vmatpush.bf16.msra.mxu1 %v6736_v44  ;;  %v6827_v43 = vld [vmem:[%s10688_s3 + $0x3c8] sm:$0xf]  ;;  %v8058_v44 = vld [vmem:[%s10688_s3 + $0x3d4] sm:$0xf0]  ;;  %v6820_v54 = vor.u32 %v8057_v50, %v6819_v49  ;;  %v8077_v45 = vld [vmem:[%s10688_s3 + $0x46c] sm:$0xf0] }
 0x1e1   :  { %v6828_v53 = vor.u32 %v8058_v44, %v6827_v43 }
 0x1e5   :  { %v1817_v56 = vpop.f32.mrf.mxu2  ;;  %v1830_v57 = vpop.f32.mrf.mxu3 }
 0x1e6   :  { %v1899_v62 = vpop.f32.mrf.mxu0  ;;  %v1912_v63 = vpop.f32.mrf.mxu1 }
 0x1e7   :  { %v1942_v1 = vadd.f32 %v1899_v62, %v1832_v26  ;;  %v1943_v2 = vadd.f32 %v1912_v63, %v1833_v28  ;;  %v8062_v26 = vld [vmem:[%s10688_s3 + $0x3f4] sm:$0xf0]  ;;  %v8060_v28 = vld [vmem:[%s10688_s3 + $0x3ec] sm:$0xf]  ;;  %v2936_v63 = vld [vmem:[#allocation2 + $0x70] sm:$0xff] }
 0x1e8   :  { %v6844_v41 = vor.u32 %v8062_v26, %v6843_v25  ;;  %v6848_v42 = vor.u32 %v8060_v28, %v6845_v29  ;;  %v2937_v12 = vpack.c.bf16 %v2936_v63, %v2936_v63  ;;  %v6865_v25 = vld [vmem:[%s10688_s3 + $0x410] sm:$0xf0]  ;;  %v8071_v63 = vld [vmem:[%s10688_s3 + $0x444] sm:$0xf] }
 0x1e9   :  { %6717 = vmatmul.msk.bf16.vlgmr.msrb.gmra.mxu0 %vm169_vm0, %v2717_v0  ;;  %6718 = vmatmul.msk.bf16.vlgmr.msrb.gmra.mxu1 %vm169_vm0, %v2717_v0 }
 0x1ea   :  { %6719 = vmatmul.msk.bf16.vlgmr.msrb.gmra.mxu2 %vm169_vm0, %v2717_v0  ;;  %6720 = vmatmul.msk.bf16.vlgmr.msrb.gmra.mxu3 %vm169_vm0, %v2717_v0  ;;  %v6887_v0 = vld [vmem:[%s10688_s3 + $0x428] sm:$0xf] }
 0x1eb   :  { %3022 = vmatpush.bf16.msrb.mxu2 %v6800_v3  ;;  %3035 = vmatpush.bf16.msrb.mxu3 %v6804_v4  ;;  %v6889_v3 = vld [vmem:[%s10688_s3 + $0x438] sm:$0xf0]  ;;  %v6879_v4 = vld [vmem:[%s10688_s3 + $0x420] sm:$0xf] }
 0x1ec   :  { %2996 = vmatpush.bf16.msrb.mxu0 %v6792_v9  ;;  %3009 = vmatpush.bf16.msrb.mxu1 %v6796_v10  ;;  %v6881_v9 = vld [vmem:[%s10688_s3 + $0x430] sm:$0xf0] }
 0x1ed   :  { %v1925_v19 = vpop.f32.mrf.mxu2  ;;  %v1938_v20 = vpop.f32.mrf.mxu3 }
 0x1ee   :  { %v1944_v21 = vadd.f32 %v1925_v19, %v1834_v47  ;;  %v1945_v22 = vadd.f32 %v1938_v20, %v1835_v48  ;;  %v1901_v23 = vpop.f32.mrf.mxu0  ;;  %v1914_v24 = vpop.f32.mrf.mxu1  ;;  %v6836_v47 = vor.u32 %v8061_v33, %v6835_v30  ;;  %v6840_v48 = vor.u32 %v8059_v34, %v6837_v35  ;;  %v8064_v19 = vld [vmem:[%s10688_s3 + $0x40c] sm:$0xf]  ;;  %v6873_v20 = vld [vmem:[%s10688_s3 + $0x418] sm:$0xf0] }
 0x1ef   :  { %3023 = vmatpush.bf16.msrb.mxu2 %v6784_v15  ;;  %3036 = vmatpush.bf16.msrb.mxu3 %v6788_v16  ;;  %v6863_v23 = vld [vmem:[%s10688_s3 + $0x400] sm:$0xf]  ;;  %v8065_v24 = vld [vmem:[%s10688_s3 + $0x40c] sm:$0xf0]  ;;  %v6876_v28 = vor.u32 %v8064_v19, %v6873_v20  ;;  %v6868_v30 = vor.u32 %v8063_v61, %v6865_v25  ;;  %v8083_v20 = vld [vmem:[%s10688_s3 + $0x4a4] sm:$0xf] }
 0x1f0   :  { %2997 = vmatpush.bf16.msrb.mxu0 %v6776_v17  ;;  %3010 = vmatpush.bf16.msrb.mxu1 %v6780_v18  ;;  %v6871_v17 = vld [vmem:[%s10688_s3 + $0x408] sm:$0xf]  ;;  %v8066_v18 = vld [vmem:[%s10688_s3 + $0x414] sm:$0xf0]  ;;  %v6864_v29 = vor.u32 %v8065_v24, %v6863_v23  ;;  %v8085_v19 = vld [vmem:[%s10688_s3 + $0x4ac] sm:$0xf0] }
 0x1f1   :  { %v6872_v26 = vor.u32 %v8066_v18, %v6871_v17 }
 0x1f5   :  { %v1927_v31 = vpop.f32.mrf.mxu2  ;;  %v1940_v32 = vpop.f32.mrf.mxu3 }
 0x1f6   :  { %v2009_v36 = vpop.f32.mrf.mxu0  ;;  %v2022_v37 = vpop.f32.mrf.mxu1 }
 0x1f7   :  { %v2052_v39 = vadd.f32 %v2009_v36, %v1942_v1  ;;  %v2053_v40 = vadd.f32 %v2022_v37, %v1943_v2  ;;  %v8070_v1 = vld [vmem:[%s10688_s3 + $0x434] sm:$0xf0]  ;;  %v8068_v2 = vld [vmem:[%s10688_s3 + $0x42c] sm:$0xf] }
 0x1f8   :  { %v6888_v15 = vor.u32 %v8070_v1, %v6887_v0  ;;  %v6892_v16 = vor.u32 %v8068_v2, %v6889_v3  ;;  %v3046_v37 = vld [vmem:[#allocation2 + $0x78] sm:$0xff]  ;;  %v6909_v0 = vld [vmem:[%s10688_s3 + $0x450] sm:$0xf0] }
 0x1f9   :  { %6761 = vmatmul.msk.bf16.vlgmr.msra.gmra.mxu0 %vm169_vm0, %v2827_v38  ;;  %6762 = vmatmul.msk.bf16.vlgmr.msra.gmra.mxu1 %vm169_vm0, %v2827_v38  ;;  %v3047_v50 = vpack.c.bf16 %v3046_v37, %v3046_v37  ;;  %v8079_v37 = vld [vmem:[%s10688_s3 + $0x484] sm:$0xf] }
 0x1fa   :  { %6763 = vmatmul.msk.bf16.vlgmr.msra.gmra.mxu2 %vm169_vm0, %v2827_v38  ;;  %6764 = vmatmul.msk.bf16.vlgmr.msra.gmra.mxu3 %vm169_vm0, %v2827_v38  ;;  %v6931_v38 = vld [vmem:[%s10688_s3 + $0x468] sm:$0xf] }
 0x1fb   :  { %3132 = vmatpush.bf16.msra.mxu2 %v6844_v41  ;;  %3145 = vmatpush.bf16.msra.mxu3 %v6848_v42  ;;  %v6933_v41 = vld [vmem:[%s10688_s3 + $0x478] sm:$0xf0]  ;;  %v6923_v42 = vld [vmem:[%s10688_s3 + $0x460] sm:$0xf] }
 0x1fc   :  { %3106 = vmatpush.bf16.msra.mxu0 %v6836_v47  ;;  %3119 = vmatpush.bf16.msra.mxu1 %v6840_v48  ;;  %v6925_v47 = vld [vmem:[%s10688_s3 + $0x470] sm:$0xf0] }
 0x1fd   :  { %v2035_v56 = vpop.f32.mrf.mxu2  ;;  %v2048_v57 = vpop.f32.mrf.mxu3 }
 0x1fe   :  { %v2054_v58 = vadd.f32 %v2035_v56, %v1944_v21  ;;  %v2055_v59 = vadd.f32 %v2048_v57, %v1945_v22  ;;  %v2011_v60 = vpop.f32.mrf.mxu0  ;;  %v2024_v62 = vpop.f32.mrf.mxu1  ;;  %v6880_v21 = vor.u32 %v8069_v7, %v6879_v4  ;;  %v6884_v22 = vor.u32 %v8067_v8, %v6881_v9  ;;  %v8072_v56 = vld [vmem:[%s10688_s3 + $0x44c] sm:$0xf]  ;;  %v6917_v57 = vld [vmem:[%s10688_s3 + $0x458] sm:$0xf0] }
 0x1ff   :  { %3133 = vmatpush.bf16.msra.mxu2 %v6828_v53  ;;  %3146 = vmatpush.bf16.msra.mxu3 %v6832_v27  ;;  %v6907_v60 = vld [vmem:[%s10688_s3 + $0x440] sm:$0xf]  ;;  %v8073_v62 = vld [vmem:[%s10688_s3 + $0x44c] sm:$0xf0]  ;;  %v6920_v2 = vor.u32 %v8072_v56, %v6917_v57  ;;  %v6912_v4 = vor.u32 %v8071_v63, %v6909_v0  ;;  %v8091_v57 = vld [vmem:[%s10688_s3 + $0x4e4] sm:$0xf] }
 0x200   :  { %3107 = vmatpush.bf16.msra.mxu0 %v6820_v54  ;;  %3120 = vmatpush.bf16.msra.mxu1 %v6824_v55  ;;  %v6915_v54 = vld [vmem:[%s10688_s3 + $0x448] sm:$0xf]  ;;  %v8074_v55 = vld [vmem:[%s10688_s3 + $0x454] sm:$0xf0]  ;;  %v6908_v3 = vor.u32 %v8073_v62, %v6907_v60  ;;  %v8093_v56 = vld [vmem:[%s10688_s3 + $0x4ec] sm:$0xf0] }
 0x201   :  { %v6916_v1 = vor.u32 %v8074_v55, %v6915_v54 }
 0x205   :  { %v2037_v5 = vpop.f32.mrf.mxu2  ;;  %v2050_v6 = vpop.f32.mrf.mxu3 }
 0x206   :  { %v2119_v10 = vpop.f32.mrf.mxu0  ;;  %v2132_v11 = vpop.f32.mrf.mxu1 }
 0x207   :  { %v2162_v13 = vadd.f32 %v2119_v10, %v2052_v39  ;;  %v2163_v14 = vadd.f32 %v2132_v11, %v2053_v40  ;;  %v8078_v39 = vld [vmem:[%s10688_s3 + $0x474] sm:$0xf0]  ;;  %v8076_v40 = vld [vmem:[%s10688_s3 + $0x46c] sm:$0xf]  ;;  %v3156_v11 = vld [vmem:[#allocation2 + $0x80] sm:$0xff] }
 0x208   :  { %v6932_v53 = vor.u32 %v8078_v39, %v6931_v38  ;;  %v6936_v27 = vor.u32 %v8076_v40, %v6933_v41  ;;  %v3157_v24 = vpack.c.bf16 %v3156_v11, %v3156_v11  ;;  %v6953_v38 = vld [vmem:[%s10688_s3 + $0x490] sm:$0xf0]  ;;  %v8087_v11 = vld [vmem:[%s10688_s3 + $0x4c4] sm:$0xf] }
 0x209   :  { %6805 = vmatmul.msk.bf16.vlgmr.msrb.gmra.mxu0 %vm169_vm0, %v2937_v12  ;;  %6806 = vmatmul.msk.bf16.vlgmr.msrb.gmra.mxu1 %vm169_vm0, %v2937_v12 }
 0x20a   :  { %6807 = vmatmul.msk.bf16.vlgmr.msrb.gmra.mxu2 %vm169_vm0, %v2937_v12  ;;  %6808 = vmatmul.msk.bf16.vlgmr.msrb.gmra.mxu3 %vm169_vm0, %v2937_v12  ;;  %v6975_v12 = vld [vmem:[%s10688_s3 + $0x4a8] sm:$0xf] }
 0x20b   :  { %3242 = vmatpush.bf16.msrb.mxu2 %v6888_v15  ;;  %3255 = vmatpush.bf16.msrb.mxu3 %v6892_v16  ;;  %v6977_v15 = vld [vmem:[%s10688_s3 + $0x4b8] sm:$0xf0]  ;;  %v6967_v16 = vld [vmem:[%s10688_s3 + $0x4a0] sm:$0xf] }
 0x20c   :  { %3216 = vmatpush.bf16.msrb.mxu0 %v6880_v21  ;;  %3229 = vmatpush.bf16.msrb.mxu1 %v6884_v22  ;;  %v6969_v21 = vld [vmem:[%s10688_s3 + $0x4b0] sm:$0xf0] }
 0x20d   :  { %v2145_v31 = vpop.f32.mrf.mxu2  ;;  %v2158_v32 = vpop.f32.mrf.mxu3 }
 0x20e   :  { %v2164_v33 = vadd.f32 %v2145_v31, %v2054_v58  ;;  %v2165_v34 = vadd.f32 %v2158_v32, %v2055_v59  ;;  %v2121_v35 = vpop.f32.mrf.mxu0  ;;  %v2134_v36 = vpop.f32.mrf.mxu1  ;;  %v6924_v58 = vor.u32 %v8077_v45, %v6923_v42  ;;  %v6928_v59 = vor.u32 %v8075_v46, %v6925_v47  ;;  %v8080_v31 = vld [vmem:[%s10688_s3 + $0x48c] sm:$0xf]  ;;  %v6961_v32 = vld [vmem:[%s10688_s3 + $0x498] sm:$0xf0] }
 0x20f   :  { %3243 = vmatpush.bf16.msrb.mxu2 %v6872_v26  ;;  %3256 = vmatpush.bf16.msrb.mxu3 %v6876_v28  ;;  %v6951_v35 = vld [vmem:[%s10688_s3 + $0x480] sm:$0xf]  ;;  %v8081_v36 = vld [vmem:[%s10688_s3 + $0x48c] sm:$0xf0]  ;;  %v6964_v40 = vor.u32 %v8080_v31, %v6961_v32  ;;  %v6956_v42 = vor.u32 %v8079_v37, %v6953_v38  ;;  %v8099_v32 = vld [vmem:[%s10688_s3 + $0x524] sm:$0xf] }
 0x210   :  { %3217 = vmatpush.bf16.msrb.mxu0 %v6864_v29  ;;  %3230 = vmatpush.bf16.msrb.mxu1 %v6868_v30  ;;  %v6959_v29 = vld [vmem:[%s10688_s3 + $0x488] sm:$0xf]  ;;  %v8082_v30 = vld [vmem:[%s10688_s3 + $0x494] sm:$0xf0]  ;;  %v6952_v41 = vor.u32 %v8081_v36, %v6951_v35  ;;  %v8101_v31 = vld [vmem:[%s10688_s3 + $0x52c] sm:$0xf0] }
 0x211   :  { %v6960_v39 = vor.u32 %v8082_v30, %v6959_v29 }
 0x215   :  { %v2147_v43 = vpop.f32.mrf.mxu2  ;;  %v2160_v44 = vpop.f32.mrf.mxu3 }
 0x216   :  { %v2229_v48 = vpop.f32.mrf.mxu0  ;;  %v2242_v49 = vpop.f32.mrf.mxu1 }
 0x217   :  { %v2272_v51 = vadd.f32 %v2229_v48, %v2162_v13  ;;  %v2273_v52 = vadd.f32 %v2242_v49, %v2163_v14  ;;  %v8086_v13 = vld [vmem:[%s10688_s3 + $0x4b4] sm:$0xf0]  ;;  %v8084_v14 = vld [vmem:[%s10688_s3 + $0x4ac] sm:$0xf] }
 0x218   :  { %v6976_v26 = vor.u32 %v8086_v13, %v6975_v12  ;;  %v6980_v28 = vor.u32 %v8084_v14, %v6977_v15  ;;  %v3266_v49 = vld [vmem:[#allocation2 + $0x88] sm:$0xff]  ;;  %v6997_v12 = vld [vmem:[%s10688_s3 + $0x4d0] sm:$0xf0] }
 0x219   :  { %6849 = vmatmul.msk.bf16.vlgmr.msra.gmra.mxu0 %vm169_vm0, %v3047_v50  ;;  %6850 = vmatmul.msk.bf16.vlgmr.msra.gmra.mxu1 %vm169_vm0, %v3047_v50  ;;  %v3267_v62 = vpack.c.bf16 %v3266_v49, %v3266_v49  ;;  %v8095_v49 = vld [vmem:[%s10688_s3 + $0x504] sm:$0xf] }
 0x21a   :  { %6851 = vmatmul.msk.bf16.vlgmr.msra.gmra.mxu2 %vm169_vm0, %v3047_v50  ;;  %6852 = vmatmul.msk.bf16.vlgmr.msra.gmra.mxu3 %vm169_vm0, %v3047_v50  ;;  %v7019_v50 = vld [vmem:[%s10688_s3 + $0x4e8] sm:$0xf] }
 0x21b   :  { %3352 = vmatpush.bf16.msra.mxu2 %v6932_v53  ;;  %3365 = vmatpush.bf16.msra.mxu3 %v6936_v27  ;;  %v7021_v53 = vld [vmem:[%s10688_s3 + $0x4f8] sm:$0xf0]  ;;  %v7011_v27 = vld [vmem:[%s10688_s3 + $0x4e0] sm:$0xf] }
 0x21c   :  { %3326 = vmatpush.bf16.msra.mxu0 %v6924_v58  ;;  %3339 = vmatpush.bf16.msra.mxu1 %v6928_v59  ;;  %v7013_v58 = vld [vmem:[%s10688_s3 + $0x4f0] sm:$0xf0] }
 0x21d   :  { %v2255_v5 = vpop.f32.mrf.mxu2  ;;  %v2268_v6 = vpop.f32.mrf.mxu3 }
 0x21e   :  { %v2274_v7 = vadd.f32 %v2255_v5, %v2164_v33  ;;  %v2275_v8 = vadd.f32 %v2268_v6, %v2165_v34  ;;  %v2231_v9 = vpop.f32.mrf.mxu0  ;;  %v2244_v10 = vpop.f32.mrf.mxu1  ;;  %v6968_v33 = vor.u32 %v8085_v19, %v6967_v16  ;;  %v6972_v34 = vor.u32 %v8083_v20, %v6969_v21  ;;  %v8088_v5 = vld [vmem:[%s10688_s3 + $0x4cc] sm:$0xf]  ;;  %v7005_v6 = vld [vmem:[%s10688_s3 + $0x4d8] sm:$0xf0] }
 0x21f   :  { %3353 = vmatpush.bf16.msra.mxu2 %v6916_v1  ;;  %3366 = vmatpush.bf16.msra.mxu3 %v6920_v2  ;;  %v6995_v9 = vld [vmem:[%s10688_s3 + $0x4c0] sm:$0xf]  ;;  %v8089_v10 = vld [vmem:[%s10688_s3 + $0x4cc] sm:$0xf0]  ;;  %v7008_v14 = vor.u32 %v8088_v5, %v7005_v6  ;;  %v7000_v16 = vor.u32 %v8087_v11, %v6997_v12  ;;  %v8107_v6 = vld [vmem:[%s10688_s3 + $0x564] sm:$0xf] }
 0x220   :  { %3327 = vmatpush.bf16.msra.mxu0 %v6908_v3  ;;  %3340 = vmatpush.bf16.msra.mxu1 %v6912_v4  ;;  %v7003_v3 = vld [vmem:[%s10688_s3 + $0x4c8] sm:$0xf]  ;;  %v8090_v4 = vld [vmem:[%s10688_s3 + $0x4d4] sm:$0xf0]  ;;  %v6996_v15 = vor.u32 %v8089_v10, %v6995_v9  ;;  %v8109_v5 = vld [vmem:[%s10688_s3 + $0x56c] sm:$0xf0] }
 0x221   :  { %v7004_v13 = vor.u32 %v8090_v4, %v7003_v3 }
 0x225   :  { %v2257_v17 = vpop.f32.mrf.mxu2  ;;  %v2270_v18 = vpop.f32.mrf.mxu3 }
 0x226   :  { %v2339_v22 = vpop.f32.mrf.mxu0  ;;  %v2352_v23 = vpop.f32.mrf.mxu1 }
 0x227   :  { %v2382_v61 = vadd.f32 %v2339_v22, %v2272_v51  ;;  %v2383_v25 = vadd.f32 %v2352_v23, %v2273_v52  ;;  %v8094_v51 = vld [vmem:[%s10688_s3 + $0x4f4] sm:$0xf0]  ;;  %v8092_v52 = vld [vmem:[%s10688_s3 + $0x4ec] sm:$0xf]  ;;  %v3376_v23 = vld [vmem:[#allocation2 + $0x90] sm:$0xff] }
 0x228   :  { %v7020_v1 = vor.u32 %v8094_v51, %v7019_v50  ;;  %v7024_v2 = vor.u32 %v8092_v52, %v7021_v53  ;;  %v3377_v36 = vpack.c.bf16 %v3376_v23, %v3376_v23  ;;  %v7041_v50 = vld [vmem:[%s10688_s3 + $0x510] sm:$0xf0]  ;;  %v8103_v23 = vld [vmem:[%s10688_s3 + $0x544] sm:$0xf] }
 0x229   :  { %6893 = vmatmul.msk.bf16.vlgmr.msrb.gmra.mxu0 %vm169_vm0, %v3157_v24  ;;  %6894 = vmatmul.msk.bf16.vlgmr.msrb.gmra.mxu1 %vm169_vm0, %v3157_v24 }
 0x22a   :  { %6895 = vmatmul.msk.bf16.vlgmr.msrb.gmra.mxu2 %vm169_vm0, %v3157_v24  ;;  %6896 = vmatmul.msk.bf16.vlgmr.msrb.gmra.mxu3 %vm169_vm0, %v3157_v24  ;;  %v7063_v24 = vld [vmem:[%s10688_s3 + $0x528] sm:$0xf] }
 0x22b   :  { %3462 = vmatpush.bf16.msrb.mxu2 %v6976_v26  ;;  %3475 = vmatpush.bf16.msrb.mxu3 %v6980_v28  ;;  %v7065_v26 = vld [vmem:[%s10688_s3 + $0x538] sm:$0xf0]  ;;  %v7055_v28 = vld [vmem:[%s10688_s3 + $0x520] sm:$0xf] }
 0x22c   :  { %3436 = vmatpush.bf16.msrb.mxu0 %v6968_v33  ;;  %3449 = vmatpush.bf16.msrb.mxu1 %v6972_v34  ;;  %v7057_v33 = vld [vmem:[%s10688_s3 + $0x530] sm:$0xf0] }
 0x22d   :  { %v2365_v43 = vpop.f32.mrf.mxu2  ;;  %v2378_v44 = vpop.f32.mrf.mxu3 }
 0x22e   :  { %v2384_v45 = vadd.f32 %v2365_v43, %v2274_v7  ;;  %v2385_v46 = vadd.f32 %v2378_v44, %v2275_v8  ;;  %v2341_v47 = vpop.f32.mrf.mxu0  ;;  %v2354_v48 = vpop.f32.mrf.mxu1  ;;  %v7012_v7 = vor.u32 %v8093_v56, %v7011_v27  ;;  %v7016_v8 = vor.u32 %v8091_v57, %v7013_v58  ;;  %v8096_v43 = vld [vmem:[%s10688_s3 + $0x50c] sm:$0xf]  ;;  %v7049_v44 = vld [vmem:[%s10688_s3 + $0x518] sm:$0xf0] }
 0x22f   :  { %3463 = vmatpush.bf16.msrb.mxu2 %v6960_v39  ;;  %3476 = vmatpush.bf16.msrb.mxu3 %v6964_v40  ;;  %v7039_v47 = vld [vmem:[%s10688_s3 + $0x500] sm:$0xf]  ;;  %v8097_v48 = vld [vmem:[%s10688_s3 + $0x50c] sm:$0xf0]  ;;  %v7052_v52 = vor.u32 %v8096_v43, %v7049_v44  ;;  %v7044_v27 = vor.u32 %v8095_v49, %v7041_v50  ;;  %v8115_v44 = vld [vmem:[%s10688_s3 + $0x5a4] sm:$0xf] }
 0x230   :  { %3437 = vmatpush.bf16.msrb.mxu0 %v6952_v41  ;;  %3450 = vmatpush.bf16.msrb.mxu1 %v6956_v42  ;;  %v7047_v41 = vld [vmem:[%s10688_s3 + $0x508] sm:$0xf]  ;;  %v8098_v42 = vld [vmem:[%s10688_s3 + $0x514] sm:$0xf0]  ;;  %v7040_v53 = vor.u32 %v8097_v48, %v7039_v47  ;;  %v8117_v43 = vld [vmem:[%s10688_s3 + $0x5ac] sm:$0xf0] }
 0x231   :  { %v7048_v51 = vor.u32 %v8098_v42, %v7047_v41 }
 0x235   :  { %v2367_v54 = vpop.f32.mrf.mxu2  ;;  %v2380_v55 = vpop.f32.mrf.mxu3 }
 0x236   :  { %v2449_v59 = vpop.f32.mrf.mxu0  ;;  %v2462_v60 = vpop.f32.mrf.mxu1 }
 0x237   :  { %v2492_v63 = vadd.f32 %v2449_v59, %v2382_v61  ;;  %v2493_v0 = vadd.f32 %v2462_v60, %v2383_v25  ;;  %v8102_v61 = vld [vmem:[%s10688_s3 + $0x534] sm:$0xf0]  ;;  %v8100_v25 = vld [vmem:[%s10688_s3 + $0x52c] sm:$0xf] }
 0x238   :  { %v7064_v39 = vor.u32 %v8102_v61, %v7063_v24  ;;  %v7068_v40 = vor.u32 %v8100_v25, %v7065_v26  ;;  %v3486_v60 = vld [vmem:[#allocation2 + $0x98] sm:$0xff]  ;;  %v7085_v24 = vld [vmem:[%s10688_s3 + $0x550] sm:$0xf0] }
 0x239   :  { %6937 = vmatmul.msk.bf16.vlgmr.msra.gmra.mxu0 %vm169_vm0, %v3267_v62  ;;  %6938 = vmatmul.msk.bf16.vlgmr.msra.gmra.mxu1 %vm169_vm0, %v3267_v62  ;;  %v3487_v10 = vpack.c.bf16 %v3486_v60, %v3486_v60  ;;  %v8111_v60 = vld [vmem:[%s10688_s3 + $0x584] sm:$0xf] }
 0x23a   :  { %6939 = vmatmul.msk.bf16.vlgmr.msra.gmra.mxu2 %vm169_vm0, %v3267_v62  ;;  %6940 = vmatmul.msk.bf16.vlgmr.msra.gmra.mxu3 %vm169_vm0, %v3267_v62  ;;  %v7107_v62 = vld [vmem:[%s10688_s3 + $0x568] sm:$0xf] }
 0x23b   :  { %3572 = vmatpush.bf16.msra.mxu2 %v7020_v1  ;;  %3585 = vmatpush.bf16.msra.mxu3 %v7024_v2  ;;  %v7109_v1 = vld [vmem:[%s10688_s3 + $0x578] sm:$0xf0]  ;;  %v7099_v2 = vld [vmem:[%s10688_s3 + $0x560] sm:$0xf] }
 0x23c   :  { %3546 = vmatpush.bf16.msra.mxu0 %v7012_v7  ;;  %3559 = vmatpush.bf16.msra.mxu1 %v7016_v8  ;;  %v7101_v7 = vld [vmem:[%s10688_s3 + $0x570] sm:$0xf0] }
 0x23d   :  { %v2475_v17 = vpop.f32.mrf.mxu2  ;;  %v2488_v18 = vpop.f32.mrf.mxu3 }
 0x23e   :  { %v2494_v19 = vadd.f32 %v2475_v17, %v2384_v45  ;;  %v2495_v20 = vadd.f32 %v2488_v18, %v2385_v46  ;;  %v2451_v21 = vpop.f32.mrf.mxu0  ;;  %v2464_v22 = vpop.f32.mrf.mxu1  ;;  %v7056_v45 = vor.u32 %v8101_v31, %v7055_v28  ;;  %v7060_v46 = vor.u32 %v8099_v32, %v7057_v33  ;;  %v8104_v17 = vld [vmem:[%s10688_s3 + $0x54c] sm:$0xf]  ;;  %v7093_v18 = vld [vmem:[%s10688_s3 + $0x558] sm:$0xf0] }
 0x23f   :  { %3573 = vmatpush.bf16.msra.mxu2 %v7004_v13  ;;  %3586 = vmatpush.bf16.msra.mxu3 %v7008_v14  ;;  %v7083_v21 = vld [vmem:[%s10688_s3 + $0x540] sm:$0xf]  ;;  %v8105_v22 = vld [vmem:[%s10688_s3 + $0x54c] sm:$0xf0]  ;;  %v7096_v25 = vor.u32 %v8104_v17, %v7093_v18  ;;  %v7088_v28 = vor.u32 %v8103_v23, %v7085_v24  ;;  %v8123_v18 = vld [vmem:[%s10688_s3 + $0x5e4] sm:$0xf] }
 0x240   :  { %3547 = vmatpush.bf16.msra.mxu0 %v6996_v15  ;;  %3560 = vmatpush.bf16.msra.mxu1 %v7000_v16  ;;  %v7091_v15 = vld [vmem:[%s10688_s3 + $0x548] sm:$0xf]  ;;  %v8106_v16 = vld [vmem:[%s10688_s3 + $0x554] sm:$0xf0]  ;;  %v7084_v26 = vor.u32 %v8105_v22, %v7083_v21  ;;  %v8125_v17 = vld [vmem:[%s10688_s3 + $0x5ec] sm:$0xf0] }
 0x241   :  { %v7092_v61 = vor.u32 %v8106_v16, %v7091_v15 }
 0x245   :  { %v2477_v29 = vpop.f32.mrf.mxu2  ;;  %v2490_v30 = vpop.f32.mrf.mxu3 }
 0x246   :  { %v2559_v34 = vpop.f32.mrf.mxu0  ;;  %v2572_v35 = vpop.f32.mrf.mxu1 }
 0x247   :  { %v2602_v37 = vadd.f32 %v2559_v34, %v2492_v63  ;;  %v2603_v38 = vadd.f32 %v2572_v35, %v2493_v0  ;;  %v8110_v63 = vld [vmem:[%s10688_s3 + $0x574] sm:$0xf0]  ;;  %v8108_v0 = vld [vmem:[%s10688_s3 + $0x56c] sm:$0xf]  ;;  %v3596_v35 = vld [vmem:[#allocation2 + $0xa0] sm:$0xff] }
 0x248   :  { %v7108_v13 = vor.u32 %v8110_v63, %v7107_v62  ;;  %v7112_v14 = vor.u32 %v8108_v0, %v7109_v1  ;;  %v3597_v48 = vpack.c.bf16 %v3596_v35, %v3596_v35  ;;  %v7129_v62 = vld [vmem:[%s10688_s3 + $0x590] sm:$0xf0]  ;;  %v8119_v35 = vld [vmem:[%s10688_s3 + $0x5c4] sm:$0xf] }
 0x249   :  { %6981 = vmatmul.msk.bf16.vlgmr.msrb.gmra.mxu0 %vm169_vm0, %v3377_v36  ;;  %6982 = vmatmul.msk.bf16.vlgmr.msrb.gmra.mxu1 %vm169_vm0, %v3377_v36 }
 0x24a   :  { %6983 = vmatmul.msk.bf16.vlgmr.msrb.gmra.mxu2 %vm169_vm0, %v3377_v36  ;;  %6984 = vmatmul.msk.bf16.vlgmr.msrb.gmra.mxu3 %vm169_vm0, %v3377_v36  ;;  %v7151_v36 = vld [vmem:[%s10688_s3 + $0x5a8] sm:$0xf] }
 0x24b   :  { %3682 = vmatpush.bf16.msrb.mxu2 %v7064_v39  ;;  %3695 = vmatpush.bf16.msrb.mxu3 %v7068_v40  ;;  %v7153_v39 = vld [vmem:[%s10688_s3 + $0x5b8] sm:$0xf0]  ;;  %v7143_v40 = vld [vmem:[%s10688_s3 + $0x5a0] sm:$0xf] }
 0x24c   :  { %3656 = vmatpush.bf16.msrb.mxu0 %v7056_v45  ;;  %3669 = vmatpush.bf16.msrb.mxu1 %v7060_v46  ;;  %v7145_v45 = vld [vmem:[%s10688_s3 + $0x5b0] sm:$0xf0] }
 0x24d   :  { %v2585_v54 = vpop.f32.mrf.mxu2  ;;  %v2598_v55 = vpop.f32.mrf.mxu3 }
 0x24e   :  { %v2604_v56 = vadd.f32 %v2585_v54, %v2494_v19  ;;  %v2605_v57 = vadd.f32 %v2598_v55, %v2495_v20  ;;  %v2561_v58 = vpop.f32.mrf.mxu0  ;;  %v2574_v59 = vpop.f32.mrf.mxu1  ;;  %v7100_v19 = vor.u32 %v8109_v5, %v7099_v2  ;;  %v7104_v20 = vor.u32 %v8107_v6, %v7101_v7  ;;  %v8112_v54 = vld [vmem:[%s10688_s3 + $0x58c] sm:$0xf]  ;;  %v7137_v55 = vld [vmem:[%s10688_s3 + $0x598] sm:$0xf0] }
 0x24f   :  { %3683 = vmatpush.bf16.msrb.mxu2 %v7048_v51  ;;  %3696 = vmatpush.bf16.msrb.mxu3 %v7052_v52  ;;  %v7127_v58 = vld [vmem:[%s10688_s3 + $0x580] sm:$0xf]  ;;  %v8113_v59 = vld [vmem:[%s10688_s3 + $0x58c] sm:$0xf0]  ;;  %v7140_v0 = vor.u32 %v8112_v54, %v7137_v55  ;;  %v7132_v2 = vor.u32 %v8111_v60, %v7129_v62  ;;  %v8131_v55 = vld [vmem:[%s10688_s3 + $0x624] sm:$0xf] }
 0x250   :  { %3657 = vmatpush.bf16.msrb.mxu0 %v7040_v53  ;;  %3670 = vmatpush.bf16.msrb.mxu1 %v7044_v27  ;;  %v7135_v53 = vld [vmem:[%s10688_s3 + $0x588] sm:$0xf]  ;;  %v8114_v27 = vld [vmem:[%s10688_s3 + $0x594] sm:$0xf0]  ;;  %v7128_v1 = vor.u32 %v8113_v59, %v7127_v58  ;;  %v8133_v54 = vld [vmem:[%s10688_s3 + $0x62c] sm:$0xf0] }
 0x251   :  { %v7136_v63 = vor.u32 %v8114_v27, %v7135_v53 }
 0x255   :  { %v2587_v3 = vpop.f32.mrf.mxu2  ;;  %v2600_v4 = vpop.f32.mrf.mxu3 }
 0x256   :  { %v2669_v8 = vpop.f32.mrf.mxu0  ;;  %v2682_v9 = vpop.f32.mrf.mxu1 }
 0x257   :  { %v2712_v11 = vadd.f32 %v2669_v8, %v2602_v37  ;;  %v2713_v12 = vadd.f32 %v2682_v9, %v2603_v38  ;;  %v8118_v37 = vld [vmem:[%s10688_s3 + $0x5b4] sm:$0xf0]  ;;  %v8116_v38 = vld [vmem:[%s10688_s3 + $0x5ac] sm:$0xf] }
 0x258   :  { %v7152_v51 = vor.u32 %v8118_v37, %v7151_v36  ;;  %v7156_v52 = vor.u32 %v8116_v38, %v7153_v39  ;;  %v3706_v9 = vld [vmem:[#allocation2 + $0xa8] sm:$0xff]  ;;  %v7173_v36 = vld [vmem:[%s10688_s3 + $0x5d0] sm:$0xf0] }
 0x259   :  { %7025 = vmatmul.msk.bf16.vlgmr.msra.gmra.mxu0 %vm169_vm0, %v3487_v10  ;;  %7026 = vmatmul.msk.bf16.vlgmr.msra.gmra.mxu1 %vm169_vm0, %v3487_v10  ;;  %v3707_v22 = vpack.c.bf16 %v3706_v9, %v3706_v9  ;;  %v8127_v9 = vld [vmem:[%s10688_s3 + $0x604] sm:$0xf] }
 0x25a   :  { %7027 = vmatmul.msk.bf16.vlgmr.msra.gmra.mxu2 %vm169_vm0, %v3487_v10  ;;  %7028 = vmatmul.msk.bf16.vlgmr.msra.gmra.mxu3 %vm169_vm0, %v3487_v10  ;;  %v7195_v10 = vld [vmem:[%s10688_s3 + $0x5e8] sm:$0xf] }
 0x25b   :  { %3792 = vmatpush.bf16.msra.mxu2 %v7108_v13  ;;  %3805 = vmatpush.bf16.msra.mxu3 %v7112_v14  ;;  %v7197_v13 = vld [vmem:[%s10688_s3 + $0x5f8] sm:$0xf0]  ;;  %v7187_v14 = vld [vmem:[%s10688_s3 + $0x5e0] sm:$0xf] }
 0x25c   :  { %3766 = vmatpush.bf16.msra.mxu0 %v7100_v19  ;;  %3779 = vmatpush.bf16.msra.mxu1 %v7104_v20  ;;  %v7189_v19 = vld [vmem:[%s10688_s3 + $0x5f0] sm:$0xf0] }
 0x25d   :  { %v2695_v29 = vpop.f32.mrf.mxu2  ;;  %v2708_v30 = vpop.f32.mrf.mxu3 }
 0x25e   :  { %v2714_v31 = vadd.f32 %v2695_v29, %v2604_v56  ;;  %v2715_v32 = vadd.f32 %v2708_v30, %v2605_v57  ;;  %v2671_v33 = vpop.f32.mrf.mxu0  ;;  %v2684_v34 = vpop.f32.mrf.mxu1  ;;  %v7144_v56 = vor.u32 %v8117_v43, %v7143_v40  ;;  %v7148_v57 = vor.u32 %v8115_v44, %v7145_v45  ;;  %v8120_v29 = vld [vmem:[%s10688_s3 + $0x5cc] sm:$0xf]  ;;  %v7181_v30 = vld [vmem:[%s10688_s3 + $0x5d8] sm:$0xf0] }
 0x25f   :  { %3793 = vmatpush.bf16.msra.mxu2 %v7092_v61  ;;  %3806 = vmatpush.bf16.msra.mxu3 %v7096_v25  ;;  %v7171_v33 = vld [vmem:[%s10688_s3 + $0x5c0] sm:$0xf]  ;;  %v8121_v34 = vld [vmem:[%s10688_s3 + $0x5cc] sm:$0xf0]  ;;  %v7184_v38 = vor.u32 %v8120_v29, %v7181_v30  ;;  %v7176_v40 = vor.u32 %v8119_v35, %v7173_v36  ;;  %v8139_v30 = vld [vmem:[%s10688_s3 + $0x664] sm:$0xf] }
 0x260   :  { %3767 = vmatpush.bf16.msra.mxu0 %v7084_v26  ;;  %3780 = vmatpush.bf16.msra.mxu1 %v7088_v28  ;;  %v7179_v26 = vld [vmem:[%s10688_s3 + $0x5c8] sm:$0xf]  ;;  %v8122_v28 = vld [vmem:[%s10688_s3 + $0x5d4] sm:$0xf0]  ;;  %v7172_v39 = vor.u32 %v8121_v34, %v7171_v33  ;;  %v8141_v29 = vld [vmem:[%s10688_s3 + $0x66c] sm:$0xf0] }
 0x261   :  { %v7180_v37 = vor.u32 %v8122_v28, %v7179_v26 }
 0x265   :  { %v2697_v41 = vpop.f32.mrf.mxu2  ;;  %v2710_v42 = vpop.f32.mrf.mxu3 }
 0x266   :  { %v2779_v46 = vpop.f32.mrf.mxu0  ;;  %v2792_v47 = vpop.f32.mrf.mxu1 }
 0x267   :  { %v2822_v49 = vadd.f32 %v2779_v46, %v2712_v11  ;;  %v2823_v50 = vadd.f32 %v2792_v47, %v2713_v12  ;;  %v8126_v11 = vld [vmem:[%s10688_s3 + $0x5f4] sm:$0xf0]  ;;  %v8124_v12 = vld [vmem:[%s10688_s3 + $0x5ec] sm:$0xf]  ;;  %v3816_v47 = vld [vmem:[#allocation2 + $0xb0] sm:$0xff] }
 0x268   :  { %v7196_v61 = vor.u32 %v8126_v11, %v7195_v10  ;;  %v7200_v25 = vor.u32 %v8124_v12, %v7197_v13  ;;  %v3817_v59 = vpack.c.bf16 %v3816_v47, %v3816_v47  ;;  %v7217_v10 = vld [vmem:[%s10688_s3 + $0x610] sm:$0xf0]  ;;  %v8135_v47 = vld [vmem:[%s10688_s3 + $0x644] sm:$0xf] }
 0x269   :  { %7069 = vmatmul.msk.bf16.vlgmr.msrb.gmra.mxu0 %vm169_vm0, %v3597_v48  ;;  %7070 = vmatmul.msk.bf16.vlgmr.msrb.gmra.mxu1 %vm169_vm0, %v3597_v48 }
 0x26a   :  { %7071 = vmatmul.msk.bf16.vlgmr.msrb.gmra.mxu2 %vm169_vm0, %v3597_v48  ;;  %7072 = vmatmul.msk.bf16.vlgmr.msrb.gmra.mxu3 %vm169_vm0, %v3597_v48  ;;  %v7239_v48 = vld [vmem:[%s10688_s3 + $0x628] sm:$0xf] }
 0x26b   :  { %3902 = vmatpush.bf16.msrb.mxu2 %v7152_v51  ;;  %3915 = vmatpush.bf16.msrb.mxu3 %v7156_v52  ;;  %v7241_v51 = vld [vmem:[%s10688_s3 + $0x638] sm:$0xf0]  ;;  %v7231_v52 = vld [vmem:[%s10688_s3 + $0x620] sm:$0xf] }
 0x26c   :  { %3876 = vmatpush.bf16.msrb.mxu0 %v7144_v56  ;;  %3889 = vmatpush.bf16.msrb.mxu1 %v7148_v57  ;;  %v7233_v56 = vld [vmem:[%s10688_s3 + $0x630] sm:$0xf0] }
 0x26d   :  { %v2805_v3 = vpop.f32.mrf.mxu2  ;;  %v2818_v4 = vpop.f32.mrf.mxu3 }
 0x26e   :  { %v2824_v5 = vadd.f32 %v2805_v3, %v2714_v31  ;;  %v2825_v6 = vadd.f32 %v2818_v4, %v2715_v32  ;;  %v2781_v7 = vpop.f32.mrf.mxu0  ;;  %v2794_v8 = vpop.f32.mrf.mxu1  ;;  %v7188_v31 = vor.u32 %v8125_v17, %v7187_v14  ;;  %v7192_v32 = vor.u32 %v8123_v18, %v7189_v19  ;;  %v8128_v3 = vld [vmem:[%s10688_s3 + $0x60c] sm:$0xf]  ;;  %v7225_v4 = vld [vmem:[%s10688_s3 + $0x618] sm:$0xf0] }
 0x26f   :  { %3903 = vmatpush.bf16.msrb.mxu2 %v7136_v63  ;;  %3916 = vmatpush.bf16.msrb.mxu3 %v7140_v0  ;;  %v7215_v7 = vld [vmem:[%s10688_s3 + $0x600] sm:$0xf]  ;;  %v8129_v8 = vld [vmem:[%s10688_s3 + $0x60c] sm:$0xf0]  ;;  %v7228_v12 = vor.u32 %v8128_v3, %v7225_v4  ;;  %v7220_v14 = vor.u32 %v8127_v9, %v7217_v10  ;;  %v8147_v4 = vld [vmem:[%s10688_s3 + $0x6a4] sm:$0xf] }
 0x270   :  { %3877 = vmatpush.bf16.msrb.mxu0 %v7128_v1  ;;  %3890 = vmatpush.bf16.msrb.mxu1 %v7132_v2  ;;  %v7223_v1 = vld [vmem:[%s10688_s3 + $0x608] sm:$0xf]  ;;  %v8130_v2 = vld [vmem:[%s10688_s3 + $0x614] sm:$0xf0]  ;;  %v7216_v13 = vor.u32 %v8129_v8, %v7215_v7  ;;  %v8149_v3 = vld [vmem:[%s10688_s3 + $0x6ac] sm:$0xf0] }
 0x271   :  { %v7224_v11 = vor.u32 %v8130_v2, %v7223_v1 }
 0x275   :  { %v2807_v15 = vpop.f32.mrf.mxu2  ;;  %v2820_v16 = vpop.f32.mrf.mxu3 }
 0x276   :  { %v2889_v20 = vpop.f32.mrf.mxu0  ;;  %v2902_v21 = vpop.f32.mrf.mxu1 }
 0x277   :  { %v2932_v23 = vadd.f32 %v2889_v20, %v2822_v49  ;;  %v2933_v24 = vadd.f32 %v2902_v21, %v2823_v50  ;;  %v8134_v49 = vld [vmem:[%s10688_s3 + $0x634] sm:$0xf0]  ;;  %v8132_v50 = vld [vmem:[%s10688_s3 + $0x62c] sm:$0xf] }
 0x278   :  { %v7240_v63 = vor.u32 %v8134_v49, %v7239_v48  ;;  %v7244_v0 = vor.u32 %v8132_v50, %v7241_v51  ;;  %v3926_v21 = vld [vmem:[#allocation2 + $0xb8] sm:$0xff]  ;;  %v7261_v48 = vld [vmem:[%s10688_s3 + $0x650] sm:$0xf0] }
 0x279   :  { %7113 = vmatmul.msk.bf16.vlgmr.msra.gmra.mxu0 %vm169_vm0, %v3707_v22  ;;  %7114 = vmatmul.msk.bf16.vlgmr.msra.gmra.mxu1 %vm169_vm0, %v3707_v22  ;;  %v3927_v34 = vpack.c.bf16 %v3926_v21, %v3926_v21  ;;  %v8143_v21 = vld [vmem:[%s10688_s3 + $0x684] sm:$0xf] }
 0x27a   :  { %7115 = vmatmul.msk.bf16.vlgmr.msra.gmra.mxu2 %vm169_vm0, %v3707_v22  ;;  %7116 = vmatmul.msk.bf16.vlgmr.msra.gmra.mxu3 %vm169_vm0, %v3707_v22  ;;  %v7283_v22 = vld [vmem:[%s10688_s3 + $0x668] sm:$0xf] }
 0x27b   :  { %4012 = vmatpush.bf16.msra.mxu2 %v7196_v61  ;;  %4025 = vmatpush.bf16.msra.mxu3 %v7200_v25  ;;  %v7285_v61 = vld [vmem:[%s10688_s3 + $0x678] sm:$0xf0]  ;;  %v7275_v25 = vld [vmem:[%s10688_s3 + $0x660] sm:$0xf] }
 0x27c   :  { %3986 = vmatpush.bf16.msra.mxu0 %v7188_v31  ;;  %3999 = vmatpush.bf16.msra.mxu1 %v7192_v32  ;;  %v7277_v31 = vld [vmem:[%s10688_s3 + $0x670] sm:$0xf0] }
 0x27d   :  { %v2915_v41 = vpop.f32.mrf.mxu2  ;;  %v2928_v42 = vpop.f32.mrf.mxu3 }
 0x27e   :  { %v2934_v43 = vadd.f32 %v2915_v41, %v2824_v5  ;;  %v2935_v44 = vadd.f32 %v2928_v42, %v2825_v6  ;;  %v2891_v45 = vpop.f32.mrf.mxu0  ;;  %v2904_v46 = vpop.f32.mrf.mxu1  ;;  %v7232_v5 = vor.u32 %v8133_v54, %v7231_v52  ;;  %v7236_v6 = vor.u32 %v8131_v55, %v7233_v56  ;;  %v8136_v41 = vld [vmem:[%s10688_s3 + $0x64c] sm:$0xf]  ;;  %v7269_v42 = vld [vmem:[%s10688_s3 + $0x658] sm:$0xf0] }
 0x27f   :  { %4013 = vmatpush.bf16.msra.mxu2 %v7180_v37  ;;  %4026 = vmatpush.bf16.msra.mxu3 %v7184_v38  ;;  %v7259_v45 = vld [vmem:[%s10688_s3 + $0x640] sm:$0xf]  ;;  %v8137_v46 = vld [vmem:[%s10688_s3 + $0x64c] sm:$0xf0]  ;;  %v7272_v50 = vor.u32 %v8136_v41, %v7269_v42  ;;  %v7264_v52 = vor.u32 %v8135_v47, %v7261_v48  ;;  %v8155_v42 = vld [vmem:[%s10688_s3 + $0x6e4] sm:$0xf] }
 0x280   :  { %3987 = vmatpush.bf16.msra.mxu0 %v7172_v39  ;;  %4000 = vmatpush.bf16.msra.mxu1 %v7176_v40  ;;  %v7267_v39 = vld [vmem:[%s10688_s3 + $0x648] sm:$0xf]  ;;  %v8138_v40 = vld [vmem:[%s10688_s3 + $0x654] sm:$0xf0]  ;;  %v7260_v51 = vor.u32 %v8137_v46, %v7259_v45  ;;  %v8157_v41 = vld [vmem:[%s10688_s3 + $0x6ec] sm:$0xf0] }
 0x281   :  { %v7268_v49 = vor.u32 %v8138_v40, %v7267_v39 }
 0x285   :  { %v2917_v53 = vpop.f32.mrf.mxu2  ;;  %v2930_v27 = vpop.f32.mrf.mxu3 }
 0x286   :  { %v2999_v57 = vpop.f32.mrf.mxu0  ;;  %v3012_v58 = vpop.f32.mrf.mxu1 }
 0x287   :  { %v3042_v60 = vadd.f32 %v2999_v57, %v2932_v23  ;;  %v3043_v62 = vadd.f32 %v3012_v58, %v2933_v24  ;;  %v8142_v23 = vld [vmem:[%s10688_s3 + $0x674] sm:$0xf0]  ;;  %v8140_v24 = vld [vmem:[%s10688_s3 + $0x66c] sm:$0xf]  ;;  %v4036_v58 = vld [vmem:[#allocation2 + $0xc0] sm:$0xff] }
 0x288   :  { %v7284_v37 = vor.u32 %v8142_v23, %v7283_v22  ;;  %v7288_v38 = vor.u32 %v8140_v24, %v7285_v61  ;;  %v4037_v8 = vpack.c.bf16 %v4036_v58, %v4036_v58  ;;  %v7305_v22 = vld [vmem:[%s10688_s3 + $0x690] sm:$0xf0]  ;;  %v8151_v58 = vld [vmem:[%s10688_s3 + $0x6c4] sm:$0xf] }
 0x289   :  { %7157 = vmatmul.msk.bf16.vlgmr.msrb.gmra.mxu0 %vm169_vm0, %v3817_v59  ;;  %7158 = vmatmul.msk.bf16.vlgmr.msrb.gmra.mxu1 %vm169_vm0, %v3817_v59 }
 0x28a   :  { %7159 = vmatmul.msk.bf16.vlgmr.msrb.gmra.mxu2 %vm169_vm0, %v3817_v59  ;;  %7160 = vmatmul.msk.bf16.vlgmr.msrb.gmra.mxu3 %vm169_vm0, %v3817_v59  ;;  %v7327_v59 = vld [vmem:[%s10688_s3 + $0x6a8] sm:$0xf] }
 0x28b   :  { %4122 = vmatpush.bf16.msrb.mxu2 %v7240_v63  ;;  %4135 = vmatpush.bf16.msrb.mxu3 %v7244_v0  ;;  %v7329_v63 = vld [vmem:[%s10688_s3 + $0x6b8] sm:$0xf0]  ;;  %v7319_v0 = vld [vmem:[%s10688_s3 + $0x6a0] sm:$0xf] }
 0x28c   :  { %4096 = vmatpush.bf16.msrb.mxu0 %v7232_v5  ;;  %4109 = vmatpush.bf16.msrb.mxu1 %v7236_v6  ;;  %v7321_v5 = vld [vmem:[%s10688_s3 + $0x6b0] sm:$0xf0] }
 0x28d   :  { %v3025_v15 = vpop.f32.mrf.mxu2  ;;  %v3038_v16 = vpop.f32.mrf.mxu3 }
 0x28e   :  { %v3044_v17 = vadd.f32 %v3025_v15, %v2934_v43  ;;  %v3045_v18 = vadd.f32 %v3038_v16, %v2935_v44  ;;  %v3001_v19 = vpop.f32.mrf.mxu0  ;;  %v3014_v20 = vpop.f32.mrf.mxu1  ;;  %v7276_v43 = vor.u32 %v8141_v29, %v7275_v25  ;;  %v7280_v44 = vor.u32 %v8139_v30, %v7277_v31  ;;  %v8144_v15 = vld [vmem:[%s10688_s3 + $0x68c] sm:$0xf]  ;;  %v7313_v16 = vld [vmem:[%s10688_s3 + $0x698] sm:$0xf0] }
 0x28f   :  { %4123 = vmatpush.bf16.msrb.mxu2 %v7224_v11  ;;  %4136 = vmatpush.bf16.msrb.mxu3 %v7228_v12  ;;  %v7303_v19 = vld [vmem:[%s10688_s3 + $0x680] sm:$0xf]  ;;  %v8145_v20 = vld [vmem:[%s10688_s3 + $0x68c] sm:$0xf0]  ;;  %v7316_v24 = vor.u32 %v8144_v15, %v7313_v16  ;;  %v7308_v25 = vor.u32 %v8143_v21, %v7305_v22  ;;  %v8163_v16 = vld [vmem:[%s10688_s3 + $0x724] sm:$0xf] }
 0x290   :  { %4097 = vmatpush.bf16.msrb.mxu0 %v7216_v13  ;;  %4110 = vmatpush.bf16.msrb.mxu1 %v7220_v14  ;;  %v7311_v13 = vld [vmem:[%s10688_s3 + $0x688] sm:$0xf]  ;;  %v8146_v14 = vld [vmem:[%s10688_s3 + $0x694] sm:$0xf0]  ;;  %v7304_v61 = vor.u32 %v8145_v20, %v7303_v19  ;;  %v8165_v15 = vld [vmem:[%s10688_s3 + $0x72c] sm:$0xf0] }
 0x291   :  { %v7312_v23 = vor.u32 %v8146_v14, %v7311_v13 }
 0x295   :  { %v3027_v26 = vpop.f32.mrf.mxu2  ;;  %v3040_v28 = vpop.f32.mrf.mxu3 }
 0x296   :  { %v3109_v32 = vpop.f32.mrf.mxu0  ;;  %v3122_v33 = vpop.f32.mrf.mxu1 }
 0x297   :  { %v3152_v35 = vadd.f32 %v3109_v32, %v3042_v60  ;;  %v3153_v36 = vadd.f32 %v3122_v33, %v3043_v62  ;;  %v8150_v60 = vld [vmem:[%s10688_s3 + $0x6b4] sm:$0xf0]  ;;  %v8148_v62 = vld [vmem:[%s10688_s3 + $0x6ac] sm:$0xf] }
 0x298   :  { %v7328_v11 = vor.u32 %v8150_v60, %v7327_v59  ;;  %v7332_v12 = vor.u32 %v8148_v62, %v7329_v63  ;;  %v4146_v33 = vld [vmem:[#allocation2 + $0xc8] sm:$0xff]  ;;  %v7349_v59 = vld [vmem:[%s10688_s3 + $0x6d0] sm:$0xf0] }
 0x299   :  { %7201 = vmatmul.msk.bf16.vlgmr.msra.gmra.mxu0 %vm169_vm0, %v3927_v34  ;;  %7202 = vmatmul.msk.bf16.vlgmr.msra.gmra.mxu1 %vm169_vm0, %v3927_v34  ;;  %v4147_v46 = vpack.c.bf16 %v4146_v33, %v4146_v33  ;;  %v8159_v33 = vld [vmem:[%s10688_s3 + $0x704] sm:$0xf] }
 0x29a   :  { %7203 = vmatmul.msk.bf16.vlgmr.msra.gmra.mxu2 %vm169_vm0, %v3927_v34  ;;  %7204 = vmatmul.msk.bf16.vlgmr.msra.gmra.mxu3 %vm169_vm0, %v3927_v34  ;;  %v7371_v34 = vld [vmem:[%s10688_s3 + $0x6e8] sm:$0xf] }
 0x29b   :  { %4232 = vmatpush.bf16.msra.mxu2 %v7284_v37  ;;  %4245 = vmatpush.bf16.msra.mxu3 %v7288_v38  ;;  %v7373_v37 = vld [vmem:[%s10688_s3 + $0x6f8] sm:$0xf0]  ;;  %v7363_v38 = vld [vmem:[%s10688_s3 + $0x6e0] sm:$0xf] }
 0x29c   :  { %4206 = vmatpush.bf16.msra.mxu0 %v7276_v43  ;;  %4219 = vmatpush.bf16.msra.mxu1 %v7280_v44  ;;  %v7365_v43 = vld [vmem:[%s10688_s3 + $0x6f0] sm:$0xf0] }
 0x29d   :  { %v3135_v53 = vpop.f32.mrf.mxu2  ;;  %v3148_v27 = vpop.f32.mrf.mxu3 }
 0x29e   :  { %v3154_v54 = vadd.f32 %v3135_v53, %v3044_v17  ;;  %v3155_v55 = vadd.f32 %v3148_v27, %v3045_v18  ;;  %v3111_v56 = vpop.f32.mrf.mxu0  ;;  %v3124_v57 = vpop.f32.mrf.mxu1  ;;  %v7320_v17 = vor.u32 %v8149_v3, %v7319_v0  ;;  %v7324_v18 = vor.u32 %v8147_v4, %v7321_v5  ;;  %v8152_v53 = vld [vmem:[%s10688_s3 + $0x6cc] sm:$0xf]  ;;  %v7357_v27 = vld [vmem:[%s10688_s3 + $0x6d8] sm:$0xf0] }
 0x29f   :  { %4233 = vmatpush.bf16.msra.mxu2 %v7268_v49  ;;  %4246 = vmatpush.bf16.msra.mxu3 %v7272_v50  ;;  %v7347_v56 = vld [vmem:[%s10688_s3 + $0x6c0] sm:$0xf]  ;;  %v8153_v57 = vld [vmem:[%s10688_s3 + $0x6cc] sm:$0xf0]  ;;  %v7360_v62 = vor.u32 %v8152_v53, %v7357_v27  ;;  %v7352_v0 = vor.u32 %v8151_v58, %v7349_v59  ;;  %v8171_v27 = vld [vmem:[%s10688_s3 + $0x764] sm:$0xf] }
 0x2a0   :  { %4207 = vmatpush.bf16.msra.mxu0 %v7260_v51  ;;  %4220 = vmatpush.bf16.msra.mxu1 %v7264_v52  ;;  %v7355_v51 = vld [vmem:[%s10688_s3 + $0x6c8] sm:$0xf]  ;;  %v8154_v52 = vld [vmem:[%s10688_s3 + $0x6d4] sm:$0xf0]  ;;  %v7348_v63 = vor.u32 %v8153_v57, %v7347_v56  ;;  %v8173_v53 = vld [vmem:[%s10688_s3 + $0x76c] sm:$0xf0] }
 0x2a1   :  { %v7356_v60 = vor.u32 %v8154_v52, %v7355_v51 }
 0x2a5   :  { %v3137_v1 = vpop.f32.mrf.mxu2  ;;  %v3150_v2 = vpop.f32.mrf.mxu3 }
 0x2a6   :  { %v3219_v6 = vpop.f32.mrf.mxu0  ;;  %v3232_v7 = vpop.f32.mrf.mxu1 }
 0x2a7   :  { %v3262_v9 = vadd.f32 %v3219_v6, %v3152_v35  ;;  %v3263_v10 = vadd.f32 %v3232_v7, %v3153_v36  ;;  %v8158_v35 = vld [vmem:[%s10688_s3 + $0x6f4] sm:$0xf0]  ;;  %v8156_v36 = vld [vmem:[%s10688_s3 + $0x6ec] sm:$0xf]  ;;  %v4256_v7 = vld [vmem:[#allocation2 + $0xd0] sm:$0xff] }
 0x2a8   :  { %v7372_v49 = vor.u32 %v8158_v35, %v7371_v34  ;;  %v7376_v50 = vor.u32 %v8156_v36, %v7373_v37  ;;  %v4257_v20 = vpack.c.bf16 %v4256_v7, %v4256_v7  ;;  %v7393_v34 = vld [vmem:[%s10688_s3 + $0x710] sm:$0xf0]  ;;  %v8167_v7 = vld [vmem:[%s10688_s3 + $0x744] sm:$0xf] }
 0x2a9   :  { %7245 = vmatmul.msk.bf16.vlgmr.msrb.gmra.mxu0 %vm169_vm0, %v4037_v8  ;;  %7246 = vmatmul.msk.bf16.vlgmr.msrb.gmra.mxu1 %vm169_vm0, %v4037_v8 }
 0x2aa   :  { %7247 = vmatmul.msk.bf16.vlgmr.msrb.gmra.mxu2 %vm169_vm0, %v4037_v8  ;;  %7248 = vmatmul.msk.bf16.vlgmr.msrb.gmra.mxu3 %vm169_vm0, %v4037_v8  ;;  %v7415_v8 = vld [vmem:[%s10688_s3 + $0x728] sm:$0xf] }
 0x2ab   :  { %4342 = vmatpush.bf16.msrb.mxu2 %v7328_v11  ;;  %4355 = vmatpush.bf16.msrb.mxu3 %v7332_v12  ;;  %v7417_v11 = vld [vmem:[%s10688_s3 + $0x738] sm:$0xf0]  ;;  %v7407_v12 = vld [vmem:[%s10688_s3 + $0x720] sm:$0xf] }
 0x2ac   :  { %4316 = vmatpush.bf16.msrb.mxu0 %v7320_v17  ;;  %4329 = vmatpush.bf16.msrb.mxu1 %v7324_v18  ;;  %v7409_v17 = vld [vmem:[%s10688_s3 + $0x730] sm:$0xf0] }
 0x2ad   :  { %v3245_v26 = vpop.f32.mrf.mxu2  ;;  %v3258_v28 = vpop.f32.mrf.mxu3 }
 0x2ae   :  { %v3264_v29 = vadd.f32 %v3245_v26, %v3154_v54  ;;  %v3265_v30 = vadd.f32 %v3258_v28, %v3155_v55  ;;  %v3221_v31 = vpop.f32.mrf.mxu0  ;;  %v3234_v32 = vpop.f32.mrf.mxu1  ;;  %v7364_v54 = vor.u32 %v8157_v41, %v7363_v38  ;;  %v7368_v55 = vor.u32 %v8155_v42, %v7365_v43  ;;  %v8160_v26 = vld [vmem:[%s10688_s3 + $0x70c] sm:$0xf]  ;;  %v7401_v28 = vld [vmem:[%s10688_s3 + $0x718] sm:$0xf0] }
 0x2af   :  { %4343 = vmatpush.bf16.msrb.mxu2 %v7312_v23  ;;  %4356 = vmatpush.bf16.msrb.mxu3 %v7316_v24  ;;  %v7391_v31 = vld [vmem:[%s10688_s3 + $0x700] sm:$0xf]  ;;  %v8161_v32 = vld [vmem:[%s10688_s3 + $0x70c] sm:$0xf0]  ;;  %v7404_v36 = vor.u32 %v8160_v26, %v7401_v28  ;;  %v7396_v38 = vor.u32 %v8159_v33, %v7393_v34  ;;  %v8179_v28 = vld [vmem:[%s10688_s3 + $0x7a4] sm:$0xf] }
 0x2b0   :  { %4317 = vmatpush.bf16.msrb.mxu0 %v7304_v61  ;;  %4330 = vmatpush.bf16.msrb.mxu1 %v7308_v25  ;;  %v7399_v61 = vld [vmem:[%s10688_s3 + $0x708] sm:$0xf]  ;;  %v8162_v25 = vld [vmem:[%s10688_s3 + $0x714] sm:$0xf0]  ;;  %v7392_v37 = vor.u32 %v8161_v32, %v7391_v31  ;;  %v8181_v26 = vld [vmem:[%s10688_s3 + $0x7ac] sm:$0xf0] }
 0x2b1   :  { %v7400_v35 = vor.u32 %v8162_v25, %v7399_v61 }
 0x2b5   :  { %v3247_v39 = vpop.f32.mrf.mxu2  ;;  %v3260_v40 = vpop.f32.mrf.mxu3 }
 0x2b6   :  { %v3329_v44 = vpop.f32.mrf.mxu0  ;;  %v3342_v45 = vpop.f32.mrf.mxu1 }
 0x2b7   :  { %v3372_v47 = vadd.f32 %v3329_v44, %v3262_v9  ;;  %v3373_v48 = vadd.f32 %v3342_v45, %v3263_v10  ;;  %v8166_v9 = vld [vmem:[%s10688_s3 + $0x734] sm:$0xf0]  ;;  %v8164_v10 = vld [vmem:[%s10688_s3 + $0x72c] sm:$0xf] }
 0x2b8   :  { %v7416_v23 = vor.u32 %v8166_v9, %v7415_v8  ;;  %v7420_v24 = vor.u32 %v8164_v10, %v7417_v11  ;;  %v4366_v45 = vld [vmem:[#allocation2 + $0xd8] sm:$0xff]  ;;  %v7437_v8 = vld [vmem:[%s10688_s3 + $0x750] sm:$0xf0] }
 0x2b9   :  { %7289 = vmatmul.msk.bf16.vlgmr.msra.gmra.mxu0 %vm169_vm0, %v4147_v46  ;;  %7290 = vmatmul.msk.bf16.vlgmr.msra.gmra.mxu1 %vm169_vm0, %v4147_v46  ;;  %v4367_v57 = vpack.c.bf16 %v4366_v45, %v4366_v45  ;;  %v8175_v45 = vld [vmem:[%s10688_s3 + $0x784] sm:$0xf] }
 0x2ba   :  { %7291 = vmatmul.msk.bf16.vlgmr.msra.gmra.mxu2 %vm169_vm0, %v4147_v46  ;;  %7292 = vmatmul.msk.bf16.vlgmr.msra.gmra.mxu3 %vm169_vm0, %v4147_v46  ;;  %v7459_v46 = vld [vmem:[%s10688_s3 + $0x768] sm:$0xf] }
 0x2bb   :  { %4452 = vmatpush.bf16.msra.mxu2 %v7372_v49  ;;  %4465 = vmatpush.bf16.msra.mxu3 %v7376_v50  ;;  %v7461_v49 = vld [vmem:[%s10688_s3 + $0x778] sm:$0xf0]  ;;  %v7451_v50 = vld [vmem:[%s10688_s3 + $0x760] sm:$0xf] }
 0x2bc   :  { %4426 = vmatpush.bf16.msra.mxu0 %v7364_v54  ;;  %4439 = vmatpush.bf16.msra.mxu1 %v7368_v55  ;;  %v7453_v54 = vld [vmem:[%s10688_s3 + $0x770] sm:$0xf0] }
 0x2bd   :  { %v3355_v1 = vpop.f32.mrf.mxu2  ;;  %v3368_v2 = vpop.f32.mrf.mxu3 }
 0x2be   :  { %v3374_v3 = vadd.f32 %v3355_v1, %v3264_v29  ;;  %v3375_v4 = vadd.f32 %v3368_v2, %v3265_v30  ;;  %v3331_v5 = vpop.f32.mrf.mxu0  ;;  %v3344_v6 = vpop.f32.mrf.mxu1  ;;  %v7408_v29 = vor.u32 %v8165_v15, %v7407_v12  ;;  %v7412_v30 = vor.u32 %v8163_v16, %v7409_v17  ;;  %v8168_v1 = vld [vmem:[%s10688_s3 + $0x74c] sm:$0xf]  ;;  %v7445_v2 = vld [vmem:[%s10688_s3 + $0x758] sm:$0xf0] }
 0x2bf   :  { %4453 = vmatpush.bf16.msra.mxu2 %v7356_v60  ;;  %4466 = vmatpush.bf16.msra.mxu3 %v7360_v62  ;;  %v7435_v5 = vld [vmem:[%s10688_s3 + $0x740] sm:$0xf]  ;;  %v8169_v6 = vld [vmem:[%s10688_s3 + $0x74c] sm:$0xf0]  ;;  %v7448_v10 = vor.u32 %v8168_v1, %v7445_v2  ;;  %v7440_v12 = vor.u32 %v8167_v7, %v7437_v8  ;;  %v8187_v2 = vld [vmem:[%s10688_s3 + $0x7e4] sm:$0xf] }
 0x2c0   :  { %4427 = vmatpush.bf16.msra.mxu0 %v7348_v63  ;;  %4440 = vmatpush.bf16.msra.mxu1 %v7352_v0  ;;  %v7443_v63 = vld [vmem:[%s10688_s3 + $0x748] sm:$0xf]  ;;  %v8170_v0 = vld [vmem:[%s10688_s3 + $0x754] sm:$0xf0]  ;;  %v7436_v11 = vor.u32 %v8169_v6, %v7435_v5  ;;  %v8189_v1 = vld [vmem:[%s10688_s3 + $0x7ec] sm:$0xf0] }
 0x2c1   :  { %v7444_v9 = vor.u32 %v8170_v0, %v7443_v63 }
 0x2c5   :  { %v3357_v13 = vpop.f32.mrf.mxu2  ;;  %v3370_v14 = vpop.f32.mrf.mxu3 }
 0x2c6   :  { %v3439_v18 = vpop.f32.mrf.mxu0  ;;  %v3452_v19 = vpop.f32.mrf.mxu1 }
 0x2c7   :  { %v3482_v21 = vadd.f32 %v3439_v18, %v3372_v47  ;;  %v3483_v22 = vadd.f32 %v3452_v19, %v3373_v48  ;;  %v8174_v47 = vld [vmem:[%s10688_s3 + $0x774] sm:$0xf0]  ;;  %v8172_v48 = vld [vmem:[%s10688_s3 + $0x76c] sm:$0xf]  ;;  %v4476_v19 = vld [vmem:[#allocation2 + $0xe0] sm:$0xff] }
 0x2c8   :  { %v7460_v60 = vor.u32 %v8174_v47, %v7459_v46  ;;  %v7464_v62 = vor.u32 %v8172_v48, %v7461_v49  ;;  %v4477_v32 = vpack.c.bf16 %v4476_v19, %v4476_v19  ;;  %v7481_v46 = vld [vmem:[%s10688_s3 + $0x790] sm:$0xf0]  ;;  %v8183_v19 = vld [vmem:[%s10688_s3 + $0x7c4] sm:$0xf] }
 0x2c9   :  { %7333 = vmatmul.msk.bf16.vlgmr.msrb.gmra.mxu0 %vm169_vm0, %v4257_v20  ;;  %7334 = vmatmul.msk.bf16.vlgmr.msrb.gmra.mxu1 %vm169_vm0, %v4257_v20 }
 0x2ca   :  { %7335 = vmatmul.msk.bf16.vlgmr.msrb.gmra.mxu2 %vm169_vm0, %v4257_v20  ;;  %7336 = vmatmul.msk.bf16.vlgmr.msrb.gmra.mxu3 %vm169_vm0, %v4257_v20  ;;  %v7503_v20 = vld [vmem:[%s10688_s3 + $0x7a8] sm:$0xf] }
 0x2cb   :  { %4562 = vmatpush.bf16.msrb.mxu2 %v7416_v23  ;;  %4575 = vmatpush.bf16.msrb.mxu3 %v7420_v24  ;;  %v7505_v23 = vld [vmem:[%s10688_s3 + $0x7b8] sm:$0xf0]  ;;  %v7495_v24 = vld [vmem:[%s10688_s3 + $0x7a0] sm:$0xf] }
 0x2cc   :  { %4536 = vmatpush.bf16.msrb.mxu0 %v7408_v29  ;;  %4549 = vmatpush.bf16.msrb.mxu1 %v7412_v30  ;;  %v7497_v29 = vld [vmem:[%s10688_s3 + $0x7b0] sm:$0xf0] }
 0x2cd   :  { %v3465_v39 = vpop.f32.mrf.mxu2  ;;  %v3478_v40 = vpop.f32.mrf.mxu3 }
 0x2ce   :  { %v3484_v41 = vadd.f32 %v3465_v39, %v3374_v3  ;;  %v3485_v42 = vadd.f32 %v3478_v40, %v3375_v4  ;;  %v3441_v43 = vpop.f32.mrf.mxu0  ;;  %v3454_v44 = vpop.f32.mrf.mxu1  ;;  %v7452_v3 = vor.u32 %v8173_v53, %v7451_v50  ;;  %v7456_v4 = vor.u32 %v8171_v27, %v7453_v54  ;;  %v8176_v39 = vld [vmem:[%s10688_s3 + $0x78c] sm:$0xf]  ;;  %v7489_v40 = vld [vmem:[%s10688_s3 + $0x798] sm:$0xf0] }
 0x2cf   :  { %4563 = vmatpush.bf16.msrb.mxu2 %v7400_v35  ;;  %4576 = vmatpush.bf16.msrb.mxu3 %v7404_v36  ;;  %v7479_v43 = vld [vmem:[%s10688_s3 + $0x780] sm:$0xf]  ;;  %v8177_v44 = vld [vmem:[%s10688_s3 + $0x78c] sm:$0xf0]  ;;  %v7492_v48 = vor.u32 %v8176_v39, %v7489_v40  ;;  %v7484_v50 = vor.u32 %v8175_v45, %v7481_v46  ;;  %v8195_v40 = vld [vmem:[%s10688_s3 + $0x824] sm:$0xf] }
 0x2d0   :  { %4537 = vmatpush.bf16.msrb.mxu0 %v7392_v37  ;;  %4550 = vmatpush.bf16.msrb.mxu1 %v7396_v38  ;;  %v7487_v37 = vld [vmem:[%s10688_s3 + $0x788] sm:$0xf]  ;;  %v8178_v38 = vld [vmem:[%s10688_s3 + $0x794] sm:$0xf0]  ;;  %v7480_v49 = vor.u32 %v8177_v44, %v7479_v43  ;;  %v8197_v39 = vld [vmem:[%s10688_s3 + $0x82c] sm:$0xf0] }
 0x2d1   :  { %v7488_v47 = vor.u32 %v8178_v38, %v7487_v37 }
 0x2d5   :  { %v3467_v51 = vpop.f32.mrf.mxu2  ;;  %v3480_v52 = vpop.f32.mrf.mxu3 }
 0x2d6   :  { %v3549_v55 = vpop.f32.mrf.mxu0  ;;  %v3562_v56 = vpop.f32.mrf.mxu1 }
 0x2d7   :  { %v3592_v58 = vadd.f32 %v3549_v55, %v3482_v21  ;;  %v3593_v59 = vadd.f32 %v3562_v56, %v3483_v22  ;;  %v8182_v21 = vld [vmem:[%s10688_s3 + $0x7b4] sm:$0xf0]  ;;  %v8180_v22 = vld [vmem:[%s10688_s3 + $0x7ac] sm:$0xf] }
 0x2d8   :  { %v7504_v35 = vor.u32 %v8182_v21, %v7503_v20  ;;  %v7508_v36 = vor.u32 %v8180_v22, %v7505_v23  ;;  %v4586_v56 = vld [vmem:[#allocation2 + $0xe8] sm:$0xff]  ;;  %v7525_v20 = vld [vmem:[%s10688_s3 + $0x7d0] sm:$0xf0] }
 0x2d9   :  { %7377 = vmatmul.msk.bf16.vlgmr.msra.gmra.mxu0 %vm169_vm0, %v4367_v57  ;;  %7378 = vmatmul.msk.bf16.vlgmr.msra.gmra.mxu1 %vm169_vm0, %v4367_v57  ;;  %v4587_v6 = vpack.c.bf16 %v4586_v56, %v4586_v56  ;;  %v8191_v56 = vld [vmem:[%s10688_s3 + $0x804] sm:$0xf] }
 0x2da   :  { %7379 = vmatmul.msk.bf16.vlgmr.msra.gmra.mxu2 %vm169_vm0, %v4367_v57  ;;  %7380 = vmatmul.msk.bf16.vlgmr.msra.gmra.mxu3 %vm169_vm0, %v4367_v57  ;;  %v7547_v57 = vld [vmem:[%s10688_s3 + $0x7e8] sm:$0xf] }
 0x2db   :  { %4672 = vmatpush.bf16.msra.mxu2 %v7460_v60  ;;  %4685 = vmatpush.bf16.msra.mxu3 %v7464_v62  ;;  %v7549_v60 = vld [vmem:[%s10688_s3 + $0x7f8] sm:$0xf0]  ;;  %v7539_v62 = vld [vmem:[%s10688_s3 + $0x7e0] sm:$0xf] }
 0x2dc   :  { %4646 = vmatpush.bf16.msra.mxu0 %v7452_v3  ;;  %4659 = vmatpush.bf16.msra.mxu1 %v7456_v4  ;;  %v7541_v3 = vld [vmem:[%s10688_s3 + $0x7f0] sm:$0xf0] }
 0x2dd   :  { %v3575_v13 = vpop.f32.mrf.mxu2  ;;  %v3588_v14 = vpop.f32.mrf.mxu3 }
 0x2de   :  { %v3594_v15 = vadd.f32 %v3575_v13, %v3484_v41  ;;  %v3595_v16 = vadd.f32 %v3588_v14, %v3485_v42  ;;  %v3551_v17 = vpop.f32.mrf.mxu0  ;;  %v3564_v18 = vpop.f32.mrf.mxu1  ;;  %v7496_v41 = vor.u32 %v8181_v26, %v7495_v24  ;;  %v7500_v42 = vor.u32 %v8179_v28, %v7497_v29  ;;  %v8184_v13 = vld [vmem:[%s10688_s3 + $0x7cc] sm:$0xf]  ;;  %v7533_v14 = vld [vmem:[%s10688_s3 + $0x7d8] sm:$0xf0] }
 0x2df   :  { %4673 = vmatpush.bf16.msra.mxu2 %v7444_v9  ;;  %4686 = vmatpush.bf16.msra.mxu3 %v7448_v10  ;;  %v7523_v17 = vld [vmem:[%s10688_s3 + $0x7c0] sm:$0xf]  ;;  %v8185_v18 = vld [vmem:[%s10688_s3 + $0x7cc] sm:$0xf0]  ;;  %v7536_v22 = vor.u32 %v8184_v13, %v7533_v14  ;;  %v7528_v24 = vor.u32 %v8183_v19, %v7525_v20  ;;  %v8203_v14 = vld [vmem:[%s10688_s3 + $0x864] sm:$0xf] }
 0x2e0   :  { %4647 = vmatpush.bf16.msra.mxu0 %v7436_v11  ;;  %4660 = vmatpush.bf16.msra.mxu1 %v7440_v12  ;;  %v7531_v11 = vld [vmem:[%s10688_s3 + $0x7c8] sm:$0xf]  ;;  %v8186_v12 = vld [vmem:[%s10688_s3 + $0x7d4] sm:$0xf0]  ;;  %v7524_v23 = vor.u32 %v8185_v18, %v7523_v17  ;;  %v8205_v13 = vld [vmem:[%s10688_s3 + $0x86c] sm:$0xf0] }
 0x2e1   :  { %v7532_v21 = vor.u32 %v8186_v12, %v7531_v11 }
 0x2e5   :  { %v3577_v61 = vpop.f32.mrf.mxu2  ;;  %v3590_v25 = vpop.f32.mrf.mxu3 }
 0x2e6   :  { %v3659_v30 = vpop.f32.mrf.mxu0  ;;  %v3672_v31 = vpop.f32.mrf.mxu1 }
 0x2e7   :  { %v3702_v33 = vadd.f32 %v3659_v30, %v3592_v58  ;;  %v3703_v34 = vadd.f32 %v3672_v31, %v3593_v59  ;;  %v8190_v58 = vld [vmem:[%s10688_s3 + $0x7f4] sm:$0xf0]  ;;  %v8188_v59 = vld [vmem:[%s10688_s3 + $0x7ec] sm:$0xf]  ;;  %v4696_v31 = vld [vmem:[#allocation2 + $0xf0] sm:$0xff] }
 0x2e8   :  { %v7548_v9 = vor.u32 %v8190_v58, %v7547_v57  ;;  %v7552_v10 = vor.u32 %v8188_v59, %v7549_v60  ;;  %v4697_v44 = vpack.c.bf16 %v4696_v31, %v4696_v31  ;;  %v7569_v57 = vld [vmem:[%s10688_s3 + $0x810] sm:$0xf0]  ;;  %v8199_v31 = vld [vmem:[%s10688_s3 + $0x844] sm:$0xf] }
 0x2e9   :  { %7421 = vmatmul.msk.bf16.vlgmr.msrb.gmra.mxu0 %vm169_vm0, %v4477_v32  ;;  %7422 = vmatmul.msk.bf16.vlgmr.msrb.gmra.mxu1 %vm169_vm0, %v4477_v32 }
 0x2ea   :  { %7423 = vmatmul.msk.bf16.vlgmr.msrb.gmra.mxu2 %vm169_vm0, %v4477_v32  ;;  %7424 = vmatmul.msk.bf16.vlgmr.msrb.gmra.mxu3 %vm169_vm0, %v4477_v32  ;;  %v7591_v32 = vld [vmem:[%s10688_s3 + $0x828] sm:$0xf] }
 0x2eb   :  { %4782 = vmatpush.bf16.msrb.mxu2 %v7504_v35  ;;  %4795 = vmatpush.bf16.msrb.mxu3 %v7508_v36  ;;  %v7593_v35 = vld [vmem:[%s10688_s3 + $0x838] sm:$0xf0]  ;;  %v7583_v36 = vld [vmem:[%s10688_s3 + $0x820] sm:$0xf] }
 0x2ec   :  { %4756 = vmatpush.bf16.msrb.mxu0 %v7496_v41  ;;  %4769 = vmatpush.bf16.msrb.mxu1 %v7500_v42  ;;  %v7585_v41 = vld [vmem:[%s10688_s3 + $0x830] sm:$0xf0] }
 0x2ed   :  { %v3685_v51 = vpop.f32.mrf.mxu2  ;;  %v3698_v52 = vpop.f32.mrf.mxu3 }
 0x2ee   :  { %v3704_v53 = vadd.f32 %v3685_v51, %v3594_v15  ;;  %v3705_v27 = vadd.f32 %v3698_v52, %v3595_v16  ;;  %v3661_v54 = vpop.f32.mrf.mxu0  ;;  %v3674_v55 = vpop.f32.mrf.mxu1  ;;  %v7540_v15 = vor.u32 %v8189_v1, %v7539_v62  ;;  %v7544_v16 = vor.u32 %v8187_v2, %v7541_v3  ;;  %v8192_v51 = vld [vmem:[%s10688_s3 + $0x80c] sm:$0xf]  ;;  %v7577_v52 = vld [vmem:[%s10688_s3 + $0x818] sm:$0xf0] }
 0x2ef   :  { %4783 = vmatpush.bf16.msrb.mxu2 %v7488_v47  ;;  %4796 = vmatpush.bf16.msrb.mxu3 %v7492_v48  ;;  %v7567_v54 = vld [vmem:[%s10688_s3 + $0x800] sm:$0xf]  ;;  %v8193_v55 = vld [vmem:[%s10688_s3 + $0x80c] sm:$0xf0]  ;;  %v7580_v59 = vor.u32 %v8192_v51, %v7577_v52  ;;  %v7572_v62 = vor.u32 %v8191_v56, %v7569_v57  ;;  %v8211_v52 = vld [vmem:[%s10688_s3 + $0x8a4] sm:$0xf] }
 0x2f0   :  { %4757 = vmatpush.bf16.msrb.mxu0 %v7480_v49  ;;  %4770 = vmatpush.bf16.msrb.mxu1 %v7484_v50  ;;  %v7575_v49 = vld [vmem:[%s10688_s3 + $0x808] sm:$0xf]  ;;  %v8194_v50 = vld [vmem:[%s10688_s3 + $0x814] sm:$0xf0]  ;;  %v7568_v60 = vor.u32 %v8193_v55, %v7567_v54  ;;  %v8213_v51 = vld [vmem:[%s10688_s3 + $0x8ac] sm:$0xf0] }
 0x2f1   :  { %v7576_v58 = vor.u32 %v8194_v50, %v7575_v49 }
 0x2f5   :  { %v3687_v63 = vpop.f32.mrf.mxu2  ;;  %v3700_v0 = vpop.f32.mrf.mxu3 }
 0x2f6   :  { %v3769_v4 = vpop.f32.mrf.mxu0  ;;  %v3782_v5 = vpop.f32.mrf.mxu1 }
 0x2f7   :  { %v3812_v7 = vadd.f32 %v3769_v4, %v3702_v33  ;;  %v3813_v8 = vadd.f32 %v3782_v5, %v3703_v34  ;;  %v8198_v33 = vld [vmem:[%s10688_s3 + $0x834] sm:$0xf0]  ;;  %v8196_v34 = vld [vmem:[%s10688_s3 + $0x82c] sm:$0xf] }
 0x2f8   :  { %v7592_v47 = vor.u32 %v8198_v33, %v7591_v32  ;;  %v7596_v48 = vor.u32 %v8196_v34, %v7593_v35  ;;  %v4806_v5 = vld [vmem:[#allocation2 + $0xf8] sm:$0xff]  ;;  %v7613_v32 = vld [vmem:[%s10688_s3 + $0x850] sm:$0xf0] }
 0x2f9   :  { %7465 = vmatmul.msk.bf16.vlgmr.msra.gmra.mxu0 %vm169_vm0, %v4587_v6  ;;  %7466 = vmatmul.msk.bf16.vlgmr.msra.gmra.mxu1 %vm169_vm0, %v4587_v6  ;;  %v4807_v18 = vpack.c.bf16 %v4806_v5, %v4806_v5  ;;  %v8207_v5 = vld [vmem:[%s10688_s3 + $0x884] sm:$0xf] }
 0x2fa   :  { %7467 = vmatmul.msk.bf16.vlgmr.msra.gmra.mxu2 %vm169_vm0, %v4587_v6  ;;  %7468 = vmatmul.msk.bf16.vlgmr.msra.gmra.mxu3 %vm169_vm0, %v4587_v6  ;;  %v7635_v6 = vld [vmem:[%s10688_s3 + $0x868] sm:$0xf] }
 0x2fb   :  { %4892 = vmatpush.bf16.msra.mxu2 %v7548_v9  ;;  %4905 = vmatpush.bf16.msra.mxu3 %v7552_v10  ;;  %v7637_v9 = vld [vmem:[%s10688_s3 + $0x878] sm:$0xf0]  ;;  %v7627_v10 = vld [vmem:[%s10688_s3 + $0x860] sm:$0xf] }
 0x2fc   :  { %4866 = vmatpush.bf16.msra.mxu0 %v7540_v15  ;;  %4879 = vmatpush.bf16.msra.mxu1 %v7544_v16  ;;  %v7629_v15 = vld [vmem:[%s10688_s3 + $0x870] sm:$0xf0] }
 0x2fd   :  { %v3795_v61 = vpop.f32.mrf.mxu2  ;;  %v3808_v25 = vpop.f32.mrf.mxu3 }
 0x2fe   :  { %v3814_v26 = vadd.f32 %v3795_v61, %v3704_v53  ;;  %v3815_v28 = vadd.f32 %v3808_v25, %v3705_v27  ;;  %v3771_v29 = vpop.f32.mrf.mxu0  ;;  %v3784_v30 = vpop.f32.mrf.mxu1  ;;  %v7584_v53 = vor.u32 %v8197_v39, %v7583_v36  ;;  %v7588_v27 = vor.u32 %v8195_v40, %v7585_v41  ;;  %v8200_v61 = vld [vmem:[%s10688_s3 + $0x84c] sm:$0xf]  ;;  %v7621_v25 = vld [vmem:[%s10688_s3 + $0x858] sm:$0xf0] }
 0x2ff   :  { %4893 = vmatpush.bf16.msra.mxu2 %v7532_v21  ;;  %4906 = vmatpush.bf16.msra.mxu3 %v7536_v22  ;;  %v7611_v29 = vld [vmem:[%s10688_s3 + $0x840] sm:$0xf]  ;;  %v8201_v30 = vld [vmem:[%s10688_s3 + $0x84c] sm:$0xf0]  ;;  %v7624_v34 = vor.u32 %v8200_v61, %v7621_v25  ;;  %v7616_v36 = vor.u32 %v8199_v31, %v7613_v32  ;;  %v8219_v25 = vld [vmem:[%s10688_s3 + $0x8e4] sm:$0xf] }
 0x300   :  { %4867 = vmatpush.bf16.msra.mxu0 %v7524_v23  ;;  %4880 = vmatpush.bf16.msra.mxu1 %v7528_v24  ;;  %v7619_v23 = vld [vmem:[%s10688_s3 + $0x848] sm:$0xf]  ;;  %v8202_v24 = vld [vmem:[%s10688_s3 + $0x854] sm:$0xf0]  ;;  %v7612_v35 = vor.u32 %v8201_v30, %v7611_v29  ;;  %v8221_v61 = vld [vmem:[%s10688_s3 + $0x8ec] sm:$0xf0] }
 0x301   :  { %v7620_v33 = vor.u32 %v8202_v24, %v7619_v23 }
 0x305   :  { %v3797_v37 = vpop.f32.mrf.mxu2  ;;  %v3810_v38 = vpop.f32.mrf.mxu3 }
 0x306   :  { %v3879_v42 = vpop.f32.mrf.mxu0  ;;  %v3892_v43 = vpop.f32.mrf.mxu1 }
 0x307   :  { %v3922_v45 = vadd.f32 %v3879_v42, %v3812_v7  ;;  %v3923_v46 = vadd.f32 %v3892_v43, %v3813_v8  ;;  %v8206_v7 = vld [vmem:[%s10688_s3 + $0x874] sm:$0xf0]  ;;  %v8204_v8 = vld [vmem:[%s10688_s3 + $0x86c] sm:$0xf]  ;;  %v4916_v43 = vld [vmem:[#allocation2 + $0x100] sm:$0xff] }
 0x308   :  { %v7636_v21 = vor.u32 %v8206_v7, %v7635_v6  ;;  %v7640_v22 = vor.u32 %v8204_v8, %v7637_v9  ;;  %v4917_v55 = vpack.c.bf16 %v4916_v43, %v4916_v43  ;;  %v7657_v6 = vld [vmem:[%s10688_s3 + $0x890] sm:$0xf0]  ;;  %v8215_v43 = vld [vmem:[%s10688_s3 + $0x8c4] sm:$0xf] }
 0x309   :  { %7509 = vmatmul.msk.bf16.vlgmr.msrb.gmra.mxu0 %vm169_vm0, %v4697_v44  ;;  %7510 = vmatmul.msk.bf16.vlgmr.msrb.gmra.mxu1 %vm169_vm0, %v4697_v44 }
 0x30a   :  { %7511 = vmatmul.msk.bf16.vlgmr.msrb.gmra.mxu2 %vm169_vm0, %v4697_v44  ;;  %7512 = vmatmul.msk.bf16.vlgmr.msrb.gmra.mxu3 %vm169_vm0, %v4697_v44  ;;  %v7679_v44 = vld [vmem:[%s10688_s3 + $0x8a8] sm:$0xf] }
 0x30b   :  { %5002 = vmatpush.bf16.msrb.mxu2 %v7592_v47  ;;  %5015 = vmatpush.bf16.msrb.mxu3 %v7596_v48  ;;  %v7681_v47 = vld [vmem:[%s10688_s3 + $0x8b8] sm:$0xf0]  ;;  %v7671_v48 = vld [vmem:[%s10688_s3 + $0x8a0] sm:$0xf] }
 0x30c   :  { %4976 = vmatpush.bf16.msrb.mxu0 %v7584_v53  ;;  %4989 = vmatpush.bf16.msrb.mxu1 %v7588_v27  ;;  %v7673_v53 = vld [vmem:[%s10688_s3 + $0x8b0] sm:$0xf0] }
 0x30d   :  { %v3905_v63 = vpop.f32.mrf.mxu2  ;;  %v3918_v0 = vpop.f32.mrf.mxu3 }
 0x30e   :  { %v3924_v1 = vadd.f32 %v3905_v63, %v3814_v26  ;;  %v3925_v2 = vadd.f32 %v3918_v0, %v3815_v28  ;;  %v3881_v3 = vpop.f32.mrf.mxu0  ;;  %v3894_v4 = vpop.f32.mrf.mxu1  ;;  %v7628_v26 = vor.u32 %v8205_v13, %v7627_v10  ;;  %v7632_v28 = vor.u32 %v8203_v14, %v7629_v15  ;;  %v8208_v63 = vld [vmem:[%s10688_s3 + $0x88c] sm:$0xf]  ;;  %v7665_v0 = vld [vmem:[%s10688_s3 + $0x898] sm:$0xf0] }
 0x30f   :  { %5003 = vmatpush.bf16.msrb.mxu2 %v7576_v58  ;;  %5016 = vmatpush.bf16.msrb.mxu3 %v7580_v59  ;;  %v7655_v3 = vld [vmem:[%s10688_s3 + $0x880] sm:$0xf]  ;;  %v8209_v4 = vld [vmem:[%s10688_s3 + $0x88c] sm:$0xf0]  ;;  %v7668_v8 = vor.u32 %v8208_v63, %v7665_v0  ;;  %v7660_v10 = vor.u32 %v8207_v5, %v7657_v6  ;;  %v5246_v5 = vld [vmem:[#allocation2 + $0x118] sm:$0xff] }
 0x310   :  { %4977 = vmatpush.bf16.msrb.mxu0 %v7568_v60  ;;  %4990 = vmatpush.bf16.msrb.mxu1 %v7572_v62  ;;  %v7663_v60 = vld [vmem:[%s10688_s3 + $0x888] sm:$0xf]  ;;  %v8210_v62 = vld [vmem:[%s10688_s3 + $0x894] sm:$0xf0]  ;;  %v7656_v9 = vor.u32 %v8209_v4, %v7655_v3 }
 0x311   :  { %v7664_v7 = vor.u32 %v8210_v62, %v7663_v60 }
 0x315   :  { %v3907_v11 = vpop.f32.mrf.mxu2  ;;  %v3920_v12 = vpop.f32.mrf.mxu3 }
 0x316   :  { %v3989_v16 = vpop.f32.mrf.mxu0  ;;  %v4002_v17 = vpop.f32.mrf.mxu1 }
 0x317   :  { %v4032_v19 = vadd.f32 %v3989_v16, %v3922_v45  ;;  %v4033_v20 = vadd.f32 %v4002_v17, %v3923_v46  ;;  %v8214_v45 = vld [vmem:[%s10688_s3 + $0x8b4] sm:$0xf0]  ;;  %v8212_v46 = vld [vmem:[%s10688_s3 + $0x8ac] sm:$0xf] }
 0x318   :  { %v7680_v58 = vor.u32 %v8214_v45, %v7679_v44  ;;  %v7684_v59 = vor.u32 %v8212_v46, %v7681_v47  ;;  %v5026_v17 = vld [vmem:[#allocation2 + $0x108] sm:$0xff]  ;;  %v7701_v44 = vld [vmem:[%s10688_s3 + $0x8d0] sm:$0xf0] }
 0x319   :  { %7553 = vmatmul.msk.bf16.vlgmr.msra.gmra.mxu0 %vm169_vm0, %v4807_v18  ;;  %7554 = vmatmul.msk.bf16.vlgmr.msra.gmra.mxu1 %vm169_vm0, %v4807_v18  ;;  %v5027_v30 = vpack.c.bf16 %v5026_v17, %v5026_v17 }
 0x31a   :  { %7555 = vmatmul.msk.bf16.vlgmr.msra.gmra.mxu2 %vm169_vm0, %v4807_v18  ;;  %7556 = vmatmul.msk.bf16.vlgmr.msra.gmra.mxu3 %vm169_vm0, %v4807_v18  ;;  %v7723_v18 = vld [vmem:[%s10688_s3 + $0x8e8] sm:$0xf] }
 0x31b   :  { %5112 = vmatpush.bf16.msra.mxu2 %v7636_v21  ;;  %5125 = vmatpush.bf16.msra.mxu3 %v7640_v22  ;;  %v7725_v21 = vld [vmem:[%s10688_s3 + $0x8f8] sm:$0xf0]  ;;  %v7715_v22 = vld [vmem:[%s10688_s3 + $0x8e0] sm:$0xf] }
 0x31c   :  { %5086 = vmatpush.bf16.msra.mxu0 %v7628_v26  ;;  %5099 = vmatpush.bf16.msra.mxu1 %v7632_v28  ;;  %v7717_v26 = vld [vmem:[%s10688_s3 + $0x8f0] sm:$0xf0] }
 0x31d   :  { %v4015_v37 = vpop.f32.mrf.mxu2  ;;  %v4028_v38 = vpop.f32.mrf.mxu3 }
 0x31e   :  { %v4034_v39 = vadd.f32 %v4015_v37, %v3924_v1  ;;  %v4035_v40 = vadd.f32 %v4028_v38, %v3925_v2  ;;  %v3991_v41 = vpop.f32.mrf.mxu0  ;;  %v4004_v42 = vpop.f32.mrf.mxu1  ;;  %v7672_v1 = vor.u32 %v8213_v51, %v7671_v48  ;;  %v7676_v2 = vor.u32 %v8211_v52, %v7673_v53  ;;  %v8216_v37 = vld [vmem:[%s10688_s3 + $0x8cc] sm:$0xf]  ;;  %v7709_v38 = vld [vmem:[%s10688_s3 + $0x8d8] sm:$0xf0] }
 0x31f   :  { %5113 = vmatpush.bf16.msra.mxu2 %v7620_v33  ;;  %5126 = vmatpush.bf16.msra.mxu3 %v7624_v34  ;;  %v7699_v41 = vld [vmem:[%s10688_s3 + $0x8c0] sm:$0xf]  ;;  %v8217_v42 = vld [vmem:[%s10688_s3 + $0x8cc] sm:$0xf0]  ;;  %v7712_v46 = vor.u32 %v8216_v37, %v7709_v38  ;;  %v7704_v48 = vor.u32 %v8215_v43, %v7701_v44 }
 0x320   :  { %5087 = vmatpush.bf16.msra.mxu0 %v7612_v35  ;;  %5100 = vmatpush.bf16.msra.mxu1 %v7616_v36  ;;  %v7707_v35 = vld [vmem:[%s10688_s3 + $0x8c8] sm:$0xf]  ;;  %v8218_v36 = vld [vmem:[%s10688_s3 + $0x8d4] sm:$0xf0]  ;;  %v7700_v47 = vor.u32 %v8217_v42, %v7699_v41 }
 0x321   :  { %v7708_v45 = vor.u32 %v8218_v36, %v7707_v35 }
 0x325   :  { %v4017_v49 = vpop.f32.mrf.mxu2  ;;  %v4030_v50 = vpop.f32.mrf.mxu3 }
 0x326   :  { %v4099_v27 = vpop.f32.mrf.mxu0  ;;  %v4112_v54 = vpop.f32.mrf.mxu1 }
 0x327   :  { %v4142_v56 = vadd.f32 %v4099_v27, %v4032_v19  ;;  %v4143_v57 = vadd.f32 %v4112_v54, %v4033_v20  ;;  %v8222_v19 = vld [vmem:[%s10688_s3 + $0x8f4] sm:$0xf0]  ;;  %v8220_v20 = vld [vmem:[%s10688_s3 + $0x8ec] sm:$0xf]  ;;  %v5136_v54 = vld [vmem:[#allocation2 + $0x110] sm:$0xff] }
 0x328   :  { %v7724_v33 = vor.u32 %v8222_v19, %v7723_v18  ;;  %v7728_v34 = vor.u32 %v8220_v20, %v7725_v21  ;;  %v5137_v62 = vpack.c.bf16 %v5136_v54, %v5136_v54 }
 0x329   :  { %7597 = vmatmul.msk.bf16.vlgmr.msrb.gmra.mxu0 %vm169_vm0, %v4917_v55  ;;  %7598 = vmatmul.msk.bf16.vlgmr.msrb.gmra.mxu1 %vm169_vm0, %v4917_v55 }
 0x32a   :  { %7599 = vmatmul.msk.bf16.vlgmr.msrb.gmra.mxu2 %vm169_vm0, %v4917_v55  ;;  %7600 = vmatmul.msk.bf16.vlgmr.msrb.gmra.mxu3 %vm169_vm0, %v4917_v55 }
 0x32b   :  { %5222 = vmatpush.bf16.msrb.mxu2 %v7680_v58  ;;  %5235 = vmatpush.bf16.msrb.mxu3 %v7684_v59 }
 0x32c   :  { %5196 = vmatpush.bf16.msrb.mxu0 %v7672_v1  ;;  %5209 = vmatpush.bf16.msrb.mxu1 %v7676_v2 }
 0x32d   :  { %v4125_v11 = vpop.f32.mrf.mxu2  ;;  %v4138_v12 = vpop.f32.mrf.mxu3 }
 0x32e   :  { %v4144_v13 = vadd.f32 %v4125_v11, %v4034_v39  ;;  %v4145_v14 = vadd.f32 %v4138_v12, %v4035_v40  ;;  %v4101_v15 = vpop.f32.mrf.mxu0  ;;  %v4114_v16 = vpop.f32.mrf.mxu1  ;;  %v7716_v39 = vor.u32 %v8221_v61, %v7715_v22  ;;  %v7720_v40 = vor.u32 %v8219_v25, %v7717_v26 }
 0x32f   :  { %5223 = vmatpush.bf16.msrb.mxu2 %v7664_v7  ;;  %5236 = vmatpush.bf16.msrb.mxu3 %v7668_v8  ;;  %v5247_v12 = vpack.c.bf16 %v5246_v5, %v5246_v5 }
 0x330   :  { %5197 = vmatpush.bf16.msrb.mxu0 %v7656_v9  ;;  %5210 = vmatpush.bf16.msrb.mxu1 %v7660_v10 }
 0x335   :  { %v4127_v23 = vpop.f32.mrf.mxu2  ;;  %v4140_v24 = vpop.f32.mrf.mxu3 }
 0x336   :  { %v4209_v28 = vpop.f32.mrf.mxu0  ;;  %v4222_v29 = vpop.f32.mrf.mxu1 }
 0x337   :  { %v4252_v31 = vadd.f32 %v4209_v28, %v4142_v56  ;;  %v4253_v32 = vadd.f32 %v4222_v29, %v4143_v57 }
 0x339   :  { %7641 = vmatmul.msk.bf16.vlgmr.msra.gmra.mxu0 %vm169_vm0, %v5027_v30  ;;  %7642 = vmatmul.msk.bf16.vlgmr.msra.gmra.mxu1 %vm169_vm0, %v5027_v30 }
 0x33a   :  { %7643 = vmatmul.msk.bf16.vlgmr.msra.gmra.mxu2 %vm169_vm0, %v5027_v30  ;;  %7644 = vmatmul.msk.bf16.vlgmr.msra.gmra.mxu3 %vm169_vm0, %v5027_v30 }
 0x33b   :  { %5332 = vmatpush.bf16.msra.mxu2 %v7724_v33  ;;  %5345 = vmatpush.bf16.msra.mxu3 %v7728_v34 }
 0x33c   :  { %5306 = vmatpush.bf16.msra.mxu0 %v7716_v39  ;;  %5319 = vmatpush.bf16.msra.mxu1 %v7720_v40 }
 0x33d   :  { %v4235_v49 = vpop.f32.mrf.mxu2  ;;  %v4248_v50 = vpop.f32.mrf.mxu3 }
 0x33e   :  { %v4254_v51 = vadd.f32 %v4235_v49, %v4144_v13  ;;  %v4255_v52 = vadd.f32 %v4248_v50, %v4145_v14  ;;  %v4211_v53 = vpop.f32.mrf.mxu0  ;;  %v4224_v27 = vpop.f32.mrf.mxu1 }
 0x33f   :  { %5333 = vmatpush.bf16.msra.mxu2 %v7708_v45  ;;  %5346 = vmatpush.bf16.msra.mxu3 %v7712_v46 }
 0x340   :  { %5307 = vmatpush.bf16.msra.mxu0 %v7700_v47  ;;  %5320 = vmatpush.bf16.msra.mxu1 %v7704_v48 }
 0x345   :  { %v4237_v55 = vpop.f32.mrf.mxu2  ;;  %v4250_v56 = vpop.f32.mrf.mxu3 }
 0x346   :  { %v4319_v57 = vpop.f32.mrf.mxu0  ;;  %v4332_v58 = vpop.f32.mrf.mxu1 }
 0x347   :  { %v4362_v59 = vadd.f32 %v4319_v57, %v4252_v31  ;;  %v4363_v60 = vadd.f32 %v4332_v58, %v4253_v32 }
 0x349   :  { %7685 = vmatmul.msk.bf16.vlgmr.msrb.gmra.mxu0 %vm169_vm0, %v5137_v62  ;;  %7686 = vmatmul.msk.bf16.vlgmr.msrb.gmra.mxu1 %vm169_vm0, %v5137_v62 }
 0x34a   :  { %7687 = vmatmul.msk.bf16.vlgmr.msrb.gmra.mxu2 %vm169_vm0, %v5137_v62  ;;  %7688 = vmatmul.msk.bf16.vlgmr.msrb.gmra.mxu3 %vm169_vm0, %v5137_v62 }
 0x34d   :  { %v4345_v63 = vpop.f32.mrf.mxu2  ;;  %v4358_v0 = vpop.f32.mrf.mxu3 }
 0x34e   :  { %v4364_v1 = vadd.f32 %v4345_v63, %v4254_v51  ;;  %v4365_v2 = vadd.f32 %v4358_v0, %v4255_v52  ;;  %v4321_v3 = vpop.f32.mrf.mxu0  ;;  %v4334_v4 = vpop.f32.mrf.mxu1  ;;  %v8230_v63 = vld [vmem:[%s10693_s5 + $0x38] sm:$0xff] }
 0x34f   :  { %v8238_v0 = vld [vmem:[%s10693_s5 + $0x78] sm:$0xff]  ;;  %5624 = vmatpush.bf16.msrb.mxu0 %v8230_v63 }
 0x350   :  { %5637 = vmatpush.bf16.msrb.mxu1 %v8238_v0  ;;  %v8246_v3 = vld [vmem:[%s10693_s5 + $0xb8] sm:$0xff] }
 0x351   :  { %v8254_v4 = vld [vmem:[%s10693_s5 + $0xf8] sm:$0xff]  ;;  %5650 = vmatpush.bf16.msrb.mxu2 %v8246_v3 }
 0x352   :  { %5663 = vmatpush.bf16.msrb.mxu3 %v8254_v4 }
 0x355   :  { %v4347_v6 = vpop.f32.mrf.mxu2  ;;  %v4360_v7 = vpop.f32.mrf.mxu3 }
 0x356   :  { %v4429_v8 = vpop.f32.mrf.mxu0  ;;  %v4442_v9 = vpop.f32.mrf.mxu1 }
 0x357   :  { %v4472_v10 = vadd.f32 %v4429_v8, %v4362_v59  ;;  %v4473_v11 = vadd.f32 %v4442_v9, %v4363_v60  ;;  %v8228_v9 = vld [vmem:[%s10693_s5 + $0x28] sm:$0xff] }
 0x359   :  { %7729 = vmatmul.msk.bf16.vlgmr.msra.gmra.mxu0 %vm169_vm0, %v5247_v12  ;;  %7730 = vmatmul.msk.bf16.vlgmr.msra.gmra.mxu1 %vm169_vm0, %v5247_v12 }
 0x35a   :  { %7731 = vmatmul.msk.bf16.vlgmr.msra.gmra.mxu2 %vm169_vm0, %v5247_v12  ;;  %7732 = vmatmul.msk.bf16.vlgmr.msra.gmra.mxu3 %vm169_vm0, %v5247_v12  ;;  %v8253_v12 = vld [vmem:[%s10693_s5 + $0xf0] sm:$0xff] }
 0x35b   :  { %5664 = vmatpush.bf16.msrb.mxu3 %v8253_v12 }
 0x35d   :  { %v4455_v13 = vpop.f32.mrf.mxu2  ;;  %v4468_v14 = vpop.f32.mrf.mxu3 }
 0x35e   :  { %v4474_v15 = vadd.f32 %v4455_v13, %v4364_v1  ;;  %v4475_v16 = vadd.f32 %v4468_v14, %v4365_v2  ;;  %v4431_v17 = vpop.f32.mrf.mxu0  ;;  %v4444_v18 = vpop.f32.mrf.mxu1  ;;  %v8229_v1 = vld [vmem:[%s10693_s5 + $0x30] sm:$0xff]  ;;  %v8227_v13 = vld [vmem:[%s10693_s5 + $0x20] sm:$0xff] }
 0x35f   :  { %v8237_v2 = vld [vmem:[%s10693_s5 + $0x70] sm:$0xff]  ;;  %5625 = vmatpush.bf16.msrb.mxu0 %v8229_v1  ;;  %v8235_v14 = vld [vmem:[%s10693_s5 + $0x60] sm:$0xff] }
 0x360   :  { %5638 = vmatpush.bf16.msrb.mxu1 %v8237_v2 }
 0x363   :  { %5626 = vmatpush.bf16.msrb.mxu0 %v8228_v9 }
 0x365   :  { %v4457_v19 = vpop.f32.mrf.mxu2  ;;  %v4470_v20 = vpop.f32.mrf.mxu3 }
 0x366   :  { %v4539_v21 = vpop.f32.mrf.mxu0  ;;  %v4552_v22 = vpop.f32.mrf.mxu1 }
 0x367   :  { %v4582_v23 = vadd.f32 %v4539_v21, %v4472_v10  ;;  %v4583_v24 = vadd.f32 %v4552_v22, %v4473_v11  ;;  %v8236_v10 = vld [vmem:[%s10693_s5 + $0x68] sm:$0xff]  ;;  %v8245_v11 = vld [vmem:[%s10693_s5 + $0xb0] sm:$0xff]  ;;  %5627 = vmatpush.bf16.msrb.mxu0 %v8227_v13  ;;  %v8226_v21 = vld [vmem:[%s10693_s5 + $0x18] sm:$0xff] }
 0x368   :  { %5639 = vmatpush.bf16.msrb.mxu1 %v8236_v10  ;;  %5651 = vmatpush.bf16.msrb.mxu2 %v8245_v11  ;;  %v8234_v22 = vld [vmem:[%s10693_s5 + $0x58] sm:$0xff] }
 0x36b   :  { %5628 = vmatpush.bf16.msrb.mxu0 %v8226_v21 }
 0x36c   :  { %5640 = vmatpush.bf16.msrb.mxu1 %v8235_v14 }
 0x36d   :  { %v4565_v61 = vpop.f32.mrf.mxu2  ;;  %v4578_v25 = vpop.f32.mrf.mxu3 }
 0x36e   :  { %v4584_v26 = vadd.f32 %v4565_v61, %v4474_v15  ;;  %v4585_v28 = vadd.f32 %v4578_v25, %v4475_v16  ;;  %v4541_v29 = vpop.f32.mrf.mxu0  ;;  %v4554_v30 = vpop.f32.mrf.mxu1  ;;  %v8244_v15 = vld [vmem:[%s10693_s5 + $0xa8] sm:$0xff]  ;;  %v8225_v61 = vld [vmem:[%s10693_s5 + $0x10] sm:$0xff] }
 0x36f   :  { %v8252_v16 = vld [vmem:[%s10693_s5 + $0xe8] sm:$0xff]  ;;  %5652 = vmatpush.bf16.msrb.mxu2 %v8244_v15  ;;  %v8233_v25 = vld [vmem:[%s10693_s5 + $0x50] sm:$0xff]  ;;  %5629 = vmatpush.bf16.msrb.mxu0 %v8225_v61 }
 0x370   :  { %5665 = vmatpush.bf16.msrb.mxu3 %v8252_v16  ;;  %5641 = vmatpush.bf16.msrb.mxu1 %v8234_v22 }
 0x374   :  { %5642 = vmatpush.bf16.msrb.mxu1 %v8233_v25 }
 0x375   :  { %v4567_v31 = vpop.f32.mrf.mxu2  ;;  %v4580_v32 = vpop.f32.mrf.mxu3 }
 0x376   :  { %v4649_v33 = vpop.f32.mrf.mxu0  ;;  %v4662_v34 = vpop.f32.mrf.mxu1 }
 0x377   :  { %v4692_v35 = vadd.f32 %v4649_v33, %v4582_v23  ;;  %v4693_v36 = vadd.f32 %v4662_v34, %v4583_v24  ;;  %v8243_v23 = vld [vmem:[%s10693_s5 + $0xa0] sm:$0xff]  ;;  %v8224_v33 = vld [vmem:[%s10693_s5 + $0x8] sm:$0xff] }
 0x378   :  { %v8251_v24 = vld [vmem:[%s10693_s5 + $0xe0] sm:$0xff]  ;;  %5653 = vmatpush.bf16.msrb.mxu2 %v8243_v23  ;;  %v8232_v34 = vld [vmem:[%s10693_s5 + $0x48] sm:$0xff]  ;;  %5630 = vmatpush.bf16.msrb.mxu0 %v8224_v33 }
 0x379   :  { %5666 = vmatpush.bf16.msrb.mxu3 %v8251_v24  ;;  %5643 = vmatpush.bf16.msrb.mxu1 %v8232_v34 }
 0x37d   :  { %v4675_v37 = vpop.f32.mrf.mxu2  ;;  %v4688_v38 = vpop.f32.mrf.mxu3 }
 0x37e   :  { %v4694_v39 = vadd.f32 %v4675_v37, %v4584_v26  ;;  %v4695_v40 = vadd.f32 %v4688_v38, %v4585_v28  ;;  %v4651_v41 = vpop.f32.mrf.mxu0  ;;  %v4664_v42 = vpop.f32.mrf.mxu1  ;;  %v8242_v26 = vld [vmem:[%s10693_s5 + $0x98] sm:$0xff]  ;;  %v8223_v37 = vld [vmem:[%s10693_s5] sm:$0xff] }
 0x37f   :  { %v8250_v28 = vld [vmem:[%s10693_s5 + $0xd8] sm:$0xff]  ;;  %5654 = vmatpush.bf16.msrb.mxu2 %v8242_v26  ;;  %v8231_v38 = vld [vmem:[%s10693_s5 + $0x40] sm:$0xff]  ;;  %5631 = vmatpush.bf16.msrb.mxu0 %v8223_v37 }
 0x380   :  { %5667 = vmatpush.bf16.msrb.mxu3 %v8250_v28  ;;  %5644 = vmatpush.bf16.msrb.mxu1 %v8231_v38 }
 0x385   :  { %v4677_v43 = vpop.f32.mrf.mxu2  ;;  %v4690_v44 = vpop.f32.mrf.mxu3 }
 0x386   :  { %v4759_v45 = vpop.f32.mrf.mxu0  ;;  %v4772_v46 = vpop.f32.mrf.mxu1 }
 0x387   :  { %v10549_v47 = vadd.f32 %v4759_v45, %v4692_v35  ;;  %v10551_v48 = vadd.f32 %v4772_v46, %v4693_v36  ;;  %v8241_v35 = vld [vmem:[%s10693_s5 + $0x90] sm:$0xff]  ;;  %v8239_v45 = vld [vmem:[%s10693_s5 + $0x80] sm:$0xff] }
 0x388   :  { %v8249_v36 = vld [vmem:[%s10693_s5 + $0xd0] sm:$0xff]  ;;  %5655 = vmatpush.bf16.msrb.mxu2 %v8241_v35  ;;  %v8247_v46 = vld [vmem:[%s10693_s5 + $0xc0] sm:$0xff] }
 0x389   :  { %5668 = vmatpush.bf16.msrb.mxu3 %v8249_v36 }
 0x38d   :  { %v4785_v49 = vpop.f32.mrf.mxu2  ;;  %v4798_v50 = vpop.f32.mrf.mxu3 }
 0x38e   :  { %v10553_v51 = vadd.f32 %v4785_v49, %v4694_v39  ;;  %v10555_v52 = vadd.f32 %v4798_v50, %v4695_v40  ;;  %v4761_v53 = vpop.f32.mrf.mxu0  ;;  %v4774_v27 = vpop.f32.mrf.mxu1  ;;  %v8240_v39 = vld [vmem:[%s10693_s5 + $0x88] sm:$0xff] }
 0x38f   :  { %v8248_v40 = vld [vmem:[%s10693_s5 + $0xc8] sm:$0xff]  ;;  %5656 = vmatpush.bf16.msrb.mxu2 %v8240_v39 }
 0x390   :  { %5669 = vmatpush.bf16.msrb.mxu3 %v8248_v40 }
 0x393   :  { %5657 = vmatpush.bf16.msrb.mxu2 %v8239_v45 }
 0x394   :  { %5670 = vmatpush.bf16.msrb.mxu3 %v8247_v46 }
 0x395   :  { %v4787_v54 = vpop.f32.mrf.mxu2  ;;  %v4800_v55 = vpop.f32.mrf.mxu3 }
 0x396   :  { %v10557_v56 = vpop.f32.mrf.mxu0  ;;  %v10559_v57 = vpop.f32.mrf.mxu1 }
 0x397   :  { %v4912_v63 = vadd.f32 %v10557_v56, %v10549_v47  ;;  %v4913_v0 = vadd.f32 %v10559_v57, %v10551_v48 }
 0x39d   :  { %v10561_v58 = vpop.f32.mrf.mxu2  ;;  %v10563_v59 = vpop.f32.mrf.mxu3 }
 0x39e   :  { %v4871_v60 = vpop.f32.mrf.mxu0  ;;  %v4884_v62 = vpop.f32.mrf.mxu1  ;;  %v4914_v11 = vadd.f32 %v10561_v58, %v10553_v51  ;;  %v4915_v12 = vadd.f32 %v10563_v59, %v10555_v52 }
 0x3a5   :  { %v4897_v5 = vpop.f32.mrf.mxu2  ;;  %v4910_v6 = vpop.f32.mrf.mxu3 }
 0x3a6   :  { %v10583_v7 = vpop.f32.mrf.mxu0  ;;  %v10585_v8 = vpop.f32.mrf.mxu1 }
 0x3a7   :  { %v5022_v1 = vadd.f32 %v10583_v7, %v4912_v63  ;;  %v5023_v2 = vadd.f32 %v10585_v8, %v4913_v0 }
 0x3ad   :  { %v10611_v17 = vpop.f32.mrf.mxu2  ;;  %v10613_v18 = vpop.f32.mrf.mxu3 }
 0x3ae   :  { %v4981_v19 = vpop.f32.mrf.mxu0  ;;  %v4994_v20 = vpop.f32.mrf.mxu1  ;;  %v5024_v57 = vadd.f32 %v10611_v17, %v4914_v11  ;;  %v5025_v7 = vadd.f32 %v10613_v18, %v4915_v12 }
 0x3b5   :  { %v5007_v29 = vpop.f32.mrf.mxu2  ;;  %v5020_v30 = vpop.f32.mrf.mxu3 }
 0x3b6   :  { %v5089_v31 = vpop.f32.mrf.mxu0  ;;  %v5102_v32 = vpop.f32.mrf.mxu1 }
 0x3b7   :  { %v5132_v3 = vadd.f32 %v5089_v31, %v5022_v1  ;;  %v5133_v4 = vadd.f32 %v5102_v32, %v5023_v2  ;;  %v8256_v31 = vld [vmem:[%s10692_s6] ss:$0 sm:$0xff] }
 0x3bd   :  { %v5115_v41 = vpop.f32.mrf.mxu2  ;;  %v5128_v42 = vpop.f32.mrf.mxu3 }
 0x3be   :  { %v5091_v43 = vpop.f32.mrf.mxu0  ;;  %v5104_v44 = vpop.f32.mrf.mxu1  ;;  %v5134_v15 = vadd.f32 %v5115_v41, %v5024_v57  ;;  %v5135_v16 = vadd.f32 %v5128_v42, %v5025_v7 }
 0x3c5   :  { %v5117_v49 = vpop.f32.mrf.mxu2  ;;  %v5130_v50 = vpop.f32.mrf.mxu3 }
 0x3c6   :  { %v5199_v53 = vpop.f32.mrf.mxu0  ;;  %v5212_v27 = vpop.f32.mrf.mxu1 }
 0x3c7   :  { %v5242_v5 = vadd.f32 %v5199_v53, %v5132_v3  ;;  %v5243_v6 = vadd.f32 %v5212_v27, %v5133_v4 }
 0x3cd   :  { %v5225_v54 = vpop.f32.mrf.mxu2  ;;  %v5238_v55 = vpop.f32.mrf.mxu3 }
 0x3ce   :  { %v5201_v60 = vpop.f32.mrf.mxu0  ;;  %v5214_v62 = vpop.f32.mrf.mxu1  ;;  %v5244_v21 = vadd.f32 %v5225_v54, %v5134_v15  ;;  %v5245_v22 = vadd.f32 %v5238_v55, %v5135_v16 }
 0x3d5   :  { %v5227_v9 = vpop.f32.mrf.mxu2  ;;  %v5240_v10 = vpop.f32.mrf.mxu3 }
 0x3d6   :  { %v5309_v47 = vpop.f32.mrf.mxu0  ;;  %v5322_v56 = vpop.f32.mrf.mxu1 }
 0x3d7   :  { %v5352_v13 = vadd.f32 %v5309_v47, %v5242_v5  ;;  %v5353_v48 = vadd.f32 %v5322_v56, %v5243_v6 }
 0x3d9   :  { %v5356_v8 = vmax.f32 %v5352_v13, 0.0  ;;  %v5357_v14 = vmax.f32 %v5353_v48, 0.0 }
 0x3db   :  { %v5360_v19 = vpack.c.bf16 %v5356_v8, %v5356_v8  ;;  %v5361_v20 = vpack.c.bf16 %v5357_v14, %v5357_v14 }
 0x3dd   :  { %v5335_v51 = vpop.f32.mrf.mxu2  ;;  %v5348_v58 = vpop.f32.mrf.mxu3  ;;  %5632 = vmatmul.bf16.vlgmr.msrb.gmra.mxu0 %v5360_v19  ;;  %5645 = vmatmul.bf16.vlgmr.msrb.gmra.mxu1 %v5361_v20 }
 0x3de   :  { %v5354_v52 = vadd.f32 %v5335_v51, %v5244_v21  ;;  %v5355_v59 = vadd.f32 %v5348_v58, %v5245_v22  ;;  %v5311_v23 = vpop.f32.mrf.mxu0  ;;  %v5324_v24 = vpop.f32.mrf.mxu1 }
 0x3e0   :  { %v5358_v61 = vmax.f32 %v5354_v52, 0.0  ;;  %v5359_v17 = vmax.f32 %v5355_v59, 0.0 }
 0x3e2   :  { %v5362_v25 = vpack.c.bf16 %v5358_v61, %v5358_v61  ;;  %v5363_v18 = vpack.c.bf16 %v5359_v17, %v5359_v17 }
 0x3e4   :  { %5658 = vmatmul.bf16.vlgmr.msrb.gmra.mxu2 %v5362_v25  ;;  %5671 = vmatmul.bf16.vlgmr.msrb.gmra.mxu3 %v5363_v18 }
 0x3e5   :  { %v5337_v26 = vpop.f32.mrf.mxu2  ;;  %v5350_v28 = vpop.f32.mrf.mxu3 }
 0x45a   :  { %v5633_v29 = vpop.f32.mrf.mxu0  ;;  %v5646_v30 = vpop.f32.mrf.mxu1 }
 0x45b   :  { %v5634_v32 = vadd.f32 %v8256_v31, %v5633_v29 }
 0x45d   :  { %v5647_v35 = vadd.f32 %v5646_v30, %v5634_v32 }
 0x462   :  { %v5635_v33 = vpop.f32.mrf.mxu0  ;;  %v5648_v34 = vpop.f32.mrf.mxu1 }
 0x467   :  { %v5659_v36 = vpop.f32.mrf.mxu2  ;;  %v5672_v37 = vpop.f32.mrf.mxu3 }
 0x468   :  { %v5660_v38 = vadd.f32 %v5659_v36, %v5647_v35 }
 0x46a   :  { %v5673_v39 = vadd.f32 %v5672_v37, %v5660_v38 }
 0x46c   :  { %5676 = vst [vmem:[%s10694_s7] sm:$0xff] %v5673_v39 }
 0x46f   :  { %v5661_v40 = vpop.f32.mrf.mxu2  ;;  %v5674_v41 = vpop.f32.mrf.mxu3 }

</bundles_post_ra>
